<compile_context>
chip_gen: v5e
topology: v5e:2x2
jax: 0.10.0
libtpu: 0.0.40
codegen_flags: <defaults>
</compile_context>

<pallas_src>
import functools
import math

import jax
import jax.numpy as jnp
from jax.experimental import pallas as pl
from jax.experimental.pallas import tpu as pltpu


def _round_up(x, m):
    return (x + m - 1) // m * m


SIGW = 128  # lane width reserved for the sigma projection (only column 0 used)


def _anomaly_kernel(
    d_model, n_real,                       # static: real feature width / window len
    x_ref,                                 # (WB, Np, Dp)  zero-padded windows
    wf_ref,                                # (Dp, 3*Dp + SIGW) fused [Wq|Wk|Wv|Ws]
    ln1_g_ref, ln1_b_ref,                  # (1, Dp) f32
    wh_ref, bh_ref,                        # (Dp, Hp) mxu, (1, Hp) f32
    wo_ref, bo_ref,                        # (Hp, Dp) mxu, (1, Dp) f32
    ln2_g_ref, ln2_b_ref,                  # (1, Dp) f32
    xhat_ref, p_ref, s_ref,                # (WB,TQ,Dp), (WB,TQ,Np), (WB,TQ,Np)
    proj_ref,                              # VMEM scratch (WB, Np, 3*Dp + SIGW)
):
    qi = pl.program_id(1)
    wb, n_pad, d_pad = x_ref.shape
    tq = p_ref.shape[1]
    feat = wf_ref.shape[1]

    # Fused Q/K/V/sigma projection: one lane-dense MXU pass per window block,
    # kept resident in VMEM scratch across all query tiles of these windows.
    @pl.when(qi == 0)
    def _():
        x2d = x_ref[...].reshape(wb * n_pad, d_pad)
        proj = jnp.dot(x2d, wf_ref[...], preferred_element_type=jnp.float32)
        proj_ref[...] = proj.reshape(wb, n_pad, feat).astype(proj_ref.dtype)

    q0 = pl.multiple_of(qi * tq, tq)
    q_tile = proj_ref[:, pl.ds(q0, tq), 0:d_pad]                    # (WB,TQ,Dp)
    k_full = proj_ref[:, :, d_pad:2 * d_pad]                        # (WB,Np,Dp)
    v_full = proj_ref[:, :, 2 * d_pad:3 * d_pad]                    # (WB,Np,Dp)
    sigma = proj_ref[:, pl.ds(q0, tq), pl.ds(3 * d_pad, SIGW)][:, :, 0:1]
    sigma = sigma.astype(jnp.float32)                               # (WB,TQ,1)

    # In-kernel (i-j)^2 and key-validity mask (padded keys j >= n_real).
    row_i = jax.lax.broadcasted_iota(jnp.int32, (tq, n_pad), 0) + qi * tq
    col_i = jax.lax.broadcasted_iota(jnp.int32, (tq, n_pad), 1)
    diff = (row_i - col_i).astype(jnp.float32)
    dist2 = diff * diff                                             # (TQ, Np)
    key_ok = col_i < n_real
    kmask = key_ok.astype(jnp.float32)
    neg_bias = jnp.where(key_ok, 0.0, -1e30).astype(jnp.float32)

    # Series association S = softmax(Q K^T / sqrt(d_model)); shared feature
    # axis contracted directly (no XLU transpose), f32 accumulation.
    scores = jnp.einsum('wqd,wkd->wqk', q_tile, k_full,
                        preferred_element_type=jnp.float32)
    scores = scores * (1.0 / math.sqrt(d_model)) + neg_bias
    scores = scores - jnp.max(scores, axis=-1, keepdims=True)
    e = jnp.exp(scores)
    S = e * (1.0 / jnp.sum(e, axis=-1, keepdims=True))       # exact reciprocal

    # Prior association P: row-normalized Gaussian over |i - j|.  The
    # 1/(sqrt(2*pi)*sigma) prefactor cancels in the row normalization; only
    # 1/sigma^2 is needed (tiny eps guards sigma == 0).
    sig2 = sigma * sigma + 1e-12
    gauss = jnp.exp(dist2 * (-0.5 / sig2)) * kmask
    P = gauss * (1.0 / jnp.sum(gauss, axis=-1, keepdims=True))

    # Attention output + transformer block (lane-dense at Dp, padded cols = 0).
    Z_attn = jnp.einsum('wqk,wkd->wqd', S.astype(v_full.dtype), v_full,
                        preferred_element_type=jnp.float32)
    x_tile = x_ref[:, pl.ds(q0, tq), :].astype(jnp.float32)

    lane = jax.lax.broadcasted_iota(jnp.int32, (1, 1, d_pad), 2)
    fmask = (lane < d_model).astype(jnp.float32)
    inv_d = 1.0 / d_model

    def layernorm(h, gamma, beta):
        # Padded columns of h are exactly zero; mask keeps them out of the
        # variance.  gamma/beta padding is zero so padded outputs stay zero.
        mu = jnp.sum(h, axis=-1, keepdims=True) * inv_d
        dv = (h - mu) * fmask
        var = jnp.sum(dv * dv, axis=-1, keepdims=True) * inv_d
        return dv * jax.lax.rsqrt(var + 1e-5) * gamma + beta

    Z = layernorm(Z_attn + x_tile, ln1_g_ref[...], ln1_b_ref[...])
    mxu = wh_ref.dtype
    z2 = Z.reshape(wb * tq, d_pad).astype(mxu)
    hidden = jnp.maximum(
        jnp.dot(z2, wh_ref[...], preferred_element_type=jnp.float32)
        + bh_ref[...], 0.0)
    xh = (jnp.dot(hidden.astype(mxu), wo_ref[...],
                  preferred_element_type=jnp.float32) + bo_ref[...])
    x_hat = layernorm(xh.reshape(wb, tq, d_pad) + Z,
                      ln2_g_ref[...], ln2_b_ref[...])

    xhat_ref[...] = x_hat.astype(xhat_ref.dtype)
    p_ref[...] = P.astype(p_ref.dtype)
    s_ref[...] = S.astype(s_ref.dtype)


def _pad2(w, rows, cols):
    return jnp.pad(w, ((0, rows - w.shape[0]), (0, cols - w.shape[1])))


def anomaly_transformer(x, params, *, tq=None, wb=None,
                        mxu_dtype=jnp.bfloat16):
    """Forward pass.  x: (N, d_model) or (B, N, d_model).
    Returns (x_hat, [P], [S]) matching the PyTorch module."""
    squeeze = x.ndim == 2
    if squeeze:
        x = x[None]
    B, N, d_model = x.shape
    hidden_dim = params["wh"].shape[1]
    d_pad = _round_up(d_model, 128)
    h_pad = _round_up(hidden_dim, 128)
    n_pad = _round_up(N, 128)   # lane-dense P/S stores; padded keys masked

    # Query-tile size: whole window when small, else biggest 8-multiple divisor.
    if tq is None:
        if N <= 256:
            tq = N
        else:
            tq = N
            for cand in (256, 128, 64, 32, 16, 8):
                if N % cand == 0:
                    tq = cand
                    break
    assert N % tq == 0 and (tq % 8 == 0 or tq == N), (N, tq)

    # Windows per grid step: batch several tiny windows so each step does
    # non-trivial MXU work (~0.35 us per-step overhead otherwise dominates).
    if wb is None:
        wb = 1
        if N <= 128:
            for cand in (8, 4, 2):
                if B % cand == 0:
                    wb = cand
                    break
    assert B % wb == 0, (B, wb)

    f32 = jnp.float32
    x_p = jnp.pad(x.astype(f32),
                  ((0, 0), (0, n_pad - N), (0, d_pad - d_model))).astype(mxu_dtype)
    w_fused = jnp.concatenate([
        _pad2(params["wq"], d_pad, d_pad),
        _pad2(params["wk"], d_pad, d_pad),
        _pad2(params["wv"], d_pad, d_pad),
        _pad2(params["ws"], d_pad, SIGW),   # sigma lives in column 0
    ], axis=1).astype(mxu_dtype)            # (Dp, 3*Dp + SIGW)
    ln1_g = _pad2(params["ln1_g"], 1, d_pad).astype(f32)
    ln1_b = _pad2(params["ln1_b"], 1, d_pad).astype(f32)
    wh = _pad2(params["wh"], d_pad, h_pad).astype(mxu_dtype)
    bh = _pad2(params["bh"], 1, h_pad).astype(f32)
    wo = _pad2(params["wo"], h_pad, d_pad).astype(mxu_dtype)
    bo = _pad2(params["bo"], 1, d_pad).astype(f32)
    ln2_g = _pad2(params["ln2_g"], 1, d_pad).astype(f32)
    ln2_b = _pad2(params["ln2_b"], 1, d_pad).astype(f32)

    def const(shape):
        return pl.BlockSpec(shape, lambda b, qi: (0,) * len(shape))

    feat = 3 * d_pad + SIGW
    grid_spec = pltpu.PrefetchScalarGridSpec(
        num_scalar_prefetch=0,
        grid=(B // wb, N // tq),
        in_specs=[
            pl.BlockSpec((wb, n_pad, d_pad), lambda b, qi: (b, 0, 0)),  # x
            const((d_pad, feat)),                                       # W_fused
            const((1, d_pad)), const((1, d_pad)),                       # ln1 g/b
            const((d_pad, h_pad)), const((1, h_pad)),                   # hidden
            const((h_pad, d_pad)), const((1, d_pad)),                   # output
            const((1, d_pad)), const((1, d_pad)),                       # ln2 g/b
        ],
        out_specs=[
            pl.BlockSpec((wb, tq, d_pad), lambda b, qi: (b, qi, 0)),    # x_hat
            pl.BlockSpec((wb, tq, n_pad), lambda b, qi: (b, qi, 0)),    # P
            pl.BlockSpec((wb, tq, n_pad), lambda b, qi: (b, qi, 0)),    # S
        ],
        scratch_shapes=[pltpu.VMEM((wb, n_pad, feat), mxu_dtype)],
    )
    out_shape = (
        jax.ShapeDtypeStruct((B, N, d_pad), f32),
        jax.ShapeDtypeStruct((B, N, n_pad), f32),
        jax.ShapeDtypeStruct((B, N, n_pad), f32),
    )
    xhat_p, P_p, S_p = pl.pallas_call(
        functools.partial(_anomaly_kernel, d_model, N),
        out_shape=out_shape,
        grid_spec=grid_spec,
        compiler_params=pltpu.CompilerParams(
            dimension_semantics=("parallel", "arbitrary"),
            # stays under v7x's 64 MiB physical VMEM with headroom
            vmem_limit_bytes=48 * 1024 * 1024),
    )(x_p, w_fused, ln1_g, ln1_b, wh, bh, wo, bo, ln2_g, ln2_b)

    x_hat = xhat_p[:, :, :d_model]
    P = P_p[:, :, :N]
    S = S_p[:, :, :N]
    if squeeze:
        return x_hat[0], [P[0]], [S[0]]
    return x_hat, [P], [S]


def make_params(key, d_model, hidden_dim):
    ks = jax.random.split(key, 6)
    scale = 0.1
    return {
        "wq": jax.random.normal(ks[0], (d_model, d_model), jnp.float32) * scale,
        "wk": jax.random.normal(ks[1], (d_model, d_model), jnp.float32) * scale,
        "wv": jax.random.normal(ks[2], (d_model, d_model), jnp.float32) * scale,
        "ws": jax.random.normal(ks[3], (d_model, 1), jnp.float32) * scale,
        "ln1_g": jnp.ones((1, d_model), jnp.float32),
        "ln1_b": jnp.zeros((1, d_model), jnp.float32),
        "wh": jax.random.normal(ks[4], (d_model, hidden_dim), jnp.float32) * scale,
        "bh": jnp.zeros((1, hidden_dim), jnp.float32),
        "wo": jax.random.normal(ks[5], (hidden_dim, d_model), jnp.float32) * scale,
        "bo": jnp.zeros((1, d_model), jnp.float32),
        "ln2_g": jnp.ones((1, d_model), jnp.float32),
        "ln2_b": jnp.zeros((1, d_model), jnp.float32),
    }


def reference_forward(x, params):
    """Pure-JAX mirror of the PyTorch module (correctness check only)."""
    d_model = x.shape[-1]

    def layernorm(h, g, b, eps=1e-5):
        mu = jnp.mean(h, axis=-1, keepdims=True)
        var = jnp.mean((h - mu) ** 2, axis=-1, keepdims=True)
        return (h - mu) * jax.lax.rsqrt(var + eps) * g + b

    def one(xw):
        n = xw.shape[0]
        q = xw @ params["wq"]
        k = xw @ params["wk"]
        v = xw @ params["wv"]
        sigma = xw @ params["ws"]                                   # (N, 1)
        scores = (q @ k.T) / math.sqrt(d_model)
        S = jax.nn.softmax(scores, axis=-1)
        idx = jnp.arange(n, dtype=jnp.float32)
        dist = jnp.abs(idx[:, None] - idx[None, :])
        norm = 1.0 / (math.sqrt(2.0 * math.pi) * sigma)
        gauss = norm * jnp.exp(-0.5 * (dist / sigma) ** 2)
        P = gauss / jnp.sum(gauss, axis=-1, keepdims=True)
        Z = layernorm(S @ v + xw, params["ln1_g"], params["ln1_b"])
        hidden = jax.nn.relu(Z @ params["wh"] + params["bh"])
        xh = hidden @ params["wo"] + params["bo"]
        xh = layernorm(xh + Z, params["ln2_g"], params["ln2_b"])
        return xh, P, S

    with jax.default_matmul_precision("highest"):
        return jax.vmap(one)(x)


if __name__ == "__main__":
    # heads=4 in the PyTorch ctor is unused by the single-head reference attn.
    B, N, d_model, hidden_dim = 4, 16, 32, 64
    key = jax.random.PRNGKey(0)
    kx, kp = jax.random.split(key)
    x = jax.random.normal(kx, (B, N, d_model), jnp.float32)
    params = make_params(kp, d_model, hidden_dim)

    xr, Pr, Sr = reference_forward(x, params)

    # --- f32 MXU path: tight parity (exact reciprocals, no approx ops). ---
    x_hat, P_list, S_list = anomaly_transformer(x, params, mxu_dtype=jnp.float32)
    jax.block_until_ready((x_hat, P_list[0], S_list[0]))
    assert x_hat.shape == (B, N, d_model)
    assert P_list[0].shape == (B, N, N) and S_list[0].shape == (B, N, N)
    assert bool(jnp.all(jnp.isfinite(x_hat)))
    assert bool(jnp.all(jnp.isfinite(P_list[0])))
    assert bool(jnp.all(jnp.isfinite(S_list[0])))
    tol = dict(rtol=1e-2, atol=1e-2)
    assert bool(jnp.allclose(S_list[0], Sr, **tol))
    assert bool(jnp.allclose(P_list[0], Pr, **tol))
    assert bool(jnp.allclose(x_hat, xr, **tol))

    # --- bf16 MXU path (v6e/v7x production setting): loose sanity check. ---
    x_hat_b, P_b, S_b = anomaly_transformer(x, params, mxu_dtype=jnp.bfloat16)
    jax.block_until_ready((x_hat_b, P_b[0], S_b[0]))
    assert bool(jnp.all(jnp.isfinite(x_hat_b)))
    assert bool(jnp.all(jnp.isfinite(P_b[0])))
    assert bool(jnp.all(jnp.isfinite(S_b[0])))
    loose = dict(rtol=1e-1, atol=1e-1)
    assert bool(jnp.allclose(S_b[0], Sr, **loose))
    assert bool(jnp.allclose(P_b[0], Pr, **loose))
    assert bool(jnp.allclose(x_hat_b, xr, **loose))

    print("KERNEL_OK")
</pallas_src>

<mosaic_0001>
module attributes {stable_mosaic.version = 11 : i64} {
  func.func @_anomaly_kernel(%arg0: i32, %arg1: i32, %arg2: memref<4x128x128xf32, #tpu.memory_space<vmem>>, %arg3: memref<128x512xf32, #tpu.memory_space<vmem>>, %arg4: memref<1x128xf32, #tpu.memory_space<vmem>>, %arg5: memref<1x128xf32, #tpu.memory_space<vmem>>, %arg6: memref<128x128xf32, #tpu.memory_space<vmem>>, %arg7: memref<1x128xf32, #tpu.memory_space<vmem>>, %arg8: memref<128x128xf32, #tpu.memory_space<vmem>>, %arg9: memref<1x128xf32, #tpu.memory_space<vmem>>, %arg10: memref<1x128xf32, #tpu.memory_space<vmem>>, %arg11: memref<1x128xf32, #tpu.memory_space<vmem>>, %arg12: memref<4x16x128xf32, #tpu.memory_space<vmem>>, %arg13: memref<4x16x128xf32, #tpu.memory_space<vmem>>, %arg14: memref<4x16x128xf32, #tpu.memory_space<vmem>>, %arg15: memref<4x128x512xf32, #tpu.memory_space<vmem>>) attributes {dimension_semantics = [#tpu.dimension_semantics<parallel>, #tpu.dimension_semantics<arbitrary>], iteration_bounds = array<i64: 1, 1>, scalar_prefetch = 0 : i64, scratch_operands = 1 : i64, tpu.core_type = #tpu.core_type<tc>, window_params = [{transform_indices = @transform_0, window_bounds = array<i64: 4, 128, 128>}, {pipeline_mode = #tpu.pipeline_mode<synchronous>, transform_indices = @transform_1, window_bounds = array<i64: 128, 512>}, {pipeline_mode = #tpu.pipeline_mode<synchronous>, transform_indices = @transform_2, window_bounds = array<i64: 1, 128>}, {pipeline_mode = #tpu.pipeline_mode<synchronous>, transform_indices = @transform_3, window_bounds = array<i64: 1, 128>}, {pipeline_mode = #tpu.pipeline_mode<synchronous>, transform_indices = @transform_4, window_bounds = array<i64: 128, 128>}, {pipeline_mode = #tpu.pipeline_mode<synchronous>, transform_indices = @transform_5, window_bounds = array<i64: 1, 128>}, {pipeline_mode = #tpu.pipeline_mode<synchronous>, transform_indices = @transform_6, window_bounds = array<i64: 128, 128>}, {pipeline_mode = #tpu.pipeline_mode<synchronous>, transform_indices = @transform_7, window_bounds = array<i64: 1, 128>}, {pipeline_mode = #tpu.pipeline_mode<synchronous>, transform_indices = @transform_8, window_bounds = array<i64: 1, 128>}, {pipeline_mode = #tpu.pipeline_mode<synchronous>, transform_indices = @transform_9, window_bounds = array<i64: 1, 128>}, {transform_indices = @transform_10, window_bounds = array<i64: 4, 16, 128>}, {transform_indices = @transform_11, window_bounds = array<i64: 4, 16, 128>}, {transform_indices = @transform_12, window_bounds = array<i64: 4, 16, 128>}]} {
    %c0_i32 = arith.constant 0 : i32
    %0 = arith.cmpi eq, %arg1, %c0_i32 : i32
    %1 = arith.extui %0 : i1 to i32
    %c0_i32_0 = arith.constant 0 : i32
    %2 = arith.cmpi ne, %1, %c0_i32_0 : i32
    scf.if %2 {
      %c0_60 = arith.constant 0 : index
      %c0_61 = arith.constant 0 : index
      %c0_62 = arith.constant 0 : index
      %142 = vector.load %arg2[%c0_60, %c0_61, %c0_62] : memref<4x128x128xf32, #tpu.memory_space<vmem>>, vector<4x128x128xf32>
      %143 = vector.shape_cast %142 : vector<4x128x128xf32> to vector<512x128xf32>
      %c0_63 = arith.constant 0 : index
      %c0_64 = arith.constant 0 : index
      %144 = vector.load %arg3[%c0_63, %c0_64] : memref<128x512xf32, #tpu.memory_space<vmem>>, vector<128x512xf32>
      %cst_65 = arith.constant dense<0.000000e+00> : vector<512x512xf32>
      %145 = tpu.matmul %143, %144, %cst_65 {dimension_numbers = #tpu.dot_dimension_numbers<[1], [0], [0], [1], [0, 0, 1, 1], [], []>} : vector<512x128xf32>, vector<128x512xf32>, vector<512x512xf32> -> vector<512x512xf32>
      %146 = vector.shape_cast %145 : vector<512x512xf32> to vector<4x128x512xf32>
      %c0_66 = arith.constant 0 : index
      %c0_67 = arith.constant 0 : index
      %c0_68 = arith.constant 0 : index
      %147 = vector.load %arg15[%c0_66, %c0_67, %c0_68] : memref<4x128x512xf32, #tpu.memory_space<vmem>>, vector<4x128x512xf32>
      tpu.vector_store %arg15[%c0_66, %c0_67, %c0_68], %146 {strides = array<i32>} : memref<4x128x512xf32, #tpu.memory_space<vmem>>, vector<4x128x512xf32>,
    } else {
    }
    %c16_i32 = arith.constant 16 : i32
    %3 = arith.muli %arg1, %c16_i32 : i32
    %4 = tpu.assume_multiple %3, 16 : i32
    %c0 = arith.constant 0 : index
    %5 = arith.index_cast %4 : i32 to index
    %c0_1 = arith.constant 0 : index
    %6 = vector.load %arg15[%c0, %5, %c0_1] : memref<4x128x512xf32, #tpu.memory_space<vmem>>, vector<4x16x128xf32>
    %c0_2 = arith.constant 0 : index
    %c0_3 = arith.constant 0 : index
    %c128 = arith.constant 128 : index
    %7 = vector.load %arg15[%c0_2, %c0_3, %c128] : memref<4x128x512xf32, #tpu.memory_space<vmem>>, vector<4x128x128xf32>
    %c0_4 = arith.constant 0 : index
    %c0_5 = arith.constant 0 : index
    %c256 = arith.constant 256 : index
    %8 = vector.load %arg15[%c0_4, %c0_5, %c256] : memref<4x128x512xf32, #tpu.memory_space<vmem>>, vector<4x128x128xf32>
    %c0_6 = arith.constant 0 : index
    %9 = arith.index_cast %4 : i32 to index
    %c384 = arith.constant 384 : index
    %10 = vector.load %arg15[%c0_6, %9, %c384] : memref<4x128x512xf32, #tpu.memory_space<vmem>>, vector<4x16x128xf32>
    %11 = vector.extract_strided_slice %10 {offsets = [0, 0, 0], sizes = [4, 16, 1], strides = [1, 1, 1]} : vector<4x16x128xf32> to vector<4x16x1xf32>
    %12 = tpu.iota {dimensions = array<i32: 0>} : vector<16x128xi32>
    %c16_i32_7 = arith.constant 16 : i32
    %13 = arith.muli %arg1, %c16_i32_7 : i32
    %14 = vector.broadcast %13 : i32 to vector<16x128xi32>
    %15 = arith.addi %12, %14 : vector<16x128xi32>
    %16 = tpu.iota {dimensions = array<i32: 1>} : vector<16x128xi32>
    %17 = arith.subi %15, %16 : vector<16x128xi32>
    %18 = arith.sitofp %17 : vector<16x128xi32> to vector<16x128xf32>
    %19 = arith.mulf %18, %18 : vector<16x128xf32>
    %c16_i32_8 = arith.constant 16 : i32
    %20 = vector.broadcast %c16_i32_8 : i32 to vector<16x128xi32>
    %21 = arith.cmpi slt, %16, %20 : vector<16x128xi32>
    %22 = arith.extui %21 : vector<16x128xi1> to vector<16x128xi32>
    %23 = arith.sitofp %22 : vector<16x128xi32> to vector<16x128xf32>
    %cst = arith.constant 0.000000e+00 : f32
    %cst_9 = arith.constant -1.000000e+30 : f32
    %24 = vector.broadcast %cst : f32 to vector<16x128xf32>
    %25 = vector.broadcast %cst_9 : f32 to vector<16x128xf32>
    %26 = arith.select %21, %24, %25 : vector<16x128xi1>, vector<16x128xf32>
    "tpu.trace_start"() <{level = 10 : i32, message = "wqd,wkd->wqk"}> : () -> ()
    %cst_10 = arith.constant dense<0.000000e+00> : vector<4x16x128xf32>
    %27 = tpu.matmul %6, %7, %cst_10 {dimension_numbers = #tpu.dot_dimension_numbers<[2], [2], [1], [1], [0, 0, 0, 1, 1, 1], [0], [0]>} : vector<4x16x128xf32>, vector<4x128x128xf32>, vector<4x16x128xf32> -> vector<4x16x128xf32>
    "tpu.trace_stop"() : () -> ()
    %cst_11 = arith.constant 0.176776692 : f32
    %28 = vector.broadcast %cst_11 : f32 to vector<4x16x128xf32>
    %29 = arith.mulf %27, %28 : vector<4x16x128xf32>
    %30 = vector.shape_cast %26 : vector<16x128xf32> to vector<1x16x128xf32>
    %31 = vector.broadcast %30 : vector<1x16x128xf32> to vector<4x16x128xf32>
    %32 = arith.addf %29, %31 : vector<4x16x128xf32>
    %cst_12 = arith.constant dense<0xFF800000> : vector<4x16xf32>
    %33 = vector.multi_reduction <maximumf>, %32, %cst_12 [2] : vector<4x16x128xf32> to vector<4x16xf32>
    %34 = vector.shape_cast %33 : vector<4x16xf32> to vector<4x16x1xf32>
    %35 = vector.broadcast %34 : vector<4x16x1xf32> to vector<4x16x128xf32>
    %36 = arith.subf %32, %35 : vector<4x16x128xf32>
    %37 = math.exp %36 : vector<4x16x128xf32>
    %cst_13 = arith.constant dense<0.000000e+00> : vector<4x16xf32>
    %38 = vector.multi_reduction <add>, %37, %cst_13 [2] : vector<4x16x128xf32> to vector<4x16xf32>
    %39 = vector.shape_cast %38 : vector<4x16xf32> to vector<4x16x1xf32>
    %cst_14 = arith.constant 1.000000e+00 : f32
    %40 = vector.broadcast %cst_14 : f32 to vector<4x16x1xf32>
    %41 = arith.divf %40, %39 : vector<4x16x1xf32>
    %42 = vector.broadcast %41 : vector<4x16x1xf32> to vector<4x16x128xf32>
    %43 = arith.mulf %37, %42 : vector<4x16x128xf32>
    %44 = arith.mulf %11, %11 : vector<4x16x1xf32>
    %cst_15 = arith.constant 9.99999996E-13 : f32
    %45 = vector.broadcast %cst_15 : f32 to vector<4x16x1xf32>
    %46 = arith.addf %44, %45 : vector<4x16x1xf32>
    %cst_16 = arith.constant -5.000000e-01 : f32
    %47 = vector.broadcast %cst_16 : f32 to vector<4x16x1xf32>
    %48 = arith.divf %47, %46 : vector<4x16x1xf32>
    %49 = vector.shape_cast %19 : vector<16x128xf32> to vector<1x16x128xf32>
    %50 = vector.broadcast %49 : vector<1x16x128xf32> to vector<4x16x128xf32>
    %51 = vector.broadcast %48 : vector<4x16x1xf32> to vector<4x16x128xf32>
    %52 = arith.mulf %50, %51 : vector<4x16x128xf32>
    %53 = math.exp %52 : vector<4x16x128xf32>
    %54 = vector.shape_cast %23 : vector<16x128xf32> to vector<1x16x128xf32>
    %55 = vector.broadcast %54 : vector<1x16x128xf32> to vector<4x16x128xf32>
    %56 = arith.mulf %53, %55 : vector<4x16x128xf32>
    %cst_17 = arith.constant dense<0.000000e+00> : vector<4x16xf32>
    %57 = vector.multi_reduction <add>, %56, %cst_17 [2] : vector<4x16x128xf32> to vector<4x16xf32>
    %58 = vector.shape_cast %57 : vector<4x16xf32> to vector<4x16x1xf32>
    %cst_18 = arith.constant 1.000000e+00 : f32
    %59 = vector.broadcast %cst_18 : f32 to vector<4x16x1xf32>
    %60 = arith.divf %59, %58 : vector<4x16x1xf32>
    %61 = vector.broadcast %60 : vector<4x16x1xf32> to vector<4x16x128xf32>
    %62 = arith.mulf %56, %61 : vector<4x16x128xf32>
    "tpu.trace_start"() <{level = 10 : i32, message = "wqk,wkd->wqd"}> : () -> ()
    %cst_19 = arith.constant dense<0.000000e+00> : vector<4x16x128xf32>
    %63 = tpu.matmul %43, %8, %cst_19 {dimension_numbers = #tpu.dot_dimension_numbers<[2], [1], [1], [2], [0, 0, 0, 1, 1, 2], [0], [0]>} : vector<4x16x128xf32>, vector<4x128x128xf32>, vector<4x16x128xf32> -> vector<4x16x128xf32>
    "tpu.trace_stop"() : () -> ()
    %c0_20 = arith.constant 0 : index
    %64 = arith.index_cast %4 : i32 to index
    %c0_21 = arith.constant 0 : index
    %65 = vector.load %arg2[%c0_20, %64, %c0_21] : memref<4x128x128xf32, #tpu.memory_space<vmem>>, vector<4x16x128xf32>
    %66 = tpu.iota {dimensions = array<i32: 2>} : vector<1x1x128xi32>
    %c32_i32 = arith.constant 32 : i32
    %67 = vector.broadcast %c32_i32 : i32 to vector<1x1x128xi32>
    %68 = arith.cmpi slt, %66, %67 : vector<1x1x128xi32>
    %69 = arith.extui %68 : vector<1x1x128xi1> to vector<1x1x128xi32>
    %70 = arith.sitofp %69 : vector<1x1x128xi32> to vector<1x1x128xf32>
    %71 = arith.addf %63, %65 : vector<4x16x128xf32>
    %c0_22 = arith.constant 0 : index
    %c0_23 = arith.constant 0 : index
    %72 = vector.load %arg4[%c0_22, %c0_23] : memref<1x128xf32, #tpu.memory_space<vmem>>, vector<1x128xf32>
    %c0_24 = arith.constant 0 : index
    %c0_25 = arith.constant 0 : index
    %73 = vector.load %arg5[%c0_24, %c0_25] : memref<1x128xf32, #tpu.memory_space<vmem>>, vector<1x128xf32>
    %cst_26 = arith.constant dense<0.000000e+00> : vector<4x16xf32>
    %74 = vector.multi_reduction <add>, %71, %cst_26 [2] : vector<4x16x128xf32> to vector<4x16xf32>
    %75 = vector.shape_cast %74 : vector<4x16xf32> to vector<4x16x1xf32>
    %cst_27 = arith.constant 3.125000e-02 : f32
    %76 = vector.broadcast %cst_27 : f32 to vector<4x16x1xf32>
    %77 = arith.mulf %75, %76 : vector<4x16x1xf32>
    %78 = vector.broadcast %77 : vector<4x16x1xf32> to vector<4x16x128xf32>
    %79 = arith.subf %71, %78 : vector<4x16x128xf32>
    %80 = vector.broadcast %70 : vector<1x1x128xf32> to vector<4x16x128xf32>
    %81 = arith.mulf %79, %80 : vector<4x16x128xf32>
    %82 = arith.mulf %81, %81 : vector<4x16x128xf32>
    %cst_28 = arith.constant dense<0.000000e+00> : vector<4x16xf32>
    %83 = vector.multi_reduction <add>, %82, %cst_28 [2] : vector<4x16x128xf32> to vector<4x16xf32>
    %84 = vector.shape_cast %83 : vector<4x16xf32> to vector<4x16x1xf32>
    %cst_29 = arith.constant 3.125000e-02 : f32
    %85 = vector.broadcast %cst_29 : f32 to vector<4x16x1xf32>
    %86 = arith.mulf %84, %85 : vector<4x16x1xf32>
    %cst_30 = arith.constant 9.99999974E-6 : f32
    %87 = vector.broadcast %cst_30 : f32 to vector<4x16x1xf32>
    %88 = arith.addf %86, %87 : vector<4x16x1xf32>
    %89 = math.rsqrt %88 : vector<4x16x1xf32>
    %90 = vector.broadcast %89 : vector<4x16x1xf32> to vector<4x16x128xf32>
    %91 = arith.mulf %81, %90 : vector<4x16x128xf32>
    %92 = vector.shape_cast %72 : vector<1x128xf32> to vector<1x1x128xf32>
    %93 = vector.broadcast %92 : vector<1x1x128xf32> to vector<4x16x128xf32>
    %94 = arith.mulf %91, %93 : vector<4x16x128xf32>
    %95 = vector.shape_cast %73 : vector<1x128xf32> to vector<1x1x128xf32>
    %96 = vector.broadcast %95 : vector<1x1x128xf32> to vector<4x16x128xf32>
    %97 = arith.addf %94, %96 : vector<4x16x128xf32>
    %98 = vector.shape_cast %97 : vector<4x16x128xf32> to vector<64x128xf32>
    %c0_31 = arith.constant 0 : index
    %c0_32 = arith.constant 0 : index
    %99 = vector.load %arg6[%c0_31, %c0_32] : memref<128x128xf32, #tpu.memory_space<vmem>>, vector<128x128xf32>
    %cst_33 = arith.constant dense<0.000000e+00> : vector<64x128xf32>
    %100 = tpu.matmul %98, %99, %cst_33 {dimension_numbers = #tpu.dot_dimension_numbers<[1], [0], [0], [1], [0, 0, 1, 1], [], []>} : vector<64x128xf32>, vector<128x128xf32>, vector<64x128xf32> -> vector<64x128xf32>
    %c0_34 = arith.constant 0 : index
    %c0_35 = arith.constant 0 : index
    %101 = vector.load %arg7[%c0_34, %c0_35] : memref<1x128xf32, #tpu.memory_space<vmem>>, vector<1x128xf32>
    %102 = vector.broadcast %101 : vector<1x128xf32> to vector<64x128xf32>
    %103 = arith.addf %100, %102 : vector<64x128xf32>
    %cst_36 = arith.constant 0.000000e+00 : f32
    %104 = vector.broadcast %cst_36 : f32 to vector<64x128xf32>
    %105 = arith.maximumf %103, %104 : vector<64x128xf32>
    %c0_37 = arith.constant 0 : index
    %c0_38 = arith.constant 0 : index
    %106 = vector.load %arg8[%c0_37, %c0_38] : memref<128x128xf32, #tpu.memory_space<vmem>>, vector<128x128xf32>
    %cst_39 = arith.constant dense<0.000000e+00> : vector<64x128xf32>
    %107 = tpu.matmul %105, %106, %cst_39 {dimension_numbers = #tpu.dot_dimension_numbers<[1], [0], [0], [1], [0, 0, 1, 1], [], []>} : vector<64x128xf32>, vector<128x128xf32>, vector<64x128xf32> -> vector<64x128xf32>
    %c0_40 = arith.constant 0 : index
    %c0_41 = arith.constant 0 : index
    %108 = vector.load %arg9[%c0_40, %c0_41] : memref<1x128xf32, #tpu.memory_space<vmem>>, vector<1x128xf32>
    %109 = vector.broadcast %108 : vector<1x128xf32> to vector<64x128xf32>
    %110 = arith.addf %107, %109 : vector<64x128xf32>
    %111 = vector.shape_cast %110 : vector<64x128xf32> to vector<4x16x128xf32>
    %112 = arith.addf %111, %97 : vector<4x16x128xf32>
    %c0_42 = arith.constant 0 : index
    %c0_43 = arith.constant 0 : index
    %113 = vector.load %arg10[%c0_42, %c0_43] : memref<1x128xf32, #tpu.memory_space<vmem>>, vector<1x128xf32>
    %c0_44 = arith.constant 0 : index
    %c0_45 = arith.constant 0 : index
    %114 = vector.load %arg11[%c0_44, %c0_45] : memref<1x128xf32, #tpu.memory_space<vmem>>, vector<1x128xf32>
    %cst_46 = arith.constant dense<0.000000e+00> : vector<4x16xf32>
    %115 = vector.multi_reduction <add>, %112, %cst_46 [2] : vector<4x16x128xf32> to vector<4x16xf32>
    %116 = vector.shape_cast %115 : vector<4x16xf32> to vector<4x16x1xf32>
    %cst_47 = arith.constant 3.125000e-02 : f32
    %117 = vector.broadcast %cst_47 : f32 to vector<4x16x1xf32>
    %118 = arith.mulf %116, %117 : vector<4x16x1xf32>
    %119 = vector.broadcast %118 : vector<4x16x1xf32> to vector<4x16x128xf32>
    %120 = arith.subf %112, %119 : vector<4x16x128xf32>
    %121 = vector.broadcast %70 : vector<1x1x128xf32> to vector<4x16x128xf32>
    %122 = arith.mulf %120, %121 : vector<4x16x128xf32>
    %123 = arith.mulf %122, %122 : vector<4x16x128xf32>
    %cst_48 = arith.constant dense<0.000000e+00> : vector<4x16xf32>
    %124 = vector.multi_reduction <add>, %123, %cst_48 [2] : vector<4x16x128xf32> to vector<4x16xf32>
    %125 = vector.shape_cast %124 : vector<4x16xf32> to vector<4x16x1xf32>
    %cst_49 = arith.constant 3.125000e-02 : f32
    %126 = vector.broadcast %cst_49 : f32 to vector<4x16x1xf32>
    %127 = arith.mulf %125, %126 : vector<4x16x1xf32>
    %cst_50 = arith.constant 9.99999974E-6 : f32
    %128 = vector.broadcast %cst_50 : f32 to vector<4x16x1xf32>
    %129 = arith.addf %127, %128 : vector<4x16x1xf32>
    %130 = math.rsqrt %129 : vector<4x16x1xf32>
    %131 = vector.broadcast %130 : vector<4x16x1xf32> to vector<4x16x128xf32>
    %132 = arith.mulf %122, %131 : vector<4x16x128xf32>
    %133 = vector.shape_cast %113 : vector<1x128xf32> to vector<1x1x128xf32>
    %134 = vector.broadcast %133 : vector<1x1x128xf32> to vector<4x16x128xf32>
    %135 = arith.mulf %132, %134 : vector<4x16x128xf32>
    %136 = vector.shape_cast %114 : vector<1x128xf32> to vector<1x1x128xf32>
    %137 = vector.broadcast %136 : vector<1x1x128xf32> to vector<4x16x128xf32>
    %138 = arith.addf %135, %137 : vector<4x16x128xf32>
    %c0_51 = arith.constant 0 : index
    %c0_52 = arith.constant 0 : index
    %c0_53 = arith.constant 0 : index
    %139 = vector.load %arg12[%c0_51, %c0_52, %c0_53] : memref<4x16x128xf32, #tpu.memory_space<vmem>>, vector<4x16x128xf32>
    tpu.vector_store %arg12[%c0_51, %c0_52, %c0_53], %138 {strides = array<i32>} : memref<4x16x128xf32, #tpu.memory_space<vmem>>, vector<4x16x128xf32>,
    %c0_54 = arith.constant 0 : index
    %c0_55 = arith.constant 0 : index
    %c0_56 = arith.constant 0 : index
    %140 = vector.load %arg13[%c0_54, %c0_55, %c0_56] : memref<4x16x128xf32, #tpu.memory_space<vmem>>, vector<4x16x128xf32>
    tpu.vector_store %arg13[%c0_54, %c0_55, %c0_56], %62 {strides = array<i32>} : memref<4x16x128xf32, #tpu.memory_space<vmem>>, vector<4x16x128xf32>,
    %c0_57 = arith.constant 0 : index
    %c0_58 = arith.constant 0 : index
    %c0_59 = arith.constant 0 : index
    %141 = vector.load %arg14[%c0_57, %c0_58, %c0_59] : memref<4x16x128xf32, #tpu.memory_space<vmem>>, vector<4x16x128xf32>
    tpu.vector_store %arg14[%c0_57, %c0_58, %c0_59], %43 {strides = array<i32>} : memref<4x16x128xf32, #tpu.memory_space<vmem>>, vector<4x16x128xf32>,
    return
  }
  func.func @transform_0(%arg0: i32, %arg1: i32) -> (i32, i32, i32) {
    %c0_i32 = arith.constant 0 : i32
    %c0_i32_0 = arith.constant 0 : i32
    %c0_i32_1 = arith.constant 0 : i32
    return %arg0, %c0_i32, %c0_i32_0 : i32, i32, i32
  }
  func.func @transform_1(%arg0: i32, %arg1: i32) -> (i32, i32) {
    %c0_i32 = arith.constant 0 : i32
    %c0_i32_0 = arith.constant 0 : i32
    %c0_i32_1 = arith.constant 0 : i32
    return %c0_i32, %c0_i32_0 : i32, i32
  }
  func.func @transform_2(%arg0: i32, %arg1: i32) -> (i32, i32) {
    %c0_i32 = arith.constant 0 : i32
    %c0_i32_0 = arith.constant 0 : i32
    %c0_i32_1 = arith.constant 0 : i32
    return %c0_i32, %c0_i32_0 : i32, i32
  }
  func.func @transform_3(%arg0: i32, %arg1: i32) -> (i32, i32) {
    %c0_i32 = arith.constant 0 : i32
    %c0_i32_0 = arith.constant 0 : i32
    %c0_i32_1 = arith.constant 0 : i32
    return %c0_i32, %c0_i32_0 : i32, i32
  }
  func.func @transform_4(%arg0: i32, %arg1: i32) -> (i32, i32) {
    %c0_i32 = arith.constant 0 : i32
    %c0_i32_0 = arith.constant 0 : i32
    %c0_i32_1 = arith.constant 0 : i32
    return %c0_i32, %c0_i32_0 : i32, i32
  }
  func.func @transform_5(%arg0: i32, %arg1: i32) -> (i32, i32) {
    %c0_i32 = arith.constant 0 : i32
    %c0_i32_0 = arith.constant 0 : i32
    %c0_i32_1 = arith.constant 0 : i32
    return %c0_i32, %c0_i32_0 : i32, i32
  }
  func.func @transform_6(%arg0: i32, %arg1: i32) -> (i32, i32) {
    %c0_i32 = arith.constant 0 : i32
    %c0_i32_0 = arith.constant 0 : i32
    %c0_i32_1 = arith.constant 0 : i32
    return %c0_i32, %c0_i32_0 : i32, i32
  }
  func.func @transform_7(%arg0: i32, %arg1: i32) -> (i32, i32) {
    %c0_i32 = arith.constant 0 : i32
    %c0_i32_0 = arith.constant 0 : i32
    %c0_i32_1 = arith.constant 0 : i32
    return %c0_i32, %c0_i32_0 : i32, i32
  }
  func.func @transform_8(%arg0: i32, %arg1: i32) -> (i32, i32) {
    %c0_i32 = arith.constant 0 : i32
    %c0_i32_0 = arith.constant 0 : i32
    %c0_i32_1 = arith.constant 0 : i32
    return %c0_i32, %c0_i32_0 : i32, i32
  }
  func.func @transform_9(%arg0: i32, %arg1: i32) -> (i32, i32) {
    %c0_i32 = arith.constant 0 : i32
    %c0_i32_0 = arith.constant 0 : i32
    %c0_i32_1 = arith.constant 0 : i32
    return %c0_i32, %c0_i32_0 : i32, i32
  }
  func.func @transform_10(%arg0: i32, %arg1: i32) -> (i32, i32, i32) {
    %c0_i32 = arith.constant 0 : i32
    %c0_i32_0 = arith.constant 0 : i32
    return %arg0, %arg1, %c0_i32 : i32, i32, i32
  }
  func.func @transform_11(%arg0: i32, %arg1: i32) -> (i32, i32, i32) {
    %c0_i32 = arith.constant 0 : i32
    %c0_i32_0 = arith.constant 0 : i32
    return %arg0, %arg1, %c0_i32 : i32, i32, i32
  }
  func.func @transform_12(%arg0: i32, %arg1: i32) -> (i32, i32, i32) {
    %c0_i32 = arith.constant 0 : i32
    %c0_i32_0 = arith.constant 0 : i32
    return %arg0, %arg1, %c0_i32 : i32, i32, i32
  }
}

</mosaic_0001>

<bundles_post_ra>
// kernel: tpu_custom_call.1
= control target key start
LH: loop header
LB: loop body
LE: loop exit
PB: predicated region body
PF: predicated region fallthrough
CT: control target
= control target key end

     0   :  { %18 = vsyncpa [#allocation4], 0  ;;  %s4455_s0 = inlined_call_operand.hbm [shape: f32[4,128,128], index: 0, kind: input, shape index: {}]   ;;  %s4456_s1 = inlined_call_operand.hbm [shape: f32[128,512], index: 1, kind: input, shape index: {}]   ;;  %s4457_s2 = inlined_call_operand.vmem [shape: f32[1,128], index: 2, kind: input, shape index: {}]   ;;  %s4458_s3 = inlined_call_operand.vmem [shape: f32[1,128], index: 3, kind: input, shape index: {}]   ;;  %s4459_s4 = inlined_call_operand.hbm [shape: f32[128,128], index: 4, kind: input, shape index: {}]   ;;  %s4460_s5 = inlined_call_operand.vmem [shape: f32[1,128], index: 5, kind: input, shape index: {}]   ;;  %s4461_s6 = inlined_call_operand.hbm [shape: f32[128,128], index: 6, kind: input, shape index: {}]   ;;  %s4462_s7 = inlined_call_operand.vmem [shape: f32[1,128], index: 7, kind: input, shape index: {}]   ;;  %s4463_s8 = inlined_call_operand.vmem [shape: f32[1,128], index: 8, kind: input, shape index: {}]   ;;  %s4464_s9 = inlined_call_operand.vmem [shape: f32[1,128], index: 9, kind: input, shape index: {}]   ;;  %s4465_s10 = inlined_call_operand.hbm [shape: f32[4,16,128], index: 10, kind: output, shape index: {0}]   ;;  %s4466_s11 = inlined_call_operand.hbm [shape: f32[4,16,128], index: 11, kind: output, shape index: {1}]   ;;  %s4467_s12 = inlined_call_operand.hbm [shape: f32[4,16,128], index: 12, kind: output, shape index: {2}]  }
   0x1   :  { %19 = vsyncpa [#allocation7], 0 }
   0x2   :  { %20 = vsyncpa [#allocation10], 0 }
   0x3   :  { %21 = vsyncpa [#allocation5], 0  ;;  %s40_s23 = sshll.u32 %s4456_s1, 4  ;;  %s41_s23 = int_to_ptr.hbm [resolvable:$true] %s40_s23 }
   0x4   :  { %22 = vsyncpa [#allocation13], 0  ;;  %s3199_s24 = smov [#allocation6]   ;;  %s27_s28 = sshll.u32 %s4455_s0, 4  ;;  %s28_s28 = int_to_ptr.hbm [resolvable:$true] %s27_s28 }
   0x5   :  { %s42_s25 = sshll.u32 %s3199_s24, 4  ;;  %s3200_s29 = smov 512   ;;  %s43_s25 = int_to_ptr.vmem [resolvable:$true] %s42_s25 }
   0x6   :  { %s3201_s30 = smov 32   ;;  %s3202_s13 = smov [#allocation3]  }
   0x7   :  { %48 = dma.hbm_to_vmem [thread:$0]  %s41_s23, 8192, %s43_s25, [#allocation7], %s3200_s29, %s3200_s29, %s3201_s30  }
   0x8   :  { %s29_s14 = sshll.u32 %s3202_s13, 4  ;;  %s3203_s15 = smov 128   ;;  %s30_s14 = int_to_ptr.vmem [resolvable:$true] %s29_s14 }
   0x9   :  { %s3204_s16 = smov 8   ;;  %s57_s18 = sshll.u32 %s4459_s4, 4  ;;  %s58_s18 = int_to_ptr.hbm [resolvable:$true] %s57_s18 }
   0xa   :  { %35 = dma.hbm_to_vmem [thread:$0]  %s28_s28, 8192, %s30_s14, [#allocation4], %s3203_s15, %s3203_s15, %s3204_s16  }
   0xb   :  { %s3205_s19 = smov [#allocation8]   ;;  %s72_s22 = sshll.u32 %s4461_s6, 4  ;;  %s73_s22 = int_to_ptr.hbm [resolvable:$true] %s72_s22 }
   0xc   :  { %s59_s0 = sshll.u32 %s3205_s19, 4  ;;  %s3206_s23 = smov [#allocation9]   ;;  %s60_s0 = int_to_ptr.vmem [resolvable:$true] %s59_s0 }
   0xd   :  { %65 = dma.hbm_to_vmem [thread:$0]  %s58_s18, 2048, %s60_s0, [#allocation7], %s3203_s15, %s3203_s15, %s3204_s16  }
   0xe   :  { %s74_s24 = sshll.u32 %s3206_s23, 4  ;;  %s75_s24 = int_to_ptr.vmem [resolvable:$true] %s74_s24 }
   0xf   :  { %80 = dma.hbm_to_vmem [thread:$0]  %s73_s22, 2048, %s75_s24, [#allocation10], %s3203_s15, %s3203_s15, %s3204_s16  }
  0x10   :  { %3189 = dma.done.wait [#allocation4], 8192  }
  0x11   :  { %3190 = vsyncadd [#allocation4], 4294959104 }
  0x12   :  { %3191 = dma.done.wait [#allocation7], 10240  }
  0x13   :  { %3192 = vsyncadd [#allocation7], 4294957056 }
  0x14   :  { %3193 = dma.done.wait [#allocation10], 2048  }
  0x15   :  { %3194 = vsyncadd [#allocation10], 4294965248  ;;  %v231_v0 = vld [vmem:[#allocation6 + $0x1e0] sm:$0xff]  ;;  %v232_v1 = vld [vmem:[#allocation6 + $0x1e8] sm:$0xff]  ;;  %s2795_s1 = sshll.u32 %s4465_s10, 4  ;;  %s3211_s10 = smov [#allocation12]   ;;  %s2796_s1 = int_to_ptr.hbm [resolvable:$true] %s2795_s1 }
  0x16   :  { %v227_v2 = vld [vmem:[#allocation6 + $0x1c0] sm:$0xff]  ;;  %235 = vmatpush.msra.mxu0 %v231_v0  ;;  %444 = vmatpush.msra.mxu1 %v232_v1  ;;  %v228_v3 = vld [vmem:[#allocation6 + $0x1c8] sm:$0xff]  ;;  %v166_v33 = vld [vmem:[#allocation3 + $0x1d8] sm:$0xff]  ;;  %s2806_s17 = sshll.u32 %s3211_s10, 4  ;;  %s2808_s0 = sshll.u32 %s4466_s11, 4  ;;  %s2807_s17 = int_to_ptr.vmem [resolvable:$true] %s2806_s17  ;;  %s2809_s0 = int_to_ptr.hbm [resolvable:$true] %s2808_s0 }
  0x17   :  { %v223_v4 = vld [vmem:[#allocation6 + $0x1a0] sm:$0xff]  ;;  %v224_v5 = vld [vmem:[#allocation6 + $0x1a8] sm:$0xff]  ;;  %2849 = vmatpush.msra.mxu2 %v231_v0  ;;  %2865 = vmatpush.msra.mxu3 %v232_v1  ;;  %v233_v34 = vld [vmem:[#allocation6 + $0x1f0] sm:$0xff]  ;;  %s3212_s20 = smov [#allocation14]   ;;  %s2821_s24 = sshll.u32 %s4467_s12, 4  ;;  %s2822_s24 = int_to_ptr.hbm [resolvable:$true] %s2821_s24 }
  0x18   :  { %236 = vmatpush.msra.mxu0 %v227_v2  ;;  %445 = vmatpush.msra.mxu1 %v228_v3  ;;  %v219_v6 = vld [vmem:[#allocation6 + $0x180] sm:$0xff]  ;;  %v220_v7 = vld [vmem:[#allocation6 + $0x188] sm:$0xff]  ;;  %v229_v35 = vld [vmem:[#allocation6 + $0x1d0] sm:$0xff]  ;;  %s2819_s21 = sshll.u32 %s3212_s20, 4  ;;  %s2820_s21 = int_to_ptr.vmem [resolvable:$true] %s2819_s21 }
  0x19   :  { %2850 = vmatpush.msra.mxu2 %v227_v2  ;;  %2866 = vmatpush.msra.mxu3 %v228_v3  ;;  %v215_v8 = vld [vmem:[#allocation6 + $0x160] sm:$0xff]  ;;  %v216_v9 = vld [vmem:[#allocation6 + $0x168] sm:$0xff]  ;;  %v225_v36 = vld [vmem:[#allocation6 + $0x1b0] sm:$0xff] }
  0x1a   :  { %237 = vmatpush.msra.mxu0 %v223_v4  ;;  %446 = vmatpush.msra.mxu1 %v224_v5  ;;  %v211_v10 = vld [vmem:[#allocation6 + $0x140] sm:$0xff]  ;;  %v212_v11 = vld [vmem:[#allocation6 + $0x148] sm:$0xff]  ;;  %v221_v38 = vld [vmem:[#allocation6 + $0x190] sm:$0xff] }
  0x1b   :  { %2851 = vmatpush.msra.mxu2 %v223_v4  ;;  %2867 = vmatpush.msra.mxu3 %v224_v5  ;;  %v207_v12 = vld [vmem:[#allocation6 + $0x120] sm:$0xff]  ;;  %v208_v13 = vld [vmem:[#allocation6 + $0x128] sm:$0xff]  ;;  %v217_v40 = vld [vmem:[#allocation6 + $0x170] sm:$0xff] }
  0x1c   :  { %238 = vmatpush.msra.mxu0 %v219_v6  ;;  %447 = vmatpush.msra.mxu1 %v220_v7  ;;  %v203_v14 = vld [vmem:[#allocation6 + $0x100] sm:$0xff]  ;;  %v204_v15 = vld [vmem:[#allocation6 + $0x108] sm:$0xff]  ;;  %v213_v41 = vld [vmem:[#allocation6 + $0x150] sm:$0xff] }
  0x1d   :  { %2852 = vmatpush.msra.mxu2 %v219_v6  ;;  %2868 = vmatpush.msra.mxu3 %v220_v7  ;;  %v199_v16 = vld [vmem:[#allocation6 + $0xe0] sm:$0xff]  ;;  %v200_v17 = vld [vmem:[#allocation6 + $0xe8] sm:$0xff]  ;;  %v209_v42 = vld [vmem:[#allocation6 + $0x130] sm:$0xff] }
  0x1e   :  { %239 = vmatpush.msra.mxu0 %v215_v8  ;;  %448 = vmatpush.msra.mxu1 %v216_v9  ;;  %v195_v18 = vld [vmem:[#allocation6 + $0xc0] sm:$0xff]  ;;  %v196_v19 = vld [vmem:[#allocation6 + $0xc8] sm:$0xff]  ;;  %v3307_v43 = vld [vmem:[#allocation3 + $0x10] sm:$0xff] }
  0x1f   :  { %2853 = vmatpush.msra.mxu2 %v215_v8  ;;  %2869 = vmatpush.msra.mxu3 %v216_v9  ;;  %v191_v20 = vld [vmem:[#allocation6 + $0xa0] sm:$0xff]  ;;  %v192_v21 = vld [vmem:[#allocation6 + $0xa8] sm:$0xff]  ;;  %v205_v44 = vld [vmem:[#allocation6 + $0x110] sm:$0xff] }
  0x20   :  { %240 = vmatpush.msra.mxu0 %v211_v10  ;;  %449 = vmatpush.msra.mxu1 %v212_v11  ;;  %v187_v22 = vld [vmem:[#allocation6 + $0x80] sm:$0xff]  ;;  %v188_v23 = vld [vmem:[#allocation6 + $0x88] sm:$0xff]  ;;  %v201_v46 = vld [vmem:[#allocation6 + $0xf0] sm:$0xff] }
  0x21   :  { %2854 = vmatpush.msra.mxu2 %v211_v10  ;;  %2870 = vmatpush.msra.mxu3 %v212_v11  ;;  %v183_v24 = vld [vmem:[#allocation6 + $0x60] sm:$0xff]  ;;  %v184_v25 = vld [vmem:[#allocation6 + $0x68] sm:$0xff]  ;;  %v197_v47 = vld [vmem:[#allocation6 + $0xd0] sm:$0xff] }
  0x22   :  { %241 = vmatpush.msra.mxu0 %v207_v12  ;;  %450 = vmatpush.msra.mxu1 %v208_v13  ;;  %v179_v26 = vld [vmem:[#allocation6 + $0x40] sm:$0xff]  ;;  %v180_v27 = vld [vmem:[#allocation6 + $0x48] sm:$0xff]  ;;  %v193_v48 = vld [vmem:[#allocation6 + $0xb0] sm:$0xff] }
  0x23   :  { %2855 = vmatpush.msra.mxu2 %v207_v12  ;;  %2871 = vmatpush.msra.mxu3 %v208_v13  ;;  %v175_v28 = vld [vmem:[#allocation6 + $0x20] sm:$0xff]  ;;  %v176_v29 = vld [vmem:[#allocation6 + $0x28] sm:$0xff]  ;;  %v3311_v49 = vld [vmem:[#allocation3 + $0x18] sm:$0xff] }
  0x24   :  { %242 = vmatpush.msra.mxu0 %v203_v14  ;;  %451 = vmatpush.msra.mxu1 %v204_v15  ;;  %v171_v30 = vld [vmem:[#allocation6] sm:$0xff]  ;;  %v172_v31 = vld [vmem:[#allocation6 + $0x8] sm:$0xff]  ;;  %v189_v50 = vld [vmem:[#allocation6 + $0x90] sm:$0xff] }
  0x25   :  { %2856 = vmatpush.msra.mxu2 %v203_v14  ;;  %2872 = vmatpush.msra.mxu3 %v204_v15  ;;  %v3299_v32 = vld [vmem:[#allocation3] sm:$0xff]  ;;  %v3303_v37 = vld [vmem:[#allocation3 + $0x8] sm:$0xff]  ;;  %v169_v51 = vld [vmem:[#allocation3 + $0x1f0] sm:$0xff] }
  0x26   :  { %243 = vmatpush.msra.mxu0 %v199_v16  ;;  %452 = vmatpush.msra.mxu1 %v200_v17  ;;  %v167_v39 = vld [vmem:[#allocation3 + $0x1e0] sm:$0xff]  ;;  %v168_v45 = vld [vmem:[#allocation3 + $0x1e8] sm:$0xff]  ;;  %v185_v52 = vld [vmem:[#allocation6 + $0x70] sm:$0xff] }
  0x27   :  { %2857 = vmatpush.msra.mxu2 %v199_v16  ;;  %2873 = vmatpush.msra.mxu3 %v200_v17  ;;  %v181_v53 = vld [vmem:[#allocation6 + $0x50] sm:$0xff]  ;;  %v3315_v55 = vld [vmem:[#allocation3 + $0x20] sm:$0xff]  ;;  %v170_v57 = vld [vmem:[#allocation3 + $0x1f8] sm:$0xff] }
  0x28   :  { %244 = vmatpush.msra.mxu0 %v195_v18  ;;  %453 = vmatpush.msra.mxu1 %v196_v19  ;;  %v177_v54 = vld [vmem:[#allocation6 + $0x30] sm:$0xff]  ;;  %v3319_v58 = vld [vmem:[#allocation3 + $0x28] sm:$0xff]  ;;  %v234_v60 = vld [vmem:[#allocation6 + $0x1f8] sm:$0xff] }
  0x29   :  { %2858 = vmatpush.msra.mxu2 %v195_v18  ;;  %2874 = vmatpush.msra.mxu3 %v196_v19  ;;  %v173_v56 = vld [vmem:[#allocation6 + $0x10] sm:$0xff]  ;;  %v230_v61 = vld [vmem:[#allocation6 + $0x1d8] sm:$0xff]  ;;  %v3334_v5 = vld [vmem:[#allocation3 + $0x40] sm:$0xff] }
  0x2a   :  { %245 = vmatpush.msra.mxu0 %v191_v20  ;;  %454 = vmatpush.msra.mxu1 %v192_v21  ;;  %v3324_v59 = vld [vmem:[#allocation3 + $0x30] sm:$0xff]  ;;  %v226_v62 = vld [vmem:[#allocation6 + $0x1b8] sm:$0xff]  ;;  %v3339_v10 = vld [vmem:[#allocation3 + $0x48] sm:$0xff] }
  0x2b   :  { %2859 = vmatpush.msra.mxu2 %v191_v20  ;;  %2875 = vmatpush.msra.mxu3 %v192_v21  ;;  %v222_v63 = vld [vmem:[#allocation6 + $0x198] sm:$0xff]  ;;  %v3344_v15 = vld [vmem:[#allocation3 + $0x50] sm:$0xff]  ;;  %v3356_v17 = vld [vmem:[#allocation3 + $0x60] sm:$0xff] }
  0x2c   :  { %246 = vmatpush.msra.mxu0 %v187_v22  ;;  %455 = vmatpush.msra.mxu1 %v188_v23  ;;  %v3329_v0 = vld [vmem:[#allocation3 + $0x38] sm:$0xff]  ;;  %v3362_v18 = vld [vmem:[#allocation3 + $0x68] sm:$0xff]  ;;  %v3368_v19 = vld [vmem:[#allocation3 + $0x70] sm:$0xff] }
  0x2d   :  { %2860 = vmatpush.msra.mxu2 %v187_v22  ;;  %2876 = vmatpush.msra.mxu3 %v188_v23  ;;  %v218_v1 = vld [vmem:[#allocation6 + $0x178] sm:$0xff]  ;;  %v3384_v23 = vld [vmem:[#allocation3 + $0x80] sm:$0xff] }
  0x2e   :  { %247 = vmatpush.msra.mxu0 %v183_v24  ;;  %456 = vmatpush.msra.mxu1 %v184_v25  ;;  %v214_v2 = vld [vmem:[#allocation6 + $0x158] sm:$0xff] }
  0x2f   :  { %2861 = vmatpush.msra.mxu2 %v183_v24  ;;  %2877 = vmatpush.msra.mxu3 %v184_v25  ;;  %v210_v3 = vld [vmem:[#allocation6 + $0x138] sm:$0xff] }
  0x30   :  { %248 = vmatpush.msra.mxu0 %v179_v26  ;;  %457 = vmatpush.msra.mxu1 %v180_v27  ;;  %v206_v4 = vld [vmem:[#allocation6 + $0x118] sm:$0xff] }
  0x31   :  { %2862 = vmatpush.msra.mxu2 %v179_v26  ;;  %2878 = vmatpush.msra.mxu3 %v180_v27  ;;  %v202_v6 = vld [vmem:[#allocation6 + $0xf8] sm:$0xff]  ;;  %v3394_v26 = vld [vmem:[#allocation3 + $0x88] sm:$0xff] }
  0x32   :  { %249 = vmatpush.msra.mxu0 %v175_v28  ;;  %458 = vmatpush.msra.mxu1 %v176_v29  ;;  %v198_v7 = vld [vmem:[#allocation6 + $0xd8] sm:$0xff] }
  0x33   :  { %2863 = vmatpush.msra.mxu2 %v175_v28  ;;  %2879 = vmatpush.msra.mxu3 %v176_v29  ;;  %v194_v8 = vld [vmem:[#allocation6 + $0xb8] sm:$0xff] }
  0x34   :  { %250 = vmatpush.msra.mxu0 %v171_v30  ;;  %459 = vmatpush.msra.mxu1 %v172_v31  ;;  %v190_v9 = vld [vmem:[#allocation6 + $0x98] sm:$0xff] }
  0x35   :  { %251 = vmatmul.f32.vlgmr.msra.gmra.mxu0 %v3299_v32  ;;  %460 = vmatmul.f32.vlgmr.msra.gmra.mxu1 %v3299_v32  ;;  %v186_v11 = vld [vmem:[#allocation6 + $0x78] sm:$0xff] }
  0x36   :  { %2864 = vmatpush.msra.mxu2 %v171_v30  ;;  %2880 = vmatpush.msra.mxu3 %v172_v31  ;;  %v182_v12 = vld [vmem:[#allocation6 + $0x58] sm:$0xff]  ;;  %v3402_v31 = vld [vmem:[#allocation3 + $0x90] sm:$0xff] }
  0x37   :  { %428 = vmatmul.f32.vlgmr.msra.gmra.mxu2 %v166_v33  ;;  %637 = vmatmul.f32.vlgmr.msra.gmra.mxu3 %v166_v33  ;;  %v178_v13 = vld [vmem:[#allocation6 + $0x38] sm:$0xff] }
  0x38   :  { %653 = vmatpush.msrb.mxu2 %v233_v34  ;;  %862 = vmatpush.msrb.mxu3 %v234_v60  ;;  %v174_v14 = vld [vmem:[#allocation6 + $0x18] sm:$0xff] }
  0x39   :  { %v3350_v16 = vld [vmem:[#allocation3 + $0x58] sm:$0xff] }
  0x3a   :  { %654 = vmatpush.msrb.mxu2 %v229_v35  ;;  %863 = vmatpush.msrb.mxu3 %v230_v61  ;;  %v3374_v20 = vld [vmem:[#allocation3 + $0x78] sm:$0xff] }
  0x3c   :  { %655 = vmatpush.msrb.mxu2 %v225_v36  ;;  %864 = vmatpush.msrb.mxu3 %v226_v62  ;;  %v3410_v36 = vld [vmem:[#allocation3 + $0x98] sm:$0xff] }
  0x3d   :  { %254 = vmatmul.f32.gmra.mxu0 %v3303_v37  ;;  %463 = vmatmul.f32.gmra.mxu1 %v3303_v37 }
  0x3e   :  { %656 = vmatpush.msrb.mxu2 %v221_v38  ;;  %865 = vmatpush.msrb.mxu3 %v222_v63  ;;  %v3464_v63 = vld [vmem:[#allocation3 + $0xc8] sm:$0xff] }
  0x3f   :  { %431 = vmatmul.f32.gmra.mxu2 %v167_v39  ;;  %640 = vmatmul.f32.gmra.mxu3 %v167_v39 }
  0x40   :  { %657 = vmatpush.msrb.mxu2 %v217_v40  ;;  %866 = vmatpush.msrb.mxu3 %v218_v1 }
  0x42   :  { %658 = vmatpush.msrb.mxu2 %v213_v41  ;;  %867 = vmatpush.msrb.mxu3 %v214_v2  ;;  %v3418_v41 = vld [vmem:[#allocation3 + $0xa0] sm:$0xff] }
  0x44   :  { %659 = vmatpush.msrb.mxu2 %v209_v42  ;;  %868 = vmatpush.msrb.mxu3 %v210_v3  ;;  %v3474_v3 = vld [vmem:[#allocation3 + $0xd0] sm:$0xff] }
  0x45   :  { %257 = vmatmul.f32.gmra.mxu0 %v3307_v43  ;;  %466 = vmatmul.f32.gmra.mxu1 %v3307_v43 }
  0x46   :  { %660 = vmatpush.msrb.mxu2 %v205_v44  ;;  %869 = vmatpush.msrb.mxu3 %v206_v4 }
  0x47   :  { %434 = vmatmul.f32.gmra.mxu2 %v168_v45  ;;  %643 = vmatmul.f32.gmra.mxu3 %v168_v45 }
  0x48   :  { %661 = vmatpush.msrb.mxu2 %v201_v46  ;;  %870 = vmatpush.msrb.mxu3 %v202_v6  ;;  %v3426_v46 = vld [vmem:[#allocation3 + $0xa8] sm:$0xff] }
  0x4a   :  { %662 = vmatpush.msrb.mxu2 %v197_v47  ;;  %871 = vmatpush.msrb.mxu3 %v198_v7 }
  0x4c   :  { %663 = vmatpush.msrb.mxu2 %v193_v48  ;;  %872 = vmatpush.msrb.mxu3 %v194_v8  ;;  %v3484_v8 = vld [vmem:[#allocation3 + $0xd8] sm:$0xff] }
  0x4d   :  { %260 = vmatmul.f32.gmra.mxu0 %v3311_v49  ;;  %469 = vmatmul.f32.gmra.mxu1 %v3311_v49 }
  0x4e   :  { %664 = vmatpush.msrb.mxu2 %v189_v50  ;;  %873 = vmatpush.msrb.mxu3 %v190_v9 }
  0x4f   :  { %437 = vmatmul.f32.gmra.mxu2 %v169_v51  ;;  %646 = vmatmul.f32.gmra.mxu3 %v169_v51  ;;  %v3434_v51 = vld [vmem:[#allocation3 + $0xb0] sm:$0xff] }
  0x50   :  { %665 = vmatpush.msrb.mxu2 %v185_v52  ;;  %874 = vmatpush.msrb.mxu3 %v186_v11 }
  0x52   :  { %666 = vmatpush.msrb.mxu2 %v181_v53  ;;  %875 = vmatpush.msrb.mxu3 %v182_v12 }
  0x54   :  { %667 = vmatpush.msrb.mxu2 %v177_v54  ;;  %876 = vmatpush.msrb.mxu3 %v178_v13  ;;  %v3494_v13 = vld [vmem:[#allocation3 + $0xe0] sm:$0xff] }
  0x55   :  { %263 = vmatmul.f32.gmra.mxu0 %v3315_v55  ;;  %472 = vmatmul.f32.gmra.mxu1 %v3315_v55 }
  0x56   :  { %668 = vmatpush.msrb.mxu2 %v173_v56  ;;  %877 = vmatpush.msrb.mxu3 %v174_v14 }
  0x57   :  { %440 = vmatmul.f32.gmra.mxu2 %v170_v57  ;;  %649 = vmatmul.f32.gmra.mxu3 %v170_v57 }
  0x5d   :  { %266 = vmatmul.f32.gmra.mxu0 %v3319_v58  ;;  %475 = vmatmul.f32.gmra.mxu1 %v3319_v58 }
  0x5f   :  { %669 = vmatmul.f32.vlgmr.msrb.gmra.mxu2 %v3299_v32  ;;  %878 = vmatmul.f32.vlgmr.msrb.gmra.mxu3 %v3299_v32 }
  0x65   :  { %269 = vmatmul.f32.gmra.mxu0 %v3324_v59  ;;  %478 = vmatmul.f32.gmra.mxu1 %v3324_v59 }
  0x67   :  { %672 = vmatmul.f32.gmra.mxu2 %v3303_v37  ;;  %881 = vmatmul.f32.gmra.mxu3 %v3303_v37 }
  0x6d   :  { %272 = vmatmul.f32.gmra.mxu0 %v3329_v0  ;;  %481 = vmatmul.f32.gmra.mxu1 %v3329_v0 }
  0x6f   :  { %675 = vmatmul.f32.gmra.mxu2 %v3307_v43  ;;  %884 = vmatmul.f32.gmra.mxu3 %v3307_v43 }
  0x75   :  { %275 = vmatmul.f32.gmra.mxu0 %v3334_v5  ;;  %484 = vmatmul.f32.gmra.mxu1 %v3334_v5 }
  0x77   :  { %678 = vmatmul.f32.gmra.mxu2 %v3311_v49  ;;  %887 = vmatmul.f32.gmra.mxu3 %v3311_v49 }
  0x7d   :  { %278 = vmatmul.f32.gmra.mxu0 %v3339_v10  ;;  %487 = vmatmul.f32.gmra.mxu1 %v3339_v10 }
  0x7f   :  { %681 = vmatmul.f32.gmra.mxu2 %v3315_v55  ;;  %890 = vmatmul.f32.gmra.mxu3 %v3315_v55  ;;  %v3444_v55 = vld [vmem:[#allocation3 + $0xb8] sm:$0xff] }
  0x85   :  { %281 = vmatmul.f32.gmra.mxu0 %v3344_v15  ;;  %490 = vmatmul.f32.gmra.mxu1 %v3344_v15 }
  0x87   :  { %684 = vmatmul.f32.gmra.mxu2 %v3319_v58  ;;  %893 = vmatmul.f32.gmra.mxu3 %v3319_v58 }
  0x8d   :  { %284 = vmatmul.f32.gmra.mxu0 %v3350_v16  ;;  %493 = vmatmul.f32.gmra.mxu1 %v3350_v16 }
  0x8f   :  { %687 = vmatmul.f32.gmra.mxu2 %v3324_v59  ;;  %896 = vmatmul.f32.gmra.mxu3 %v3324_v59  ;;  %v3454_v59 = vld [vmem:[#allocation3 + $0xc0] sm:$0xff] }
  0x95   :  { %287 = vmatmul.f32.gmra.mxu0 %v3356_v17  ;;  %496 = vmatmul.f32.gmra.mxu1 %v3356_v17 }
  0x97   :  { %690 = vmatmul.f32.gmra.mxu2 %v3329_v0  ;;  %899 = vmatmul.f32.gmra.mxu3 %v3329_v0 }
  0x9d   :  { %290 = vmatmul.f32.gmra.mxu0 %v3362_v18  ;;  %499 = vmatmul.f32.gmra.mxu1 %v3362_v18 }
  0x9f   :  { %693 = vmatmul.f32.gmra.mxu2 %v3334_v5  ;;  %902 = vmatmul.f32.gmra.mxu3 %v3334_v5 }
  0xa5   :  { %293 = vmatmul.f32.gmra.mxu0 %v3368_v19  ;;  %502 = vmatmul.f32.gmra.mxu1 %v3368_v19 }
  0xa7   :  { %696 = vmatmul.f32.gmra.mxu2 %v3339_v10  ;;  %905 = vmatmul.f32.gmra.mxu3 %v3339_v10 }
  0xad   :  { %296 = vmatmul.f32.gmra.mxu0 %v3374_v20  ;;  %505 = vmatmul.f32.gmra.mxu1 %v3374_v20 }
  0xaf   :  { %699 = vmatmul.f32.gmra.mxu2 %v3344_v15  ;;  %908 = vmatmul.f32.gmra.mxu3 %v3344_v15 }
  0xb2   :  { %v3380_v21 = vpop.f32.mrf.mxu0  ;;  %v3382_v22 = vpop.f32.mrf.mxu1 }
  0xb5   :  { %299 = vmatmul.f32.gmra.mxu0 %v3384_v23  ;;  %508 = vmatmul.f32.gmra.mxu1 %v3384_v23 }
  0xb7   :  { %702 = vmatmul.f32.gmra.mxu2 %v3350_v16  ;;  %911 = vmatmul.f32.gmra.mxu3 %v3350_v16 }
  0xba   :  { %v3390_v24 = vpop.f32.mrf.mxu0  ;;  %v3392_v25 = vpop.f32.mrf.mxu1 }
  0xbb   :  { %v429_v27 = vpop.f32.mrf.mxu2  ;;  %v638_v28 = vpop.f32.mrf.mxu3 }
  0xbc   :  { %v3510_v27 = vld [vmem:[#allocation3 + $0xf0] sm:$0xff] }
  0xbd   :  { %302 = vmatmul.f32.gmra.mxu0 %v3394_v26  ;;  %511 = vmatmul.f32.gmra.mxu1 %v3394_v26 }
  0xbf   :  { %705 = vmatmul.f32.gmra.mxu2 %v3356_v17  ;;  %914 = vmatmul.f32.gmra.mxu3 %v3356_v17 }
  0xc2   :  { %v258_v29 = vpop.f32.mrf.mxu0  ;;  %v3400_v30 = vpop.f32.mrf.mxu1 }
  0xc3   :  { %v432_v32 = vpop.f32.mrf.mxu2  ;;  %v641_v33 = vpop.f32.mrf.mxu3 }
  0xc5   :  { %305 = vmatmul.f32.gmra.mxu0 %v3402_v31  ;;  %514 = vmatmul.f32.gmra.mxu1 %v3402_v31 }
  0xc7   :  { %708 = vmatmul.f32.gmra.mxu2 %v3362_v18  ;;  %917 = vmatmul.f32.gmra.mxu3 %v3362_v18  ;;  %v3502_v18 = vld [vmem:[#allocation3 + $0xe8] sm:$0xff] }
  0xca   :  { %v261_v34 = vpop.f32.mrf.mxu0  ;;  %v3408_v35 = vpop.f32.mrf.mxu1 }
  0xcb   :  { %v435_v37 = vpop.f32.mrf.mxu2  ;;  %v644_v38 = vpop.f32.mrf.mxu3 }
  0xcd   :  { %308 = vmatmul.f32.gmra.mxu0 %v3410_v36  ;;  %517 = vmatmul.f32.gmra.mxu1 %v3410_v36 }
  0xcf   :  { %711 = vmatmul.f32.gmra.mxu2 %v3368_v19  ;;  %920 = vmatmul.f32.gmra.mxu3 %v3368_v19 }
  0xd2   :  { %v264_v39 = vpop.f32.mrf.mxu0  ;;  %v3416_v40 = vpop.f32.mrf.mxu1 }
  0xd3   :  { %v438_v42 = vpop.f32.mrf.mxu2  ;;  %v647_v43 = vpop.f32.mrf.mxu3  ;;  %v3530_v39 = vld [vmem:[#allocation3 + $0x100] sm:$0xff] }
  0xd5   :  { %311 = vmatmul.f32.gmra.mxu0 %v3418_v41  ;;  %520 = vmatmul.f32.gmra.mxu1 %v3418_v41 }
  0xd7   :  { %714 = vmatmul.f32.gmra.mxu2 %v3374_v20  ;;  %923 = vmatmul.f32.gmra.mxu3 %v3374_v20 }
  0xda   :  { %v267_v44 = vpop.f32.mrf.mxu0  ;;  %v3424_v45 = vpop.f32.mrf.mxu1 }
  0xdb   :  { %v441_v47 = vpop.f32.mrf.mxu2  ;;  %v650_v48 = vpop.f32.mrf.mxu3 }
  0xdc   :  { %1564 = vmatpush.xpose.msra.mxu3 %v650_v48 }
  0xdd   :  { %314 = vmatmul.f32.gmra.mxu0 %v3426_v46  ;;  %523 = vmatmul.f32.gmra.mxu1 %v3426_v46 }
  0xdf   :  { %717 = vmatmul.f32.gmra.mxu2 %v3384_v23  ;;  %926 = vmatmul.f32.gmra.mxu3 %v3384_v23 }
  0xe0   :  { %1565 = vmatpush.xpose.msra.mxu3 %v647_v43 }
  0xe2   :  { %v270_v49 = vpop.f32.mrf.mxu0  ;;  %v3432_v50 = vpop.f32.mrf.mxu1 }
  0xe3   :  { %v3436_v52 = vpop.f32.mrf.mxu2  ;;  %v3482_v5 = vpop.f32.mrf.mxu3 }
  0xe4   :  { %1566 = vmatpush.xpose.msra.mxu3 %v644_v38 }
  0xe5   :  { %317 = vmatmul.f32.gmra.mxu0 %v3434_v51  ;;  %526 = vmatmul.f32.gmra.mxu1 %v3434_v51 }
  0xe7   :  { %720 = vmatmul.f32.gmra.mxu2 %v3394_v26  ;;  %929 = vmatmul.f32.gmra.mxu3 %v3394_v26 }
  0xe8   :  { %1567 = vmatpush.xpose.msra.mxu3 %v641_v33  ;;  %v3518_v33 = vld [vmem:[#allocation3 + $0xf8] sm:$0xff] }
  0xea   :  { %v273_v53 = vpop.f32.mrf.mxu0  ;;  %v3442_v54 = vpop.f32.mrf.mxu1 }
  0xeb   :  { %v3446_v56 = vpop.f32.mrf.mxu2  ;;  %v3492_v10 = vpop.f32.mrf.mxu3  ;;  %v3553_v53 = vld [vmem:[#allocation3 + $0x110] sm:$0xff] }
  0xec   :  { %1568 = vmatpush.xpose.msra.mxu3 %v638_v28 }
  0xed   :  { %320 = vmatmul.f32.gmra.mxu0 %v3444_v55  ;;  %529 = vmatmul.f32.gmra.mxu1 %v3444_v55 }
  0xef   :  { %723 = vmatmul.f32.gmra.mxu2 %v3402_v31  ;;  %932 = vmatmul.f32.gmra.mxu3 %v3402_v31 }
  0xf2   :  { %v276_v57 = vpop.f32.mrf.mxu0  ;;  %v3452_v58 = vpop.f32.mrf.mxu1 }
  0xf3   :  { %v3456_v60 = vpop.f32.mrf.mxu2  ;;  %v885_v15 = vpop.f32.mrf.mxu3 }
  0xf5   :  { %323 = vmatmul.f32.gmra.mxu0 %v3454_v59  ;;  %532 = vmatmul.f32.gmra.mxu1 %v3454_v59 }
  0xf7   :  { %726 = vmatmul.f32.gmra.mxu2 %v3410_v36  ;;  %935 = vmatmul.f32.gmra.mxu3 %v3410_v36 }
  0xfa   :  { %v279_v61 = vpop.f32.mrf.mxu0  ;;  %v3462_v62 = vpop.f32.mrf.mxu1 }
  0xfb   :  { %v3466_v0 = vpop.f32.mrf.mxu2  ;;  %v888_v20 = vpop.f32.mrf.mxu3 }
  0xfc   :  { %v3605_v20 = vld [vmem:[#allocation3 + $0x138] sm:$0xff] }
  0xfd   :  { %326 = vmatmul.f32.gmra.mxu0 %v3464_v63  ;;  %535 = vmatmul.f32.gmra.mxu1 %v3464_v63 }
  0xff   :  { %729 = vmatmul.f32.gmra.mxu2 %v3418_v41  ;;  %938 = vmatmul.f32.gmra.mxu3 %v3418_v41 }
 0x102   :  { %v282_v1 = vpop.f32.mrf.mxu0  ;;  %v3472_v2 = vpop.f32.mrf.mxu1 }
 0x103   :  { %v3476_v4 = vpop.f32.mrf.mxu2  ;;  %v891_v29 = vpop.f32.mrf.mxu3 }
 0x105   :  { %329 = vmatmul.f32.gmra.mxu0 %v3474_v3  ;;  %538 = vmatmul.f32.gmra.mxu1 %v3474_v3 }
 0x107   :  { %732 = vmatmul.f32.gmra.mxu2 %v3426_v46  ;;  %941 = vmatmul.f32.gmra.mxu3 %v3426_v46  ;;  %v3542_v46 = vld [vmem:[#allocation3 + $0x108] sm:$0xff] }
 0x10a   :  { %v285_v6 = vpop.f32.mrf.mxu0  ;;  %v494_v7 = vpop.f32.mrf.mxu1 }
 0x10b   :  { %v3486_v9 = vpop.f32.mrf.mxu2  ;;  %v894_v36 = vpop.f32.mrf.mxu3 }
 0x10c   :  { %v3630_v36 = vld [vmem:[#allocation3 + $0x148] sm:$0xff] }
 0x10d   :  { %332 = vmatmul.f32.gmra.mxu0 %v3484_v8  ;;  %541 = vmatmul.f32.gmra.mxu1 %v3484_v8 }
 0x10f   :  { %735 = vmatmul.f32.gmra.mxu2 %v3434_v51  ;;  %944 = vmatmul.f32.gmra.mxu3 %v3434_v51 }
 0x112   :  { %v288_v11 = vpop.f32.mrf.mxu0  ;;  %v497_v12 = vpop.f32.mrf.mxu1 }
 0x113   :  { %v3496_v14 = vpop.f32.mrf.mxu2  ;;  %v897_v42 = vpop.f32.mrf.mxu3 }
 0x114   :  { %v3667_v42 = vld [vmem:[#allocation3 + $0x160] sm:$0xff] }
 0x115   :  { %335 = vmatmul.f32.gmra.mxu0 %v3494_v13  ;;  %544 = vmatmul.f32.gmra.mxu1 %v3494_v13 }
 0x117   :  { %738 = vmatmul.f32.gmra.mxu2 %v3444_v55  ;;  %947 = vmatmul.f32.gmra.mxu3 %v3444_v55 }
 0x11a   :  { %v291_v16 = vpop.f32.mrf.mxu0  ;;  %v500_v17 = vpop.f32.mrf.mxu1 }
 0x11b   :  { %v3504_v19 = vpop.f32.mrf.mxu2  ;;  %v900_v48 = vpop.f32.mrf.mxu3  ;;  %v3593_v16 = vld [vmem:[#allocation3 + $0x130] sm:$0xff] }
 0x11d   :  { %338 = vmatmul.f32.gmra.mxu0 %v3502_v18  ;;  %547 = vmatmul.f32.gmra.mxu1 %v3502_v18 }
 0x11f   :  { %741 = vmatmul.f32.gmra.mxu2 %v3454_v59  ;;  %950 = vmatmul.f32.gmra.mxu3 %v3454_v59 }
 0x122   :  { %v294_v23 = vpop.f32.mrf.mxu0  ;;  %v503_v26 = vpop.f32.mrf.mxu1 }
 0x123   :  { %v3512_v28 = vpop.f32.mrf.mxu2  ;;  %v903_v55 = vpop.f32.mrf.mxu3 }
 0x125   :  { %341 = vmatmul.f32.gmra.mxu0 %v3510_v27  ;;  %550 = vmatmul.f32.gmra.mxu1 %v3510_v27 }
 0x127   :  { %744 = vmatmul.f32.gmra.mxu2 %v3464_v63  ;;  %953 = vmatmul.f32.gmra.mxu3 %v3464_v63 }
 0x12a   :  { %v297_v31 = vpop.f32.mrf.mxu0  ;;  %v506_v32 = vpop.f32.mrf.mxu1 }
 0x12b   :  { %1495 = vmatpush.xpose.msrb.mxu0 %v506_v32  ;;  %v3520_v34 = vpop.f32.mrf.mxu2 }
 0x12d   :  { %344 = vmatmul.f32.gmra.mxu0 %v3518_v33  ;;  %553 = vmatmul.f32.gmra.mxu1 %v3518_v33 }
 0x12f   :  { %1496 = vmatpush.xpose.msrb.mxu0 %v503_v26  ;;  %747 = vmatmul.f32.gmra.mxu2 %v3474_v3  ;;  %v3616_v26 = vld [vmem:[#allocation3 + $0x140] sm:$0xff] }
 0x130   :  { %956 = vmatmul.f32.gmra.mxu3 %v3474_v3 }
 0x132   :  { %v3526_v37 = vpop.f32.mrf.mxu0  ;;  %v3528_v38 = vpop.f32.mrf.mxu1 }
 0x133   :  { %1497 = vmatpush.xpose.msrb.mxu0 %v500_v17  ;;  %v3532_v41 = vpop.f32.mrf.mxu2 }
 0x135   :  { %347 = vmatmul.f32.gmra.mxu0 %v3530_v39  ;;  %556 = vmatmul.f32.gmra.mxu1 %v3530_v39 }
 0x137   :  { %1498 = vmatpush.xpose.msrb.mxu0 %v497_v12  ;;  %750 = vmatmul.f32.gmra.mxu2 %v3484_v8  ;;  %v3583_v12 = vld [vmem:[#allocation3 + $0x128] sm:$0xff] }
 0x138   :  { %959 = vmatmul.f32.gmra.mxu3 %v3484_v8 }
 0x13a   :  { %v3538_v43 = vpop.f32.mrf.mxu0  ;;  %v3540_v44 = vpop.f32.mrf.mxu1 }
 0x13b   :  { %1499 = vmatpush.xpose.msrb.mxu0 %v494_v7  ;;  %v3544_v47 = vpop.f32.mrf.mxu2  ;;  %v3573_v7 = vld [vmem:[#allocation3 + $0x120] sm:$0xff] }
 0x13d   :  { %350 = vmatmul.f32.gmra.mxu0 %v3542_v46  ;;  %559 = vmatmul.f32.gmra.mxu1 %v3542_v46 }
 0x13f   :  { %1500 = vmatpush.xpose.msrb.mxu0 %v3472_v2  ;;  %753 = vmatmul.f32.gmra.mxu2 %v3494_v13  ;;  %v3563_v2 = vld [vmem:[#allocation3 + $0x118] sm:$0xff] }
 0x140   :  { %962 = vmatmul.f32.gmra.mxu3 %v3494_v13 }
 0x142   :  { %v306_v49 = vpop.f32.mrf.mxu0  ;;  %v3551_v51 = vpop.f32.mrf.mxu1 }
 0x143   :  { %1501 = vmatpush.xpose.msrb.mxu0 %v3462_v62  ;;  %v706_v57 = vpop.f32.mrf.mxu2 }
 0x145   :  { %353 = vmatmul.f32.gmra.mxu0 %v3553_v53  ;;  %562 = vmatmul.f32.gmra.mxu1 %v3553_v53 }
 0x147   :  { %1502 = vmatpush.xpose.msrb.mxu0 %v3452_v58  ;;  %756 = vmatmul.f32.gmra.mxu2 %v3502_v18  ;;  %v906_v58 = vpop.f32.mrf.mxu3 }
 0x148   :  { %965 = vmatmul.f32.gmra.mxu3 %v3502_v18  ;;  %v3683_v58 = vld [vmem:[#allocation3 + $0x170] sm:$0xff] }
 0x14a   :  { %v309_v61 = vpop.f32.mrf.mxu0  ;;  %v3561_v1 = vpop.f32.mrf.mxu1 }
 0x14b   :  { %1503 = vmatpush.xpose.msrb.mxu0 %v3442_v54  ;;  %v709_v62 = vpop.f32.mrf.mxu2 }
 0x14d   :  { %356 = vmatmul.f32.gmra.mxu0 %v3563_v2  ;;  %565 = vmatmul.f32.gmra.mxu1 %v3563_v2 }
 0x14f   :  { %1504 = vmatpush.xpose.msrb.mxu0 %v3432_v50  ;;  %759 = vmatmul.f32.gmra.mxu2 %v3510_v27  ;;  %v909_v50 = vpop.f32.mrf.mxu3 }
 0x150   :  { %968 = vmatmul.f32.gmra.mxu3 %v3510_v27 }
 0x152   :  { %v312_v59 = vpop.f32.mrf.mxu0  ;;  %v3571_v6 = vpop.f32.mrf.mxu1 }
 0x153   :  { %1505 = vmatpush.xpose.msrb.mxu0 %v3424_v45  ;;  %v712_v54 = vpop.f32.mrf.mxu2 }
 0x155   :  { %359 = vmatmul.f32.gmra.mxu0 %v3573_v7  ;;  %568 = vmatmul.f32.gmra.mxu1 %v3573_v7 }
 0x157   :  { %1506 = vmatpush.xpose.msrb.mxu0 %v3416_v40  ;;  %762 = vmatmul.f32.gmra.mxu2 %v3518_v33  ;;  %v912_v40 = vpop.f32.mrf.mxu3 }
 0x158   :  { %971 = vmatmul.f32.gmra.mxu3 %v3518_v33 }
 0x15a   :  { %v315_v63 = vpop.f32.mrf.mxu0  ;;  %v3581_v11 = vpop.f32.mrf.mxu1 }
 0x15b   :  { %1507 = vmatpush.xpose.msrb.mxu0 %v3408_v35  ;;  %v715_v45 = vpop.f32.mrf.mxu2  ;;  %v3691_v63 = vld [vmem:[#allocation3 + $0x178] sm:$0xff] }
 0x15d   :  { %362 = vmatmul.f32.gmra.mxu0 %v3583_v12  ;;  %571 = vmatmul.f32.gmra.mxu1 %v3583_v12 }
 0x15f   :  { %1508 = vmatpush.xpose.msrb.mxu0 %v3400_v30  ;;  %765 = vmatmul.f32.gmra.mxu2 %v3530_v39  ;;  %v915_v30 = vpop.f32.mrf.mxu3 }
 0x160   :  { %974 = vmatmul.f32.gmra.mxu3 %v3530_v39  ;;  %v3703_v30 = vld [vmem:[#allocation3 + $0x180] sm:$0xff] }
 0x162   :  { %v318_v3 = vpop.f32.mrf.mxu0  ;;  %v3591_v15 = vpop.f32.mrf.mxu1 }
 0x163   :  { %1509 = vmatpush.xpose.msrb.mxu0 %v3392_v25  ;;  %v3596_v35 = vpop.f32.mrf.mxu2 }
 0x165   :  { %365 = vmatmul.f32.gmra.mxu0 %v3593_v16  ;;  %574 = vmatmul.f32.gmra.mxu1 %v3593_v16 }
 0x167   :  { %1510 = vmatpush.xpose.msrb.mxu0 %v3382_v22  ;;  %768 = vmatmul.f32.gmra.mxu2 %v3542_v46  ;;  %v918_v22 = vpop.f32.mrf.mxu3 }
 0x168   :  { %977 = vmatmul.f32.gmra.mxu3 %v3542_v46 }
 0x16a   :  { %v321_v8 = vpop.f32.mrf.mxu0  ;;  %v3603_v17 = vpop.f32.mrf.mxu1 }
 0x16b   :  { %2151 = vmatpush.msra.mxu0 %v715_v45  ;;  %v3607_v25 = vpop.f32.mrf.mxu2 }
 0x16d   :  { %2152 = vmatpush.msra.mxu0 %v712_v54  ;;  %577 = vmatmul.f32.gmra.mxu1 %v3605_v20 }
 0x16e   :  { %368 = vmatmul.f32.gmra.mxu0 %v3605_v20 }
 0x16f   :  { %2153 = vmatpush.msra.mxu0 %v709_v62  ;;  %771 = vmatmul.f32.gmra.mxu2 %v3553_v53  ;;  %v921_v18 = vpop.f32.mrf.mxu3 }
 0x170   :  { %980 = vmatmul.f32.gmra.mxu3 %v3553_v53  ;;  %v3715_v18 = vld [vmem:[#allocation3 + $0x188] sm:$0xff] }
 0x171   :  { %2154 = vmatpush.msra.mxu0 %v706_v57  ;;  %v3675_v57 = vld [vmem:[#allocation3 + $0x168] sm:$0xff] }
 0x172   :  { %v324_v13 = vpop.f32.mrf.mxu0  ;;  %v3614_v23 = vpop.f32.mrf.mxu1 }
 0x173   :  { %2155 = vmatpush.msra.mxu0 %v3544_v47  ;;  %v3619_v29 = vpop.f32.mrf.mxu2 }
 0x175   :  { %2156 = vmatpush.msra.mxu0 %v3532_v41  ;;  %580 = vmatmul.f32.gmra.mxu1 %v3616_v26  ;;  %v3657_v41 = vld [vmem:[#allocation3 + $0x158] sm:$0xff] }
 0x176   :  { %371 = vmatmul.f32.gmra.mxu0 %v3616_v26 }
 0x177   :  { %2157 = vmatpush.msra.mxu0 %v3520_v34  ;;  %774 = vmatmul.f32.gmra.mxu2 %v3563_v2 }
 0x178   :  { %983 = vmatmul.f32.gmra.mxu3 %v3563_v2 }
 0x179   :  { %2158 = vmatpush.msra.mxu0 %v3512_v28 }
 0x17a   :  { %v327_v31 = vpop.f32.mrf.mxu0  ;;  %v3628_v32 = vpop.f32.mrf.mxu1 }
 0x17b   :  { %2159 = vmatpush.msra.mxu0 %v3504_v19  ;;  %v3633_v27 = vpop.f32.mrf.mxu2  ;;  %v924_v19 = vpop.f32.mrf.mxu3 }
 0x17d   :  { %2160 = vmatpush.msra.mxu0 %v3496_v14  ;;  %583 = vmatmul.f32.gmra.mxu1 %v3630_v36  ;;  %v3644_v14 = vld [vmem:[#allocation3 + $0x150] sm:$0xff] }
 0x17e   :  { %374 = vmatmul.f32.gmra.mxu0 %v3630_v36 }
 0x17f   :  { %2161 = vmatpush.msra.mxu0 %v3486_v9  ;;  %777 = vmatmul.f32.gmra.mxu2 %v3573_v7 }
 0x180   :  { %986 = vmatmul.f32.gmra.mxu3 %v3573_v7 }
 0x181   :  { %2162 = vmatpush.msra.mxu0 %v3476_v4 }
 0x182   :  { %v330_v28 = vpop.f32.mrf.mxu0  ;;  %v3642_v34 = vpop.f32.mrf.mxu1 }
 0x183   :  { %2163 = vmatpush.msra.mxu0 %v3466_v0  ;;  %v3647_v33 = vpop.f32.mrf.mxu2  ;;  %v3655_v0 = vpop.f32.mrf.mxu3 }
 0x185   :  { %2164 = vmatpush.msra.mxu0 %v3456_v60  ;;  %586 = vmatmul.f32.gmra.mxu1 %v3644_v14 }
 0x186   :  { %377 = vmatmul.f32.gmra.mxu0 %v3644_v14 }
 0x187   :  { %2165 = vmatpush.msra.mxu0 %v3446_v56  ;;  %780 = vmatmul.f32.gmra.mxu2 %v3583_v12 }
 0x188   :  { %989 = vmatmul.f32.gmra.mxu3 %v3583_v12 }
 0x189   :  { %2166 = vmatpush.msra.mxu0 %v3436_v52 }
 0x18a   :  { %v333_v4 = vpop.f32.mrf.mxu0  ;;  %v542_v9 = vpop.f32.mrf.mxu1 }
 0x18b   :  { %v3659_v60 = vpop.f32.mrf.mxu2  ;;  %v3665_v56 = vpop.f32.mrf.mxu3  ;;  %v3726_v4 = vld [vmem:[#allocation3 + $0x190] sm:$0xff] }
 0x18d   :  { %589 = vmatmul.f32.gmra.mxu1 %v3657_v41 }
 0x18e   :  { %380 = vmatmul.f32.gmra.mxu0 %v3657_v41 }
 0x18f   :  { %783 = vmatmul.f32.gmra.mxu2 %v3593_v16 }
 0x190   :  { %992 = vmatmul.f32.gmra.mxu3 %v3593_v16 }
 0x192   :  { %v336_v52 = vpop.f32.mrf.mxu0  ;;  %v545_v39 = vpop.f32.mrf.mxu1 }
 0x193   :  { %v3669_v47 = vpop.f32.mrf.mxu2  ;;  %v933_v46 = vpop.f32.mrf.mxu3 }
 0x195   :  { %592 = vmatmul.f32.gmra.mxu1 %v3667_v42 }
 0x196   :  { %383 = vmatmul.f32.gmra.mxu0 %v3667_v42 }
 0x197   :  { %786 = vmatmul.f32.gmra.mxu2 %v3605_v20 }
 0x198   :  { %995 = vmatmul.f32.gmra.mxu3 %v3605_v20 }
 0x19a   :  { %v339_v48 = vpop.f32.mrf.mxu0  ;;  %v548_v49 = vpop.f32.mrf.mxu1 }
 0x19b   :  { %v3677_v55 = vpop.f32.mrf.mxu2  ;;  %v936_v53 = vpop.f32.mrf.mxu3  ;;  %v3746_v48 = vld [vmem:[#allocation3 + $0x1a0] sm:$0xff] }
 0x19c   :  { %v3756_v53 = vld [vmem:[#allocation3 + $0x1a8] sm:$0xff] }
 0x19d   :  { %595 = vmatmul.f32.gmra.mxu1 %v3675_v57 }
 0x19e   :  { %386 = vmatmul.f32.gmra.mxu0 %v3675_v57 }
 0x19f   :  { %789 = vmatmul.f32.gmra.mxu2 %v3616_v26 }
 0x1a0   :  { %998 = vmatmul.f32.gmra.mxu3 %v3616_v26 }
 0x1a2   :  { %v342_v61 = vpop.f32.mrf.mxu0  ;;  %v551_v62 = vpop.f32.mrf.mxu1 }
 0x1a3   :  { %v3685_v59 = vpop.f32.mrf.mxu2  ;;  %v939_v2 = vpop.f32.mrf.mxu3 }
 0x1a5   :  { %598 = vmatmul.f32.gmra.mxu1 %v3683_v58 }
 0x1a6   :  { %389 = vmatmul.f32.gmra.mxu0 %v3683_v58 }
 0x1a7   :  { %792 = vmatmul.f32.gmra.mxu2 %v3630_v36 }
 0x1a8   :  { %1001 = vmatmul.f32.gmra.mxu3 %v3630_v36 }
 0x1aa   :  { %v345_v54 = vpop.f32.mrf.mxu0  ;;  %v554_v50 = vpop.f32.mrf.mxu1 }
 0x1ab   :  { %1518 = vmatpush.xpose.msrb.mxu1 %v554_v50  ;;  %v3693_v45 = vpop.f32.mrf.mxu2  ;;  %v942_v7 = vpop.f32.mrf.mxu3  ;;  %v3778_v54 = vld [vmem:[#allocation3 + $0x1b8] sm:$0xff] }
 0x1ac   :  { %v3789_v7 = vld [vmem:[#allocation3 + $0x1c0] sm:$0xff] }
 0x1ad   :  { %601 = vmatmul.f32.gmra.mxu1 %v3691_v63 }
 0x1ae   :  { %392 = vmatmul.f32.gmra.mxu0 %v3691_v63 }
 0x1af   :  { %1519 = vmatpush.xpose.msrb.mxu1 %v551_v62  ;;  %795 = vmatmul.f32.gmra.mxu2 %v3644_v14  ;;  %v3766_v62 = vld [vmem:[#allocation3 + $0x1b0] sm:$0xff] }
 0x1b0   :  { %1004 = vmatmul.f32.gmra.mxu3 %v3644_v14 }
 0x1b2   :  { %v3699_v40 = vpop.f32.mrf.mxu0  ;;  %v3701_v3 = vpop.f32.mrf.mxu1 }
 0x1b3   :  { %1520 = vmatpush.xpose.msrb.mxu1 %v548_v49  ;;  %v3705_v8 = vpop.f32.mrf.mxu2  ;;  %v945_v12 = vpop.f32.mrf.mxu3 }
 0x1b5   :  { %604 = vmatmul.f32.gmra.mxu1 %v3703_v30 }
 0x1b6   :  { %395 = vmatmul.f32.gmra.mxu0 %v3703_v30 }
 0x1b7   :  { %1521 = vmatpush.xpose.msrb.mxu1 %v545_v39  ;;  %798 = vmatmul.f32.gmra.mxu2 %v3657_v41  ;;  %v3736_v39 = vld [vmem:[#allocation3 + $0x198] sm:$0xff] }
 0x1b8   :  { %1007 = vmatmul.f32.gmra.mxu3 %v3657_v41 }
 0x1ba   :  { %v3711_v22 = vpop.f32.mrf.mxu0  ;;  %v3713_v13 = vpop.f32.mrf.mxu1 }
 0x1bb   :  { %1522 = vmatpush.xpose.msrb.mxu1 %v542_v9  ;;  %v3717_v31 = vpop.f32.mrf.mxu2  ;;  %v948_v16 = vpop.f32.mrf.mxu3 }
 0x1bd   :  { %607 = vmatmul.f32.gmra.mxu1 %v3715_v18 }
 0x1be   :  { %398 = vmatmul.f32.gmra.mxu0 %v3715_v18 }
 0x1bf   :  { %1523 = vmatpush.xpose.msrb.mxu1 %v3642_v34  ;;  %801 = vmatmul.f32.gmra.mxu2 %v3667_v42 }
 0x1c0   :  { %1010 = vmatmul.f32.gmra.mxu3 %v3667_v42 }
 0x1c2   :  { %v354_v19 = vpop.f32.mrf.mxu0  ;;  %v3724_v28 = vpop.f32.mrf.mxu1 }
 0x1c3   :  { %1524 = vmatpush.xpose.msrb.mxu1 %v3628_v32  ;;  %v754_v9 = vpop.f32.mrf.mxu2  ;;  %v951_v20 = vpop.f32.mrf.mxu3 }
 0x1c5   :  { %610 = vmatmul.f32.gmra.mxu1 %v3726_v4 }
 0x1c6   :  { %401 = vmatmul.f32.gmra.mxu0 %v3726_v4 }
 0x1c7   :  { %1525 = vmatpush.xpose.msrb.mxu1 %v3614_v23  ;;  %804 = vmatmul.f32.gmra.mxu2 %v3675_v57 }
 0x1c8   :  { %1013 = vmatmul.f32.gmra.mxu3 %v3675_v57 }
 0x1ca   :  { %v357_v34 = vpop.f32.mrf.mxu0  ;;  %v3734_v52 = vpop.f32.mrf.mxu1 }
 0x1cb   :  { %1526 = vmatpush.xpose.msrb.mxu1 %v3603_v17  ;;  %v757_v32 = vpop.f32.mrf.mxu2  ;;  %v954_v23 = vpop.f32.mrf.mxu3 }
 0x1cd   :  { %613 = vmatmul.f32.gmra.mxu1 %v3736_v39 }
 0x1ce   :  { %404 = vmatmul.f32.gmra.mxu0 %v3736_v39 }
 0x1cf   :  { %1527 = vmatpush.xpose.msrb.mxu1 %v3591_v15  ;;  %807 = vmatmul.f32.gmra.mxu2 %v3683_v58 }
 0x1d0   :  { %1016 = vmatmul.f32.gmra.mxu3 %v3683_v58 }
 0x1d2   :  { %v360_v26 = vpop.f32.mrf.mxu0  ;;  %v3744_v46 = vpop.f32.mrf.mxu1 }
 0x1d3   :  { %1528 = vmatpush.xpose.msrb.mxu1 %v3581_v11  ;;  %v760_v17 = vpop.f32.mrf.mxu2  ;;  %v957_v15 = vpop.f32.mrf.mxu3 }
 0x1d5   :  { %616 = vmatmul.f32.gmra.mxu1 %v3746_v48 }
 0x1d6   :  { %407 = vmatmul.f32.gmra.mxu0 %v3746_v48 }
 0x1d7   :  { %1529 = vmatpush.xpose.msrb.mxu1 %v3571_v6  ;;  %810 = vmatmul.f32.gmra.mxu2 %v3691_v63 }
 0x1d8   :  { %1019 = vmatmul.f32.gmra.mxu3 %v3691_v63 }
 0x1da   :  { %v363_v36 = vpop.f32.mrf.mxu0  ;;  %v3754_v49 = vpop.f32.mrf.mxu1 }
 0x1db   :  { %1530 = vmatpush.xpose.msrb.mxu1 %v3561_v1  ;;  %v763_v11 = vpop.f32.mrf.mxu2  ;;  %v960_v6 = vpop.f32.mrf.mxu3 }
 0x1dd   :  { %619 = vmatmul.f32.gmra.mxu1 %v3756_v53 }
 0x1de   :  { %410 = vmatmul.f32.gmra.mxu0 %v3756_v53 }
 0x1df   :  { %1531 = vmatpush.xpose.msrb.mxu1 %v3551_v51  ;;  %813 = vmatmul.f32.gmra.mxu2 %v3703_v30 }
 0x1e0   :  { %1022 = vmatmul.f32.gmra.mxu3 %v3703_v30 }
 0x1e2   :  { %v366_v14 = vpop.f32.mrf.mxu0  ;;  %v3764_v61 = vpop.f32.mrf.mxu1 }
 0x1e3   :  { %1532 = vmatpush.xpose.msrb.mxu1 %v3540_v44  ;;  %v3769_v1 = vpop.f32.mrf.mxu2  ;;  %v963_v51 = vpop.f32.mrf.mxu3 }
 0x1e5   :  { %622 = vmatmul.f32.gmra.mxu1 %v3766_v62 }
 0x1e6   :  { %413 = vmatmul.f32.gmra.mxu0 %v3766_v62 }
 0x1e7   :  { %1533 = vmatpush.xpose.msrb.mxu1 %v3528_v38  ;;  %816 = vmatmul.f32.gmra.mxu2 %v3715_v18 }
 0x1e8   :  { %1025 = vmatmul.f32.gmra.mxu3 %v3715_v18 }
 0x1ea   :  { %v3776_v2 = vpop.f32.mrf.mxu1 }
 0x1eb   :  { %2174 = vmatpush.msra.mxu1 %v763_v11  ;;  %v369_v41 = vpop.f32.mrf.mxu0  ;;  %v3780_v44 = vpop.f32.mrf.mxu2  ;;  %v3016_v11 = vld [vmem:[#allocation3 + $0x1d8] sm:$0xff] }
 0x1ec   :  { %v966_v38 = vpop.f32.mrf.mxu3  ;;  %v3017_v41 = vld [vmem:[#allocation3 + $0x1e0] sm:$0xff] }
 0x1ed   :  { %2175 = vmatpush.msra.mxu1 %v760_v17 }
 0x1ee   :  { %416 = vmatmul.f32.gmra.mxu0 %v3778_v54  ;;  %625 = vmatmul.f32.gmra.mxu1 %v3778_v54 }
 0x1ef   :  { %2176 = vmatpush.msra.mxu1 %v757_v32  ;;  %819 = vmatmul.f32.gmra.mxu2 %v3726_v4 }
 0x1f0   :  { %1028 = vmatmul.f32.gmra.mxu3 %v3726_v4 }
 0x1f1   :  { %2177 = vmatpush.msra.mxu1 %v754_v9 }
 0x1f2   :  { %v3787_v50 = vpop.f32.mrf.mxu1 }
 0x1f3   :  { %2178 = vmatpush.msra.mxu1 %v3717_v31  ;;  %v372_v42 = vpop.f32.mrf.mxu0  ;;  %v3792_v12 = vpop.f32.mrf.mxu2 }
 0x1f4   :  { %v969_v57 = vpop.f32.mrf.mxu3 }
 0x1f5   :  { %2179 = vmatpush.msra.mxu1 %v3705_v8  ;;  %v3803_v8 = vld [vmem:[#allocation3 + $0x1c8] sm:$0xff] }
 0x1f6   :  { %419 = vmatmul.f32.gmra.mxu0 %v3789_v7  ;;  %628 = vmatmul.f32.gmra.mxu1 %v3789_v7 }
 0x1f7   :  { %2180 = vmatpush.msra.mxu1 %v3693_v45  ;;  %822 = vmatmul.f32.gmra.mxu2 %v3736_v39 }
 0x1f8   :  { %1031 = vmatmul.f32.gmra.mxu3 %v3736_v39 }
 0x1f9   :  { %2181 = vmatpush.msra.mxu1 %v3685_v59 }
 0x1fa   :  { %v3801_v16 = vpop.f32.mrf.mxu1 }
 0x1fb   :  { %2182 = vmatpush.msra.mxu1 %v3677_v55  ;;  %v375_v31 = vpop.f32.mrf.mxu0  ;;  %v3806_v58 = vpop.f32.mrf.mxu2 }
 0x1fc   :  { %v972_v55 = vpop.f32.mrf.mxu3  ;;  %v3018_v31 = vld [vmem:[#allocation3 + $0x1e8] sm:$0xff] }
 0x1fd   :  { %2183 = vmatpush.msra.mxu1 %v3669_v47  ;;  %v3815_v47 = vld [vmem:[#allocation3 + $0x1d0] sm:$0xff] }
 0x1fe   :  { %422 = vmatmul.f32.gmra.mxu0 %v3803_v8  ;;  %631 = vmatmul.f32.gmra.mxu1 %v3803_v8 }
 0x1ff   :  { %2184 = vmatpush.msra.mxu1 %v3659_v60  ;;  %825 = vmatmul.f32.gmra.mxu2 %v3746_v48 }
 0x200   :  { %1034 = vmatmul.f32.gmra.mxu3 %v3746_v48 }
 0x201   :  { %2185 = vmatpush.msra.mxu1 %v3647_v33 }
 0x202   :  { %v587_v45 = vpop.f32.mrf.mxu1 }
 0x203   :  { %2186 = vmatpush.msra.mxu1 %v3633_v27  ;;  %v378_v59 = vpop.f32.mrf.mxu0  ;;  %v3818_v63 = vpop.f32.mrf.mxu2 }
 0x204   :  { %v3826_v27 = vpop.f32.mrf.mxu3 }
 0x205   :  { %2187 = vmatpush.msra.mxu1 %v3619_v29 }
 0x206   :  { %425 = vmatmul.f32.gmra.mxu0 %v3815_v47  ;;  %634 = vmatmul.f32.gmra.mxu1 %v3815_v47 }
 0x207   :  { %2188 = vmatpush.msra.mxu1 %v3607_v25  ;;  %828 = vmatmul.f32.gmra.mxu2 %v3756_v53 }
 0x208   :  { %1037 = vmatmul.f32.gmra.mxu3 %v3756_v53 }
 0x209   :  { %2189 = vmatpush.msra.mxu1 %v3596_v35 }
 0x20a   :  { %v590_v60 = vpop.f32.mrf.mxu1 }
 0x20b   :  { %v381_v33 = vpop.f32.mrf.mxu0  ;;  %v3828_v19 = vpop.f32.mrf.mxu2 }
 0x20c   :  { %v3834_v25 = vpop.f32.mrf.mxu3 }
 0x20e   :  { %1511 = vmatmul.f32.vlgmr.msrb.gmra.mxu0 %v3380_v21  ;;  %1534 = vmatmul.f32.vlgmr.msrb.gmra.mxu1 %v3526_v37 }
 0x20f   :  { %831 = vmatmul.f32.gmra.mxu2 %v3766_v62 }
 0x210   :  { %1040 = vmatmul.f32.gmra.mxu3 %v3766_v62 }
 0x212   :  { %v593_v35 = vpop.f32.mrf.mxu1 }
 0x213   :  { %v384_v29 = vpop.f32.mrf.mxu0  ;;  %v3836_v30 = vpop.f32.mrf.mxu2 }
 0x214   :  { %v981_v18 = vpop.f32.mrf.mxu3 }
 0x216   :  { %1514 = vmatmul.f32.gmra.mxu0 %v3390_v24  ;;  %1537 = vmatmul.f32.gmra.mxu1 %v3538_v43 }
 0x217   :  { %834 = vmatmul.f32.gmra.mxu2 %v3778_v54 }
 0x218   :  { %1043 = vmatmul.f32.gmra.mxu3 %v3778_v54 }
 0x21a   :  { %v596_v9 = vpop.f32.mrf.mxu1 }
 0x21b   :  { %v387_v21 = vpop.f32.mrf.mxu0  ;;  %v3842_v37 = vpop.f32.mrf.mxu2 }
 0x21c   :  { %v984_v20 = vpop.f32.mrf.mxu3 }
 0x21f   :  { %837 = vmatmul.f32.gmra.mxu2 %v3789_v7 }
 0x220   :  { %1046 = vmatmul.f32.gmra.mxu3 %v3789_v7 }
 0x222   :  { %v599_v32 = vpop.f32.mrf.mxu1 }
 0x223   :  { %v390_v34 = vpop.f32.mrf.mxu0  ;;  %v3846_v23 = vpop.f32.mrf.mxu2 }
 0x224   :  { %v987_v24 = vpop.f32.mrf.mxu3 }
 0x227   :  { %840 = vmatmul.f32.gmra.mxu2 %v3803_v8 }
 0x228   :  { %1049 = vmatmul.f32.gmra.mxu3 %v3803_v8 }
 0x22a   :  { %v602_v4 = vpop.f32.mrf.mxu1 }
 0x22b   :  { %v393_v43 = vpop.f32.mrf.mxu0  ;;  %1541 = vmatpush.xpose.msra.mxu2 %v602_v4  ;;  %v3850_v26 = vpop.f32.mrf.mxu2 }
 0x22c   :  { %v990_v39 = vpop.f32.mrf.mxu3 }
 0x22f   :  { %1542 = vmatpush.xpose.msra.mxu2 %v599_v32 }
 0x230   :  { %843 = vmatmul.f32.gmra.mxu2 %v3815_v47  ;;  %1052 = vmatmul.f32.gmra.mxu3 %v3815_v47 }
 0x232   :  { %v3856_v15 = vpop.f32.mrf.mxu1 }
 0x233   :  { %v3854_v17 = vpop.f32.mrf.mxu0  ;;  %1543 = vmatpush.xpose.msra.mxu2 %v596_v9  ;;  %v3858_v48 = vpop.f32.mrf.mxu2 }
 0x234   :  { %v993_v36 = vpop.f32.mrf.mxu3 }
 0x237   :  { %1544 = vmatpush.xpose.msra.mxu2 %v593_v35 }
 0x238   :  { %846 = vmatmul.f32.gmra.mxu2 %v3016_v11  ;;  %1055 = vmatmul.f32.gmra.mxu3 %v3016_v11 }
 0x23a   :  { %v3863_v53 = vpop.f32.mrf.mxu1 }
 0x23b   :  { %v3861_v6 = vpop.f32.mrf.mxu0  ;;  %1545 = vmatpush.xpose.msra.mxu2 %v590_v60  ;;  %v799_v14 = vpop.f32.mrf.mxu2 }
 0x23c   :  { %v996_v51 = vpop.f32.mrf.mxu3 }
 0x23f   :  { %1546 = vmatpush.xpose.msra.mxu2 %v587_v45 }
 0x240   :  { %849 = vmatmul.f32.gmra.mxu2 %v3017_v41  ;;  %1058 = vmatmul.f32.gmra.mxu3 %v3017_v41 }
 0x242   :  { %v3866_v42 = vpop.f32.mrf.mxu1 }
 0x243   :  { %v402_v38 = vpop.f32.mrf.mxu0  ;;  %1547 = vmatpush.xpose.msra.mxu2 %v3801_v16  ;;  %v802_v62 = vpop.f32.mrf.mxu2  ;;  %v3019_v16 = vld [vmem:[#allocation3 + $0x1f0] sm:$0xff] }
 0x244   :  { %v999_v57 = vpop.f32.mrf.mxu3 }
 0x247   :  { %1548 = vmatpush.xpose.msra.mxu2 %v3787_v50 }
 0x248   :  { %852 = vmatmul.f32.gmra.mxu2 %v3018_v31  ;;  %1061 = vmatmul.f32.gmra.mxu3 %v3018_v31 }
 0x24a   :  { %v3871_v59 = vpop.f32.mrf.mxu1 }
 0x24b   :  { %v405_v55 = vpop.f32.mrf.mxu0  ;;  %1549 = vmatpush.xpose.msra.mxu2 %v3776_v2  ;;  %v805_v54 = vpop.f32.mrf.mxu2  ;;  %v3020_v2 = vld [vmem:[#allocation3 + $0x1f8] sm:$0xff] }
 0x24c   :  { %v1002_v45 = vpop.f32.mrf.mxu3 }
 0x24f   :  { %1550 = vmatpush.xpose.msra.mxu2 %v3764_v61 }
 0x250   :  { %855 = vmatmul.f32.gmra.mxu2 %v3019_v16  ;;  %1064 = vmatmul.f32.gmra.mxu3 %v3019_v16 }
 0x252   :  { %v3876_v7 = vpop.f32.mrf.mxu1 }
 0x253   :  { %v408_v33 = vpop.f32.mrf.mxu0  ;;  %1551 = vmatpush.xpose.msra.mxu2 %v3754_v49  ;;  %v808_v50 = vpop.f32.mrf.mxu2 }
 0x254   :  { %v1005_v60 = vpop.f32.mrf.mxu3 }
 0x257   :  { %1552 = vmatpush.xpose.msra.mxu2 %v3744_v46 }
 0x258   :  { %858 = vmatmul.f32.gmra.mxu2 %v3020_v2  ;;  %1067 = vmatmul.f32.gmra.mxu3 %v3020_v2 }
 0x25a   :  { %v3881_v8 = vpop.f32.mrf.mxu1 }
 0x25b   :  { %v411_v29 = vpop.f32.mrf.mxu0  ;;  %1553 = vmatpush.xpose.msra.mxu2 %v3734_v52  ;;  %v811_v61 = vpop.f32.mrf.mxu2 }
 0x25c   :  { %v1008_v35 = vpop.f32.mrf.mxu3 }
 0x25f   :  { %1554 = vmatpush.xpose.msra.mxu2 %v3724_v28 }
 0x262   :  { %v3885_v49 = vpop.f32.mrf.mxu1 }
 0x263   :  { %v414_v18 = vpop.f32.mrf.mxu0  ;;  %1555 = vmatpush.xpose.msra.mxu2 %v3713_v13  ;;  %v3888_v47 = vpop.f32.mrf.mxu2 }
 0x264   :  { %v1011_v46 = vpop.f32.mrf.mxu3 }
 0x267   :  { %1556 = vmatpush.xpose.msra.mxu2 %v3701_v3 }
 0x26a   :  { %1557 = vmatmul.f32.vlgmr.msra.gmra.mxu2 %v3699_v40 }
 0x26b   :  { %2197 = vmatpush.msrb.mxu2 %v811_v61  ;;  %v417_v21 = vpop.f32.mrf.mxu0  ;;  %v626_v9 = vpop.f32.mrf.mxu1 }
 0x26c   :  { %v3892_v52 = vpop.f32.mrf.mxu2  ;;  %v1014_v28 = vpop.f32.mrf.mxu3 }
 0x26d   :  { %2198 = vmatpush.msrb.mxu2 %v808_v50 }
 0x26f   :  { %2199 = vmatpush.msrb.mxu2 %v805_v54 }
 0x271   :  { %2200 = vmatpush.msrb.mxu2 %v802_v62 }
 0x272   :  { %1560 = vmatmul.f32.gmra.mxu2 %v3711_v22  ;;  %v1477_v22 = vlaneseq }
 0x273   :  { %2201 = vmatpush.msrb.mxu2 %v799_v14  ;;  %v420_v13 = vpop.f32.mrf.mxu0  ;;  %v629_v20 = vpop.f32.mrf.mxu1 }
 0x274   :  { %v3895_v34 = vpop.f32.mrf.mxu2  ;;  %v1017_v40 = vpop.f32.mrf.mxu3 }
 0x275   :  { %2202 = vmatpush.msrb.mxu2 %v3858_v48 }
 0x277   :  { %2203 = vmatpush.msrb.mxu2 %v3850_v26 }
 0x279   :  { %2204 = vmatpush.msrb.mxu2 %v3846_v23 }
 0x27b   :  { %2205 = vmatpush.msrb.mxu2 %v3842_v37  ;;  %v423_v3 = vpop.f32.mrf.mxu0  ;;  %v632_v32 = vpop.f32.mrf.mxu1  ;;  %v3910_v37 = vand.u32 127, %v1477_v22 }
 0x27c   :  { %v3901_v24 = vpop.f32.mrf.mxu2  ;;  %v1020_v43 = vpop.f32.mrf.mxu3 }
 0x27d   :  { %2206 = vmatpush.msrb.mxu2 %v3836_v30  ;;  %vm1491_vm0 = vcmp.lt.s32.totalorder %v3910_v37, 16 }
 0x27f   :  { %2207 = vmatpush.msrb.mxu2 %v3828_v19 }
 0x281   :  { %2208 = vmatpush.msrb.mxu2 %v3818_v63  ;;  %v3207_v63 = vmov -1e+30  }
 0x282   :  { %v3920_v30 = vsel %vm1491_vm0, 0.0, %v3207_v63 }
 0x283   :  { %2209 = vmatpush.msrb.mxu2 %v3806_v58  ;;  %v426_v4 = vpop.f32.mrf.mxu0  ;;  %v635_v26 = vpop.f32.mrf.mxu1 }
 0x284   :  { %1569 = vmatpush.xpose.msra.mxu3 %v635_v26  ;;  %v3907_v23 = vpop.f32.mrf.mxu2  ;;  %v3915_v19 = vpop.f32.mrf.mxu3 }
 0x285   :  { %2210 = vmatpush.msrb.mxu2 %v3792_v12 }
 0x287   :  { %2211 = vmatpush.msrb.mxu2 %v3780_v44 }
 0x288   :  { %1570 = vmatpush.xpose.msra.mxu3 %v632_v32 }
 0x289   :  { %2212 = vmatpush.msrb.mxu2 %v3769_v1 }
 0x28b   :  { %v1512_v58 = vpop.f32.mrf.mxu0  ;;  %v1535_v39 = vpop.f32.mrf.mxu1 }
 0x28c   :  { %v1587_v48 = vmul.f32 0.17677669, %v1512_v58  ;;  %1571 = vmatpush.xpose.msra.mxu3 %v629_v20  ;;  %v829_v36 = vpop.f32.mrf.mxu2  ;;  %v1589_v12 = vmul.f32 0.17677669, %v1535_v39  ;;  %v3929_v1 = vpop.f32.mrf.mxu3 }
 0x28e   :  { %v3923_v44 = vadd.f32 %v1587_v48, %v3920_v30  ;;  %v3926_v11 = vadd.f32 %v1589_v12, %v3920_v30 }
 0x290   :  { %1572 = vmatpush.xpose.msra.mxu3 %v626_v9  ;;  %1603 = vmax.xlane.f32.xlu0 %v3923_v44 }
 0x291   :  { %1607 = vmax.xlane.f32.xlu1 %v3926_v11 }
 0x293   :  { %v1515_v14 = vpop.f32.mrf.mxu0  ;;  %v1538_v51 = vpop.f32.mrf.mxu1 }
 0x294   :  { %1573 = vmatpush.xpose.msra.mxu3 %v3885_v49  ;;  %v832_v41 = vpop.f32.mrf.mxu2  ;;  %v1588_v38 = vmul.f32 0.17677669, %v1515_v14  ;;  %v1590_v62 = vmul.f32 0.17677669, %v1538_v51  ;;  %v1029_v55 = vpop.f32.mrf.mxu3 }
 0x296   :  { %v3934_v57 = vadd.f32 %v1588_v38, %v3920_v30  ;;  %v3937_v31 = vadd.f32 %v1590_v62, %v3920_v30 }
 0x298   :  { %1574 = vmatpush.xpose.msra.mxu3 %v3881_v8  ;;  %1605 = vmax.xlane.f32.xlu0 %v3934_v57 }
 0x299   :  { %1609 = vmax.xlane.f32.xlu1 %v3937_v31 }
 0x29c   :  { %1575 = vmatpush.xpose.msra.mxu3 %v3876_v7  ;;  %v835_v54 = vpop.f32.mrf.mxu2  ;;  %v1032_v45 = vpop.f32.mrf.mxu3 }
 0x2a0   :  { %1576 = vmatpush.xpose.msra.mxu3 %v3871_v59 }
 0x2a4   :  { %1577 = vmatpush.xpose.msra.mxu3 %v3866_v42  ;;  %v838_v16 = vpop.f32.mrf.mxu2  ;;  %v1035_v33 = vpop.f32.mrf.mxu3 }
 0x2a8   :  { %1578 = vmatpush.xpose.msra.mxu3 %v3863_v53 }
 0x2ac   :  { %1579 = vmatpush.xpose.msra.mxu3 %v3856_v15  ;;  %v841_v50 = vpop.f32.mrf.mxu2  ;;  %v1038_v60 = vpop.f32.mrf.mxu3 }
 0x2af   :  { %1580 = vmatmul.f32.vlgmr.msra.gmra.mxu3 %v3854_v17 }
 0x2b4   :  { %v844_v2 = vpop.f32.mrf.mxu2  ;;  %v1041_v7 = vpop.f32.mrf.mxu3 }
 0x2b7   :  { %1583 = vmatmul.f32.gmra.mxu3 %v3861_v6 }
 0x2bc   :  { %v847_v29 = vpop.f32.mrf.mxu2  ;;  %v1044_v8 = vpop.f32.mrf.mxu3 }
 0x2c4   :  { %v850_v59 = vpop.f32.mrf.mxu2  ;;  %v1047_v61 = vpop.f32.mrf.mxu3 }
 0x2cc   :  { %v853_v35 = vpop.f32.mrf.mxu2  ;;  %v1050_v42 = vpop.f32.mrf.mxu3 }
 0x2d4   :  { %v856_v18 = vpop.f32.mrf.mxu2  ;;  %v1053_v49 = vpop.f32.mrf.mxu3 }
 0x2dc   :  { %v859_v53 = vpop.f32.mrf.mxu2  ;;  %v1056_v15 = vpop.f32.mrf.mxu3 }
 0x2dd   :  { %2220 = vmatpush.msrb.mxu3 %v859_v53 }
 0x2df   :  { %2221 = vmatpush.msrb.mxu3 %v856_v18 }
 0x2e1   :  { %2222 = vmatpush.msrb.mxu3 %v853_v35 }
 0x2e3   :  { %2223 = vmatpush.msrb.mxu3 %v850_v59 }
 0x2e4   :  { %v1059_v17 = vpop.f32.mrf.mxu3 }
 0x2e5   :  { %2224 = vmatpush.msrb.mxu3 %v847_v29 }
 0x2e7   :  { %2225 = vmatpush.msrb.mxu3 %v844_v2 }
 0x2e9   :  { %2226 = vmatpush.msrb.mxu3 %v841_v50 }
 0x2eb   :  { %2227 = vmatpush.msrb.mxu3 %v838_v16 }
 0x2ec   :  { %v1062_v21 = vpop.f32.mrf.mxu3 }
 0x2ed   :  { %2228 = vmatpush.msrb.mxu3 %v835_v54  ;;  %v1558_v6 = vpop.f32.mrf.mxu2 }
 0x2ee   :  { %v1591_v46 = vmul.f32 0.17677669, %v1558_v6 }
 0x2ef   :  { %2229 = vmatpush.msrb.mxu3 %v832_v41 }
 0x2f0   :  { %v1599_v9 = vadd.f32 %v1591_v46, %v3920_v30 }
 0x2f1   :  { %2230 = vmatpush.msrb.mxu3 %v829_v36 }
 0x2f2   :  { %1611 = vmax.xlane.f32.xlu2 %v1599_v9 }
 0x2f3   :  { %2231 = vmatpush.msrb.mxu3 %v3907_v23 }
 0x2f4   :  { %v1065_v20 = vpop.f32.mrf.mxu3 }
 0x2f5   :  { %2232 = vmatpush.msrb.mxu3 %v3901_v24  ;;  %v1561_v28 = vpop.f32.mrf.mxu2 }
 0x2f6   :  { %v1592_v13 = vmul.f32 0.17677669, %v1561_v28 }
 0x2f7   :  { %2233 = vmatpush.msrb.mxu3 %v3895_v34 }
 0x2f8   :  { %v1600_v40 = vadd.f32 %v1592_v13, %v3920_v30 }
 0x2f9   :  { %2234 = vmatpush.msrb.mxu3 %v3892_v52 }
 0x2fa   :  { %1613 = vmax.xlane.f32.xlu2 %v1600_v40 }
 0x2fb   :  { %2235 = vmatpush.msrb.mxu3 %v3888_v47 }
 0x2fc   :  { %v1068_v3 = vpop.f32.mrf.mxu3 }
 0x303   :  { %v1604_v32 = vpop.xlane.xlu0 %1603 }
 0x304   :  { %v1619_v43 = vsub.f32 %v3923_v44, %v1604_v32  ;;  %v1608_v4 = vpop.xlane.xlu1 %1607 }
 0x305   :  { %v1621_v44 = vsub.f32 %v3926_v11, %v1608_v4 }
 0x306   :  { %v1627_v26 = vmul.f32 1.442695, %v1619_v43 }
 0x307   :  { %v1631_v41 = vmul.f32 1.442695, %v1621_v44 }
 0x308   :  { %2904 = vpow2.f32 %v1627_v26 }
 0x30b   :  { %v1606_v52 = vpop.xlane.xlu0 %1605 }
 0x30c   :  { %v1610_v24 = vpop.xlane.xlu1 %1609  ;;  %v1620_v47 = vsub.f32 %v3934_v57, %v1606_v52 }
 0x30d   :  { %v1622_v23 = vsub.f32 %v3937_v31, %v1610_v24 }
 0x30e   :  { %v2905_v58 = vpop.eup %2904  ;;  %v1629_v36 = vmul.f32 1.442695, %v1620_v47 }
 0x30f   :  { %1643 = vadd.xlane.f32.xlu2 %v2905_v58  ;;  %v1633_v34 = vmul.f32 1.442695, %v1622_v23 }
 0x311   :  { %2906 = vpow2.f32 %v1633_v34 }
 0x312   :  { %2908 = vpow2.f32 %v1629_v36 }
 0x313   :  { %2910 = vpow2.f32 %v1631_v41 }
 0x317   :  { %v3958_v63 = vpop.eup %2906 }
 0x318   :  { %1649 = vadd.xlane.f32.xlu2 %v3958_v63  ;;  %v3970_v62 = vpop.eup %2908 }
 0x319   :  { %v3974_v57 = vpop.eup %2910 }
 0x332   :  { %v1581_v39 = vpop.f32.mrf.mxu3 }
 0x333   :  { %v1593_v48 = vmul.f32 0.17677669, %v1581_v39 }
 0x335   :  { %v3963_v12 = vadd.f32 %v1593_v48, %v3920_v30 }
 0x337   :  { %1615 = vmax.xlane.f32.xlu0 %v3963_v12 }
 0x33a   :  { %v1584_v14 = vpop.f32.mrf.mxu3 }
 0x33b   :  { %v1594_v51 = vmul.f32 0.17677669, %v1584_v14 }
 0x33d   :  { %v3968_v38 = vadd.f32 %v1594_v51, %v3920_v30 }
 0x33f   :  { %1617 = vmax.xlane.f32.xlu1 %v3968_v38  ;;  %1645 = vadd.xlane.f32.xlu0 %v3970_v62 }
 0x347   :  { %1647 = vadd.xlane.f32.xlu1 %v3974_v57 }
 0x365   :  { %v1612_v31 = vpop.xlane.xlu2 %1611 }
 0x366   :  { %v1623_v55 = vsub.f32 %v1599_v9, %v1612_v31 }
 0x368   :  { %v1635_v11 = vmul.f32 1.442695, %v1623_v55 }
 0x36a   :  { %2912 = vpow2.f32 %v1635_v11 }
 0x36d   :  { %v1614_v54 = vpop.xlane.xlu2 %1613 }
 0x36e   :  { %v1624_v45 = vsub.f32 %v1600_v40, %v1614_v54 }
 0x370   :  { %v3977_v16 = vpop.eup %2912  ;;  %v1637_v30 = vmul.f32 1.442695, %v1624_v45 }
 0x371   :  { %1651 = vadd.xlane.f32.xlu0 %v3977_v16 }
 0x372   :  { %2914 = vpow2.f32 %v1637_v30 }
 0x378   :  { %v3980_v33 = vpop.eup %2914 }
 0x379   :  { %1653 = vadd.xlane.f32.xlu1 %v3980_v33 }
 0x382   :  { %v1644_v50 = vpop.xlane.xlu2 %1643 }
 0x383   :  { %2916 = vrcp.f32 %v1644_v50  ;;  %v1670_v8 = vand.u32 2147483648, %v1644_v50  ;;  %v1668_v61 = vand.u32 2147483647, %v1644_v50  ;;  %vm1664_vm2 = vweird.f32 %v1644_v50 }
 0x385   :  { %v1671_v42 = vor.u32 1.1754944e-38, %v1670_v8  ;;  %vm1669_vm4 = vcmp.eq.f32.partialorder %v1668_v61, 8.507059e+37 }
 0x389   :  { %v2917_v60 = vpop.eup %2916 }
 0x38a   :  { %v1660_v2 = vmul.f32 %v2917_v60, %v1644_v50  ;;  %vm1665_vm1 = vweird.f32 %v2917_v60 }
 0x38b   :  { %v1650_v7 = vpop.xlane.xlu2 %1649  ;;  %vm1666_vm3 = vmor %vm1664_vm2, %vm1665_vm1 }
 0x38c   :  { %v1661_v29 = vsub.f32 1.0, %v1660_v2  ;;  %2918 = vrcp.f32 %v1650_v7  ;;  %v1715_v46 = vand.u32 2147483648, %v1650_v7  ;;  %v1713_v9 = vand.u32 2147483647, %v1650_v7 }
 0x38d   :  { %vm1709_vm6 = vweird.f32 %v1650_v7 }
 0x38e   :  { %v1662_v59 = vmul.f32 %v2917_v60, %v1661_v29  ;;  %v1716_v13 = vor.u32 1.1754944e-38, %v1715_v46  ;;  %vm1714_vm8 = vcmp.eq.f32.partialorder %v1713_v9, 8.507059e+37 }
 0x390   :  { %v1663_v35 = vadd.f32 %v2917_v60, %v1662_v59 }
 0x392   :  { %v2919_v18 = vpop.eup %2918  ;;  %v1667_v49 = vsel %vm1666_vm3, %v2917_v60, %v1663_v35 }
 0x393   :  { %v1672_v53 = vsel %vm1669_vm4, %v1671_v42, %v1667_v49  ;;  %v1705_v15 = vmul.f32 %v2919_v18, %v1650_v7  ;;  %vm1710_vm5 = vweird.f32 %v2919_v18 }
 0x394   :  { %v1779_v17 = vmul.f32 %v2905_v58, %v1672_v53  ;;  %vm1711_vm7 = vmor %vm1709_vm6, %vm1710_vm5 }
 0x395   :  { %v1706_v6 = vsub.f32 1.0, %v1705_v15 }
 0x396   :  { %2167 = vmatmul.f32.vlgmr.msra.gmra.mxu0 %v1779_v17  ;;  %2781 = vst [vmem:[#allocation14] sm:$0xff] %v1779_v17 }
 0x397   :  { %v1707_v21 = vmul.f32 %v2919_v18, %v1706_v6 }
 0x399   :  { %v1708_v28 = vadd.f32 %v2919_v18, %v1707_v21 }
 0x39b   :  { %v1712_v20 = vsel %vm1711_vm7, %v2919_v18, %v1708_v28 }
 0x39c   :  { %v1717_v40 = vsel %vm1714_vm8, %v1716_v13, %v1712_v20 }
 0x39d   :  { %v1782_v3 = vmul.f32 %v3958_v63, %v1717_v40 }
 0x39f   :  { %2784 = vst [vmem:[#allocation14 + $0x18] sm:$0xff] %v1782_v3 }
 0x3aa   :  { %v1616_v32 = vpop.xlane.xlu0 %1615 }
 0x3ab   :  { %v1625_v43 = vsub.f32 %v3963_v12, %v1616_v32 }
 0x3ad   :  { %v1639_v4 = vmul.f32 1.442695, %v1625_v43 }
 0x3af   :  { %2920 = vpow2.f32 %v1639_v4 }
 0x3b2   :  { %v1618_v26 = vpop.xlane.xlu1 %1617  ;;  %v1646_v24 = vpop.xlane.xlu0 %1645 }
 0x3b3   :  { %v1626_v23 = vsub.f32 %v3968_v38, %v1618_v26  ;;  %2922 = vrcp.f32 %v1646_v24  ;;  %v1685_v36 = vand.u32 2147483648, %v1646_v24  ;;  %v1683_v44 = vand.u32 2147483647, %v1646_v24 }
 0x3b4   :  { %vm1679_vm10 = vweird.f32 %v1646_v24 }
 0x3b5   :  { %v3986_v58 = vpop.eup %2920  ;;  %v1641_v34 = vmul.f32 1.442695, %v1626_v23  ;;  %v1686_v41 = vor.u32 1.1754944e-38, %v1685_v36  ;;  %vm1684_vm12 = vcmp.eq.f32.partialorder %v1683_v44, 8.507059e+37 }
 0x3b6   :  { %1655 = vadd.xlane.f32.xlu2 %v3986_v58 }
 0x3b7   :  { %2924 = vpow2.f32 %v1641_v34 }
 0x3b9   :  { %v2923_v52 = vpop.eup %2922 }
 0x3ba   :  { %v1675_v47 = vmul.f32 %v2923_v52, %v1646_v24  ;;  %v1648_v63 = vpop.xlane.xlu1 %1647  ;;  %vm1680_vm9 = vweird.f32 %v2923_v52  ;;  %v2140_v24 = vld [vmem:[#allocation3] sm:$0xff] }
 0x3bb   :  { %2926 = vrcp.f32 %v1648_v63  ;;  %vm1681_vm11 = vmor %vm1679_vm10, %vm1680_vm9  ;;  %v1700_v45 = vand.u32 2147483648, %v1648_v63  ;;  %v1698_v50 = vand.u32 2147483647, %v1648_v63  ;;  %vm1694_vm14 = vweird.f32 %v1648_v63 }
 0x3bc   :  { %v1676_v39 = vsub.f32 1.0, %v1675_v47 }
 0x3bd   :  { %v3989_v48 = vpop.eup %2924  ;;  %v1701_v2 = vor.u32 1.1754944e-38, %v1700_v45  ;;  %vm1699_vm1 = vcmp.eq.f32.partialorder %v1698_v50, 8.507059e+37 }
 0x3be   :  { %v1677_v12 = vmul.f32 %v2923_v52, %v1676_v39  ;;  %1657 = vadd.xlane.f32.xlu0 %v3989_v48 }
 0x3c0   :  { %v1678_v14 = vadd.f32 %v2923_v52, %v1677_v12 }
 0x3c1   :  { %v2927_v51 = vpop.eup %2926 }
 0x3c2   :  { %v1690_v38 = vmul.f32 %v2927_v51, %v1648_v63  ;;  %v1682_v31 = vsel %vm1681_vm11, %v2923_v52, %v1678_v14  ;;  %vm1695_vm13 = vweird.f32 %v2927_v51 }
 0x3c3   :  { %v1687_v55 = vsel %vm1684_vm12, %v1686_v41, %v1682_v31  ;;  %vm1696_vm15 = vmor %vm1694_vm14, %vm1695_vm13 }
 0x3c4   :  { %v1691_v11 = vsub.f32 1.0, %v1690_v38  ;;  %v1780_v54 = vmul.f32 %v3970_v62, %v1687_v55 }
 0x3c6   :  { %v1692_v30 = vmul.f32 %v2927_v51, %v1691_v11  ;;  %2170 = vmatmul.f32.gmra.mxu0 %v1780_v54  ;;  %2782 = vst [vmem:[#allocation14 + $0x8] sm:$0xff] %v1780_v54 }
 0x3c8   :  { %v1693_v60 = vadd.f32 %v2927_v51, %v1692_v30 }
 0x3ca   :  { %v1697_v7 = vsel %vm1696_vm15, %v2927_v51, %v1693_v60 }
 0x3cb   :  { %v1702_v29 = vsel %vm1699_vm1, %v1701_v2, %v1697_v7  ;;  %v2141_v2 = vld [vmem:[#allocation3 + $0x8] sm:$0xff] }
 0x3cc   :  { %v1781_v8 = vmul.f32 %v3974_v57, %v1702_v29 }
 0x3ce   :  { %2190 = vmatmul.f32.vlgmr.msra.gmra.mxu1 %v1781_v8  ;;  %2783 = vst [vmem:[#allocation14 + $0x10] sm:$0xff] %v1781_v8 }
 0x3d6   :  { %2193 = vmatmul.f32.gmra.mxu1 %v1782_v3 }
 0x3e4   :  { %v1652_v59 = vpop.xlane.xlu0 %1651 }
 0x3e5   :  { %2928 = vrcp.f32 %v1652_v59  ;;  %v1730_v18 = vand.u32 2147483648, %v1652_v59  ;;  %v1728_v53 = vand.u32 2147483647, %v1652_v59  ;;  %vm1724_vm3 = vweird.f32 %v1652_v59 }
 0x3e7   :  { %v1731_v6 = vor.u32 1.1754944e-38, %v1730_v18  ;;  %vm1729_vm5 = vcmp.eq.f32.partialorder %v1728_v53, 8.507059e+37  ;;  %v2144_v53 = vld [vmem:[#allocation3 + $0x100] sm:$0xff] }
 0x3eb   :  { %v2929_v62 = vpop.eup %2928 }
 0x3ec   :  { %v1720_v61 = vmul.f32 %v2929_v62, %v1652_v59  ;;  %v1654_v35 = vpop.xlane.xlu1 %1653  ;;  %vm1725_vm2 = vweird.f32 %v2929_v62 }
 0x3ed   :  { %2930 = vrcp.f32 %v1654_v35  ;;  %vm1726_vm4 = vmor %vm1724_vm3, %vm1725_vm2  ;;  %v1745_v13 = vand.u32 2147483648, %v1654_v35  ;;  %v1743_v40 = vand.u32 2147483647, %v1654_v35  ;;  %vm1739_vm7 = vweird.f32 %v1654_v35 }
 0x3ee   :  { %v1721_v42 = vsub.f32 1.0, %v1720_v61  ;;  %vm2148_vm3 = vcmp.lt.s32.totalorder %v3910_v37, 32 }
 0x3ef   :  { %v1746_v32 = vor.u32 1.1754944e-38, %v1745_v13  ;;  %vm1744_vm9 = vcmp.eq.f32.partialorder %v1743_v40, 8.507059e+37 }
 0x3f0   :  { %v1722_v49 = vmul.f32 %v2929_v62, %v1721_v42  ;;  %v2143_v42 = vld [vmem:[#allocation3 + $0x88] sm:$0xff] }
 0x3f2   :  { %v1723_v15 = vadd.f32 %v2929_v62, %v1722_v49 }
 0x3f3   :  { %v2931_v17 = vpop.eup %2930 }
 0x3f4   :  { %v1727_v57 = vsel %vm1726_vm4, %v2929_v62, %v1723_v15  ;;  %v1735_v46 = vmul.f32 %v2931_v17, %v1654_v35  ;;  %vm1740_vm6 = vweird.f32 %v2931_v17 }
 0x3f5   :  { %v1732_v21 = vsel %vm1729_vm5, %v1731_v6, %v1727_v57  ;;  %vm1741_vm8 = vmor %vm1739_vm7, %vm1740_vm6  ;;  %v2145_v6 = vld [vmem:[#allocation3 + $0x108] sm:$0xff] }
 0x3f6   :  { %v1736_v9 = vsub.f32 1.0, %v1735_v46  ;;  %v1783_v28 = vmul.f32 %v3977_v16, %v1732_v21 }
 0x3f8   :  { %v1737_v20 = vmul.f32 %v2931_v17, %v1736_v9  ;;  %2213 = vmatmul.f32.vlgmr.msrb.gmra.mxu2 %v1783_v28  ;;  %2785 = vst [vmem:[#allocation14 + $0x20] sm:$0xff] %v1783_v28  ;;  %v3208_v9 = vmov 0.0  }
 0x3f9   :  { %v4009_v28 = vsel %vm2148_vm3, 1.0, %v3208_v9 }
 0x3fa   :  { %v1738_v3 = vadd.f32 %v2931_v17, %v1737_v20 }
 0x3fc   :  { %v1742_v43 = vsel %vm1741_vm8, %v2931_v17, %v1738_v3 }
 0x3fd   :  { %v1747_v4 = vsel %vm1744_vm9, %v1746_v32, %v1742_v43  ;;  %v2146_v43 = vld [vmem:[#allocation3 + $0x180] sm:$0xff] }
 0x3fe   :  { %v1784_v26 = vmul.f32 %v3980_v33, %v1747_v4 }
 0x400   :  { %2216 = vmatmul.f32.gmra.mxu2 %v1784_v26  ;;  %2786 = vst [vmem:[#allocation14 + $0x28] sm:$0xff] %v1784_v26 }
 0x413   :  { %v2168_v23 = vpop.f32.mrf.mxu0 }
 0x414   :  { %v3996_v16 = vadd.f32 %v2168_v23, %v2140_v24 }
 0x416   :  { %2245 = vadd.xlane.f32.xlu1 %v3996_v16 }
 0x429   :  { %v1656_v34 = vpop.xlane.xlu2 %1655 }
 0x42a   :  { %2932 = vrcp.f32 %v1656_v34  ;;  %v1760_v36 = vand.u32 2147483648, %v1656_v34  ;;  %v1758_v44 = vand.u32 2147483647, %v1656_v34  ;;  %vm1754_vm11 = vweird.f32 %v1656_v34 }
 0x42c   :  { %v1761_v51 = vor.u32 1.1754944e-38, %v1760_v36  ;;  %vm1759_vm13 = vcmp.eq.f32.partialorder %v1758_v44, 8.507059e+37 }
 0x430   :  { %v2933_v52 = vpop.eup %2932 }
 0x431   :  { %v1750_v47 = vmul.f32 %v2933_v52, %v1656_v34  ;;  %v1658_v63 = vpop.xlane.xlu0 %1657  ;;  %vm1755_vm10 = vweird.f32 %v2933_v52 }
 0x432   :  { %2934 = vrcp.f32 %v1658_v63  ;;  %vm1756_vm12 = vmor %vm1754_vm11, %vm1755_vm10  ;;  %v1775_v54 = vand.u32 2147483648, %v1658_v63  ;;  %v1773_v30 = vand.u32 2147483647, %v1658_v63  ;;  %vm1769_vm15 = vweird.f32 %v1658_v63 }
 0x433   :  { %v1751_v39 = vsub.f32 1.0, %v1750_v47  ;;  %v2147_v47 = vld [vmem:[#allocation3 + $0x188] sm:$0xff] }
 0x434   :  { %v1776_v60 = vor.u32 1.1754944e-38, %v1775_v54  ;;  %vm1774_vm2 = vcmp.eq.f32.partialorder %v1773_v30, 8.507059e+37  ;;  %v2447_v54 = vld [vmem:[#allocation8 + $0x60] sm:$0xff]  ;;  %v2445_v30 = vld [vmem:[#allocation8 + $0x50] sm:$0xff] }
 0x435   :  { %v1752_v12 = vmul.f32 %v2933_v52, %v1751_v39 }
 0x437   :  { %v1753_v33 = vadd.f32 %v2933_v52, %v1752_v12 }
 0x438   :  { %v2935_v14 = vpop.eup %2934 }
 0x439   :  { %v1757_v41 = vsel %vm1756_vm12, %v2933_v52, %v1753_v33  ;;  %v1765_v38 = vmul.f32 %v2935_v14, %v1658_v63  ;;  %vm1770_vm14 = vweird.f32 %v2935_v14 }
 0x43a   :  { %v1762_v31 = vsel %vm1759_vm13, %v1761_v51, %v1757_v41  ;;  %vm1771_vm1 = vmor %vm1769_vm15, %vm1770_vm14 }
 0x43b   :  { %v1766_v55 = vsub.f32 1.0, %v1765_v38  ;;  %v1785_v11 = vmul.f32 %v3986_v58, %v1762_v31  ;;  %v2142_v58 = vld [vmem:[#allocation3 + $0x80] sm:$0xff]  ;;  %v2450_v31 = vld [vmem:[#allocation8 + $0x78] sm:$0xff] }
 0x43c   :  { %2455 = vmatpush.msrb.mxu0 %v2450_v31 }
 0x43d   :  { %v1767_v45 = vmul.f32 %v2935_v14, %v1766_v55  ;;  %2236 = vmatmul.f32.vlgmr.msrb.gmra.mxu3 %v1785_v11  ;;  %2787 = vst [vmem:[#allocation14 + $0x30] sm:$0xff] %v1785_v11  ;;  %v2449_v55 = vld [vmem:[#allocation8 + $0x70] sm:$0xff]  ;;  %v2448_v11 = vld [vmem:[#allocation8 + $0x68] sm:$0xff] }
 0x43e   :  { %2456 = vmatpush.msrb.mxu0 %v2449_v55 }
 0x43f   :  { %v1768_v50 = vadd.f32 %v2935_v14, %v1767_v45  ;;  %v2446_v45 = vld [vmem:[#allocation8 + $0x58] sm:$0xff] }
 0x440   :  { %2457 = vmatpush.msrb.mxu0 %v2448_v11 }
 0x441   :  { %v1772_v7 = vsel %vm1771_vm1, %v2935_v14, %v1768_v50  ;;  %v2444_v50 = vld [vmem:[#allocation8 + $0x48] sm:$0xff] }
 0x442   :  { %v1777_v29 = vsel %vm1774_vm2, %v1776_v60, %v1772_v7  ;;  %2458 = vmatpush.msrb.mxu0 %v2447_v54  ;;  %v1787_v60 = vmul.f32 %v3482_v5, %v3482_v5  ;;  %v1790_v5 = vmul.f32 %v3665_v56, %v3665_v56  ;;  %v2436_v56 = vld [vmem:[#allocation8 + $0x8] sm:$0xff] }
 0x443   :  { %v2171_v8 = vpop.f32.mrf.mxu0  ;;  %v1786_v59 = vmul.f32 %v3989_v48, %v1777_v29  ;;  %v2443_v29 = vld [vmem:[#allocation8 + $0x40] sm:$0xff] }
 0x444   :  { %v2172_v62 = vadd.f32 %v2171_v8, %v2141_v2  ;;  %2459 = vmatpush.msrb.mxu0 %v2446_v45 }
 0x445   :  { %2239 = vmatmul.f32.gmra.mxu3 %v1786_v59  ;;  %2788 = vst [vmem:[#allocation14 + $0x38] sm:$0xff] %v1786_v59  ;;  %v2442_v59 = vld [vmem:[#allocation8 + $0x38] sm:$0xff] }
 0x446   :  { %2247 = vadd.xlane.f32.xlu2 %v2172_v62  ;;  %2460 = vmatpush.msrb.mxu0 %v2445_v30 }
 0x448   :  { %2461 = vmatpush.msrb.mxu0 %v2444_v50 }
 0x44a   :  { %2462 = vmatpush.msrb.mxu0 %v2443_v29  ;;  %v4057_v29 = vld [vmem:[%s4457_s2] ss:$0 sm:$0xff] }
 0x44b   :  { %v2191_v61 = vpop.f32.mrf.mxu1 }
 0x44c   :  { %v2192_v35 = vadd.f32 %v2191_v61, %v2142_v58  ;;  %2463 = vmatpush.msrb.mxu0 %v2442_v59  ;;  %v2441_v61 = vld [vmem:[#allocation8 + $0x30] sm:$0xff] }
 0x44e   :  { %2249 = vadd.xlane.f32.xlu0 %v2192_v35  ;;  %2464 = vmatpush.msrb.mxu0 %v2441_v61 }
 0x453   :  { %v2194_v18 = vpop.f32.mrf.mxu1 }
 0x454   :  { %v2195_v49 = vadd.f32 %v2194_v18, %v2143_v42  ;;  %v2440_v42 = vld [vmem:[#allocation8 + $0x28] sm:$0xff] }
 0x455   :  { %2465 = vmatpush.msrb.mxu0 %v2440_v42 }
 0x456   :  { %2251 = vadd.xlane.f32.xlu1 %v2195_v49 }
 0x47b   :  { %v2214_v15 = vpop.f32.mrf.mxu2 }
 0x47c   :  { %v4001_v17 = vadd.f32 %v2214_v15, %v2144_v53  ;;  %v2439_v53 = vld [vmem:[#allocation8 + $0x20] sm:$0xff] }
 0x47d   :  { %2466 = vmatpush.msrb.mxu0 %v2439_v53  ;;  %v1788_v53 = vmul.f32 %v3492_v10, %v3492_v10 }
 0x47e   :  { %2253 = vadd.xlane.f32.xlu2 %v4001_v17 }
 0x483   :  { %v2217_v48 = vpop.f32.mrf.mxu2 }
 0x484   :  { %v4004_v57 = vadd.f32 %v2217_v48, %v2145_v6  ;;  %v2438_v6 = vld [vmem:[#allocation8 + $0x18] sm:$0xff]  ;;  %v1798_v48 = vadd.f32 1e-12, %v1790_v5 }
 0x485   :  { %2467 = vmatpush.msrb.mxu0 %v2438_v6  ;;  %v1789_v6 = vmul.f32 %v3655_v0, %v3655_v0 }
 0x486   :  { %2255 = vadd.xlane.f32.xlu0 %v4004_v57  ;;  %vm1853_vm8 = vweird.f32 %v1798_v48  ;;  %v1859_v45 = vand.u32 2147483648, %v1798_v48 }
 0x489   :  { %v2246_v46 = vpop.xlane.xlu1 %2245 }
 0x48a   :  { %v2261_v21 = vmul.f32 0.03125, %v2246_v46  ;;  %v2437_v46 = vld [vmem:[#allocation8 + $0x10] sm:$0xff] }
 0x48b   :  { %2468 = vmatpush.msrb.mxu0 %v2437_v46 }
 0x48c   :  { %v2269_v13 = vsub.f32 %v3996_v16, %v2261_v21 }
 0x48d   :  { %2469 = vmatpush.msrb.mxu0 %v2436_v56 }
 0x48e   :  { %v4013_v20 = vmul.f32 %v4009_v28, %v2269_v13 }
 0x490   :  { %v2285_v40 = vmul.f32 %v4013_v20, %v4013_v20 }
 0x492   :  { %2293 = vadd.xlane.f32.xlu2 %v2285_v40 }
 0x4b9   :  { %v2248_v3 = vpop.xlane.xlu2 %2247 }
 0x4ba   :  { %v2262_v32 = vmul.f32 0.03125, %v2248_v3  ;;  %v2435_v3 = vld [vmem:[#allocation8] sm:$0xff] }
 0x4bb   :  { %2470 = vmatpush.msrb.mxu0 %v2435_v3  ;;  %v4079_v3 = vadd.f32 1e-12, %v1789_v6 }
 0x4bc   :  { %v2270_v26 = vsub.f32 %v2172_v62, %v2262_v32  ;;  %v1795_v62 = vadd.f32 1e-12, %v1787_v60  ;;  %v1857_v60 = vand.u32 2147483647, %v1798_v48 }
 0x4be   :  { %v4021_v16 = vmul.f32 %v4009_v28, %v2270_v26  ;;  %2936 = vrcp.f32 %v1795_v62  ;;  %vm1808_vm4 = vweird.f32 %v1795_v62  ;;  %vm1858_vm14 = vcmp.eq.f32.partialorder %v1857_v60, 8.507059e+37 }
 0x4bf   :  { %2938 = vrcp.f32 %v1798_v48 }
 0x4c0   :  { %v2237_v4 = vpop.f32.mrf.mxu3  ;;  %v2286_v33 = vmul.f32 %v4021_v16, %v4021_v16 }
 0x4c1   :  { %v4017_v24 = vadd.f32 %v2237_v4, %v2146_v43  ;;  %v2250_v23 = vpop.xlane.xlu0 %2249 }
 0x4c2   :  { %v2263_v34 = vmul.f32 0.03125, %v2250_v23 }
 0x4c3   :  { %2257 = vadd.xlane.f32.xlu1 %v4017_v24 }
 0x4c4   :  { %v2271_v52 = vsub.f32 %v2192_v35, %v2263_v34  ;;  %v2937_v13 = vpop.eup %2936 }
 0x4c5   :  { %v2939_v26 = vpop.eup %2938  ;;  %vm1809_vm5 = vweird.f32 %v2937_v13 }
 0x4c6   :  { %v4024_v63 = vmul.f32 %v4009_v28, %v2271_v52  ;;  %v1849_v34 = vmul.f32 %v2939_v26, %v1798_v48  ;;  %vm1810_vm6 = vmor %vm1808_vm4, %vm1809_vm5  ;;  %vm1854_vm9 = vweird.f32 %v2939_v26 }
 0x4c7   :  { %vm1855_vm11 = vmor %vm1853_vm8, %vm1854_vm9  ;;  %vm1838_vm9 = vweird.f32 %v4079_v3 }
 0x4c8   :  { %v2240_v39 = vpop.f32.mrf.mxu3  ;;  %v2287_v36 = vmul.f32 %v4024_v63, %v4024_v63 }
 0x4c9   :  { %v4028_v12 = vadd.f32 %v2240_v39, %v2147_v47  ;;  %v2252_v44 = vpop.xlane.xlu1 %2251  ;;  %v1814_v47 = vand.u32 2147483648, %v1795_v62 }
 0x4ca   :  { %v2264_v14 = vmul.f32 0.03125, %v2252_v44  ;;  %2297 = vadd.xlane.f32.xlu2 %v2287_v36  ;;  %v1812_v36 = vand.u32 2147483647, %v1795_v62  ;;  %v1850_v44 = vsub.f32 1.0, %v1849_v34 }
 0x4cb   :  { %2295 = vadd.xlane.f32.xlu1 %v2286_v33  ;;  %2259 = vadd.xlane.f32.xlu0 %v4028_v12 }
 0x4cc   :  { %v2272_v51 = vsub.f32 %v2195_v49, %v2264_v14  ;;  %vm1813_vm7 = vcmp.eq.f32.partialorder %v1812_v36, 8.507059e+37  ;;  %v1851_v55 = vmul.f32 %v2939_v26, %v1850_v44 }
 0x4ce   :  { %v4034_v41 = vmul.f32 %v4009_v28, %v2272_v51  ;;  %v1815_v51 = vor.u32 1.1754944e-38, %v1814_v47  ;;  %v1852_v50 = vadd.f32 %v2939_v26, %v1851_v55 }
 0x4d0   :  { %v2288_v38 = vmul.f32 %v4034_v41, %v4034_v41 }
 0x4d3   :  { %2299 = vadd.xlane.f32.xlu0 %v2288_v38 }
 0x4f1   :  { %v2254_v2 = vpop.xlane.xlu2 %2253 }
 0x4f2   :  { %v2265_v7 = vmul.f32 0.03125, %v2254_v2 }
 0x4f4   :  { %v2273_v8 = vsub.f32 %v4001_v17, %v2265_v7  ;;  %v3209_v17 = vmov 0  }
 0x4f5   :  { %2895 = vset.pattern.permute.xlu2 %v3209_v17  ;;  %2896 = vset.pattern.permute.xlu0 %v3209_v17 }
 0x4f6   :  { %v4042_v58 = vmul.f32 %v4009_v28, %v2273_v8  ;;  %2897 = vset.pattern.permute.xlu1 %v3209_v17  ;;  %v1860_v8 = vor.u32 1.1754944e-38, %v1859_v45 }
 0x4f8   :  { %v2289_v35 = vmul.f32 %v4042_v58, %v4042_v58 }
 0x4f9   :  { %v2256_v18 = vpop.xlane.xlu0 %2255 }
 0x4fa   :  { %v2266_v49 = vmul.f32 0.03125, %v2256_v18  ;;  %2301 = vadd.xlane.f32.xlu1 %v2289_v35  ;;  %v4063_v35 = vld [vmem:[%s4458_s3] ss:$0 sm:$0xff] }
 0x4fc   :  { %v2274_v15 = vsub.f32 %v4004_v57, %v2266_v49  ;;  %v1804_v57 = vmul.f32 %v2937_v13, %v1795_v62  ;;  %v1856_v62 = vsel %vm1855_vm11, %v2939_v26, %v1852_v50 }
 0x4fd   :  { %v1861_v5 = vsel %vm1858_vm14, %v1860_v8, %v1856_v62 }
 0x4fe   :  { %v4050_v21 = vmul.f32 %v4009_v28, %v2274_v15  ;;  %v1805_v4 = vsub.f32 1.0, %v1804_v57  ;;  %v1862_v49 = vmul.f32 -0.5, %v1861_v5  ;;  %v1796_v15 = vadd.f32 1e-12, %v1788_v53 }
 0x500   :  { %v2290_v40 = vmul.f32 %v4050_v21, %v4050_v21  ;;  %v1806_v52 = vmul.f32 %v2937_v13, %v1805_v4  ;;  %vm1823_vm15 = vweird.f32 %v1796_v15 }
 0x502   :  { %2303 = vadd.xlane.f32.xlu2 %v2290_v40  ;;  %v1807_v39 = vadd.f32 %v2937_v13, %v1806_v52 }
 0x504   :  { %v1811_v31 = vsel %vm1810_vm6, %v2937_v13, %v1807_v39 }
 0x505   :  { %v2294_v32 = vpop.xlane.xlu2 %2293  ;;  %v1816_v54 = vsel %vm1813_vm7, %v1815_v51, %v1811_v31 }
 0x506   :  { %v2309_v43 = vmul.f32 0.03125, %v2294_v32  ;;  %v1817_v7 = vmul.f32 -0.5, %v1816_v54 }
 0x508   :  { %v2317_v23 = vadd.f32 1e-05, %v2309_v43 }
 0x50a   :  { %2940 = vrsqrt.f32 %v2317_v23  ;;  %vm2331_vm12 = vweird.f32 %v2317_v23 }
 0x50b   :  { %2942 = vrcp.f32 %v1796_v15 }
 0x510   :  { %v2941_v33 = vpop.eup %2940 }
 0x511   :  { %v2326_v14 = vmul.f32 %v2941_v33, %v2317_v23  ;;  %vm2332_vm10 = vweird.f32 %v2941_v33  ;;  %v2943_v17 = vpop.eup %2942 }
 0x512   :  { %vm2333_vm13 = vmor %vm2331_vm12, %vm2332_vm10  ;;  %v1819_v13 = vmul.f32 %v2943_v17, %v1796_v15  ;;  %vm1824_vm1 = vweird.f32 %v2943_v17 }
 0x513   :  { %v2327_v38 = vmul.f32 %v2941_v33, %v2326_v14  ;;  %v1829_v14 = vand.u32 2147483648, %v1796_v15  ;;  %vm4103_vm2 = vmor %vm1823_vm15, %vm1824_vm1 }
 0x514   :  { %v1820_v32 = vsub.f32 1.0, %v1819_v13 }
 0x515   :  { %v2328_v11 = vmul.f32 0.5, %v2327_v38  ;;  %v1830_v50 = vor.u32 1.1754944e-38, %v1829_v14 }
 0x516   :  { %v1821_v39 = vmul.f32 %v2943_v17, %v1820_v32 }
 0x517   :  { %v2329_v30 = vsub.f32 1.5, %v2328_v11 }
 0x518   :  { %v1822_v38 = vadd.f32 %v2943_v17, %v1821_v39  ;;  %v2505_v39 = vld [vmem:[#allocation9 + $0x8] sm:$0xff] }
 0x519   :  { %v2330_v2 = vmul.f32 %v2941_v33, %v2329_v30 }
 0x51a   :  { %1925 = vperm.xlu2 %2895, %v1817_v7   ;;  %v1826_v8 = vsel %vm4103_vm2, %v2943_v17, %v1822_v38 }
 0x51b   :  { %v2334_v59 = vsel %vm2333_vm13, %v2941_v33, %v2330_v2 }
 0x51c   :  { %v2405_v61 = vmul.f32 %v2334_v59, %v4013_v20  ;;  %v1791_v20 = vmul.f32 %v3826_v27, %v3826_v27 }
 0x51e   :  { %v2416_v42 = vmul.f32 %v4057_v29, %v2405_v61  ;;  %v4076_v48 = vadd.f32 1e-12, %v1791_v20 }
 0x520   :  { %v4067_v18 = vadd.f32 %v4063_v35, %v2416_v42  ;;  %2944 = vrcp.f32 %v4076_v48  ;;  %vm1868_vm4 = vweird.f32 %v4076_v48 }
 0x521   :  { %2946 = vrcp.f32 %v4079_v3 }
 0x522   :  { %2471 = vmatmul.f32.vlgmr.msrb.gmra.mxu0 %v4067_v18  ;;  %1940 = vperm.xlu2 %2895, %v1862_v49  }
 0x536   :  { %v2258_v46 = vpop.xlane.xlu1 %2257 }
 0x537   :  { %v2267_v56 = vmul.f32 0.03125, %v2258_v46  ;;  %v1872_v46 = vand.u32 2147483647, %v4076_v48 }
 0x539   :  { %v2275_v40 = vsub.f32 %v4017_v24, %v2267_v56  ;;  %v4088_v24 = vpop.eup %2944  ;;  %vm1873_vm13 = vcmp.eq.f32.partialorder %v1872_v46, 8.507059e+37 }
 0x53a   :  { %v1864_v36 = vmul.f32 %v4088_v24, %v4076_v48  ;;  %v4099_v33 = vpop.eup %2946  ;;  %vm1869_vm5 = vweird.f32 %v4088_v24 }
 0x53b   :  { %v4083_v10 = vmul.f32 %v4009_v28, %v2275_v40  ;;  %v1834_v11 = vmul.f32 %v4099_v33, %v4079_v3  ;;  %vm4119_vm7 = vmor %vm1868_vm4, %vm1869_vm5  ;;  %vm1839_vm10 = vweird.f32 %v4099_v33 }
 0x53c   :  { %v1865_v45 = vsub.f32 1.0, %v1864_v36  ;;  %vm4133_vm15 = vmor %vm1838_vm9, %vm1839_vm10  ;;  %v1842_v36 = vand.u32 2147483647, %v4079_v3 }
 0x53d   :  { %v2298_v57 = vpop.xlane.xlu2 %2297  ;;  %v2291_v27 = vmul.f32 %v4083_v10, %v4083_v10  ;;  %v1835_v42 = vsub.f32 1.0, %v1834_v11 }
 0x53e   :  { %v2311_v0 = vmul.f32 0.03125, %v2298_v57  ;;  %v2296_v43 = vpop.xlane.xlu1 %2295  ;;  %v2260_v4 = vpop.xlane.xlu0 %2259  ;;  %v1866_v61 = vmul.f32 %v4088_v24, %v1865_v45  ;;  %vm1843_vm2 = vcmp.eq.f32.partialorder %v1842_v36, 8.507059e+37  ;;  %v2509_v57 = vld [vmem:[#allocation9 + $0x28] sm:$0xff]  ;;  %v2504_v36 = vld [vmem:[#allocation9] sm:$0xff] }
 0x53f   :  { %v2310_v26 = vmul.f32 0.03125, %v2296_v43  ;;  %v2268_v23 = vmul.f32 0.03125, %v2260_v4  ;;  %2305 = vadd.xlane.f32.xlu0 %v2291_v27  ;;  %v1836_v56 = vmul.f32 %v4099_v33, %v1835_v42  ;;  %v2515_v42 = vld [vmem:[#allocation9 + $0x58] sm:$0xff] }
 0x540   :  { %v4090_v34 = vadd.f32 1e-05, %v2311_v0  ;;  %v1867_v17 = vadd.f32 %v4088_v24, %v1866_v61  ;;  %v2516_v61 = vld [vmem:[#allocation9 + $0x60] sm:$0xff] }
 0x541   :  { %v2318_v52 = vadd.f32 1e-05, %v2310_v26  ;;  %v2276_v47 = vsub.f32 %v4028_v12, %v2268_v23  ;;  %v1827_v12 = vand.u32 2147483647, %v1796_v15  ;;  %v1874_v15 = vand.u32 2147483648, %v4076_v48 }
 0x542   :  { %2948 = vrsqrt.f32 %v4090_v34  ;;  %v1871_v4 = vsel %vm4119_vm7, %v4088_v24, %v1867_v17  ;;  %v1837_v26 = vadd.f32 %v4099_v33, %v1836_v56  ;;  %v1844_v23 = vand.u32 2147483648, %v4079_v3  ;;  %v2510_v56 = vld [vmem:[#allocation9 + $0x30] sm:$0xff] }
 0x543   :  { %2950 = vrsqrt.f32 %v2318_v52  ;;  %v4097_v44 = vmul.f32 %v4009_v28, %v2276_v47  ;;  %vm1828_vm3 = vcmp.eq.f32.partialorder %v1827_v12, 8.507059e+37  ;;  %vm2341_vm8 = vweird.f32 %v2318_v52 }
 0x544   :  { %v1831_v49 = vsel %vm1828_vm3, %v1830_v50, %v1826_v8  ;;  %v1875_v32 = vor.u32 1.1754944e-38, %v1874_v15  ;;  %vm2351_vm14 = vweird.f32 %v4090_v34  ;;  %v1841_v55 = vsel %vm4133_vm15, %v4099_v33, %v1837_v26  ;;  %v2519_v8 = vld [vmem:[#allocation9 + $0x78] sm:$0xff]  ;;  %v2513_v15 = vld [vmem:[#allocation9 + $0x48] sm:$0xff] }
 0x545   :  { %v2292_v51 = vmul.f32 %v4097_v44, %v4097_v44  ;;  %v1832_v40 = vmul.f32 -0.5, %v1831_v49  ;;  %2524 = vmatpush.msrb.mxu1 %v2519_v8  ;;  %v2514_v49 = vld [vmem:[#allocation9 + $0x50] sm:$0xff] }
 0x546   :  { %v2300_v31 = vpop.xlane.xlu0 %2299  ;;  %v1876_v38 = vsel %vm1873_vm13, %v1875_v32, %v1871_v4  ;;  %v2508_v32 = vld [vmem:[#allocation9 + $0x20] sm:$0xff] }
 0x547   :  { %v2312_v54 = vmul.f32 0.03125, %v2300_v31  ;;  %2307 = vadd.xlane.f32.xlu1 %v2292_v51  ;;  %v1845_v31 = vor.u32 1.1754944e-38, %v1844_v23  ;;  %v2506_v23 = vld [vmem:[#allocation9 + $0x10] sm:$0xff] }
 0x548   :  { %v2949_v30 = vpop.eup %2948 }
 0x549   :  { %v2951_v60 = vpop.eup %2950  ;;  %v2346_v2 = vmul.f32 %v2949_v30, %v4090_v34  ;;  %v2320_v7 = vadd.f32 1e-05, %v2312_v54  ;;  %vm2352_vm11 = vweird.f32 %v2949_v30  ;;  %v1877_v54 = vmul.f32 -0.5, %v1876_v38 }
 0x54a   :  { %v2336_v59 = vmul.f32 %v2951_v60, %v2318_v52  ;;  %vm2342_vm6 = vweird.f32 %v2951_v60  ;;  %vm2353_vm1 = vmor %vm2351_vm14, %vm2352_vm11 }
 0x54b   :  { %v2347_v62 = vmul.f32 %v2949_v30, %v2346_v2  ;;  %2952 = vrsqrt.f32 %v2320_v7  ;;  %vm2343_vm12 = vmor %vm2341_vm8, %vm2342_vm6  ;;  %vm2361_vm4 = vweird.f32 %v2320_v7 }
 0x54c   :  { %v2337_v5 = vmul.f32 %v2951_v60, %v2336_v59 }
 0x54d   :  { %v2348_v53 = vmul.f32 0.5, %v2347_v62  ;;  %v2517_v62 = vld [vmem:[#allocation9 + $0x68] sm:$0xff] }
 0x54e   :  { %v2338_v20 = vmul.f32 0.5, %v2337_v5 }
 0x54f   :  { %v2349_v6 = vsub.f32 1.5, %v2348_v53 }
 0x550   :  { %v2339_v13 = vsub.f32 1.5, %v2338_v20  ;;  %v2512_v20 = vld [vmem:[#allocation9 + $0x40] sm:$0xff] }
 0x551   :  { %v2953_v27 = vpop.eup %2952  ;;  %v2350_v0 = vmul.f32 %v2949_v30, %v2349_v6  ;;  %v2511_v6 = vld [vmem:[#allocation9 + $0x38] sm:$0xff] }
 0x552   :  { %v2340_v43 = vmul.f32 %v2951_v60, %v2339_v13  ;;  %v2356_v48 = vmul.f32 %v2953_v27, %v2320_v7  ;;  %vm2362_vm3 = vweird.f32 %v2953_v27  ;;  %v2518_v7 = vld [vmem:[#allocation9 + $0x70] sm:$0xff] }
 0x553   :  { %1930 = vperm.xlu0 %2896, %v1832_v40   ;;  %v2354_v14 = vsel %vm2353_vm1, %v2949_v30, %v2350_v0  ;;  %vm2363_vm5 = vmor %vm2361_vm4, %vm2362_vm3  ;;  %2525 = vmatpush.msrb.mxu1 %v2518_v7 }
 0x554   :  { %v2344_v52 = vsel %vm2343_vm12, %v2951_v60, %v2340_v43  ;;  %v2357_v47 = vmul.f32 %v2953_v27, %v2356_v48  ;;  %v2407_v3 = vmul.f32 %v2354_v14, %v4024_v63  ;;  %v2507_v43 = vld [vmem:[#allocation9 + $0x18] sm:$0xff] }
 0x555   :  { %v2406_v24 = vmul.f32 %v2344_v52, %v4021_v16  ;;  %v1846_v16 = vsel %vm1843_vm2, %v1845_v31, %v1841_v55  ;;  %2526 = vmatpush.msrb.mxu1 %v2517_v62 }
 0x556   :  { %v2358_v51 = vmul.f32 0.5, %v2357_v47  ;;  %v2418_v30 = vmul.f32 %v4057_v29, %v2407_v3  ;;  %v1847_v60 = vmul.f32 -0.5, %v1846_v16  ;;  %v4174_v16 = vld [vmem:[%s4460_s5] ss:$0 sm:$0xff] }
 0x557   :  { %v2417_v12 = vmul.f32 %v4057_v29, %v2406_v24  ;;  %2527 = vmatpush.msrb.mxu1 %v2516_v61 }
 0x558   :  { %v2359_v34 = vsub.f32 1.5, %v2358_v51  ;;  %v4150_v33 = vadd.f32 %v4063_v35, %v2418_v30 }
 0x559   :  { %v4144_v11 = vadd.f32 %v4063_v35, %v2417_v12  ;;  %2528 = vmatpush.msrb.mxu1 %v2515_v42 }
 0x55a   :  { %v2360_v45 = vmul.f32 %v2953_v27, %v2359_v34 }
 0x55b   :  { %2474 = vmatmul.f32.gmra.mxu0 %v4144_v11  ;;  %1945 = vperm.xlu0 %2896, %v1877_v54  }
 0x55c   :  { %v2364_v50 = vsel %vm2363_vm5, %v2953_v27, %v2360_v45  ;;  %2529 = vmatpush.msrb.mxu1 %v2514_v49 }
 0x55d   :  { %v2408_v2 = vmul.f32 %v2364_v50, %v4034_v41 }
 0x55e   :  { %2530 = vmatpush.msrb.mxu1 %v2513_v15 }
 0x55f   :  { %v2419_v63 = vmul.f32 %v4057_v29, %v2408_v2 }
 0x560   :  { %1935 = vperm.xlu1 %2897, %v1847_v60   ;;  %2531 = vmatpush.msrb.mxu1 %v2512_v20 }
 0x561   :  { %v4156_v59 = vadd.f32 %v4063_v35, %v2419_v63 }
 0x562   :  { %2532 = vmatpush.msrb.mxu1 %v2511_v6 }
 0x563   :  { %2477 = vmatmul.f32.gmra.mxu0 %v4150_v33 }
 0x564   :  { %2533 = vmatpush.msrb.mxu1 %v2510_v56 }
 0x566   :  { %2534 = vmatpush.msrb.mxu1 %v2509_v57 }
 0x568   :  { %2535 = vmatpush.msrb.mxu1 %v2508_v32 }
 0x56a   :  { %2536 = vmatpush.msrb.mxu1 %v2507_v43 }
 0x56b   :  { %2480 = vmatmul.f32.gmra.mxu0 %v4156_v59 }
 0x56c   :  { %2537 = vmatpush.msrb.mxu1 %v2506_v23 }
 0x56d   :  { %v2302_v5 = vpop.xlane.xlu1 %2301 }
 0x56e   :  { %v2313_v41 = vmul.f32 0.03125, %v2302_v5  ;;  %2538 = vmatpush.msrb.mxu1 %v2505_v39 }
 0x570   :  { %v2321_v53 = vadd.f32 1e-05, %v2313_v41  ;;  %2539 = vmatpush.msrb.mxu1 %v2504_v36 }
 0x572   :  { %2954 = vrsqrt.f32 %v2321_v53  ;;  %vm2371_vm7 = vweird.f32 %v2321_v53 }
 0x575   :  { %v2304_v17 = vpop.xlane.xlu2 %2303 }
 0x576   :  { %v2314_v46 = vmul.f32 0.03125, %v2304_v17 }
 0x578   :  { %v2955_v13 = vpop.eup %2954  ;;  %v2322_v40 = vadd.f32 1e-05, %v2314_v46 }
 0x579   :  { %v2366_v27 = vmul.f32 %v2955_v13, %v2321_v53  ;;  %vm2372_vm6 = vweird.f32 %v2955_v13 }
 0x57a   :  { %2956 = vrsqrt.f32 %v2322_v40  ;;  %vm2373_vm8 = vmor %vm2371_vm7, %vm2372_vm6  ;;  %vm2381_vm10 = vweird.f32 %v2322_v40 }
 0x57b   :  { %v2367_v0 = vmul.f32 %v2955_v13, %v2366_v27 }
 0x57d   :  { %v2368_v48 = vmul.f32 0.5, %v2367_v0 }
 0x57f   :  { %v2369_v4 = vsub.f32 1.5, %v2368_v48 }
 0x580   :  { %v2957_v26 = vpop.eup %2956 }
 0x581   :  { %v2370_v52 = vmul.f32 %v2955_v13, %v2369_v4  ;;  %v2376_v47 = vmul.f32 %v2957_v26, %v2322_v40  ;;  %vm2382_vm9 = vweird.f32 %v2957_v26 }
 0x582   :  { %vm2383_vm11 = vmor %vm2381_vm10, %vm2382_vm9 }
 0x583   :  { %v2374_v24 = vsel %vm2373_vm8, %v2955_v13, %v2370_v52  ;;  %v2377_v14 = vmul.f32 %v2957_v26, %v2376_v47 }
 0x584   :  { %v2409_v51 = vmul.f32 %v2374_v24, %v4042_v58 }
 0x585   :  { %v2378_v38 = vmul.f32 0.5, %v2377_v14 }
 0x586   :  { %v2420_v12 = vmul.f32 %v4057_v29, %v2409_v51 }
 0x587   :  { %v2379_v31 = vsub.f32 1.5, %v2378_v38 }
 0x588   :  { %v4162_v34 = vadd.f32 %v4063_v35, %v2420_v12  ;;  %v4197_v12 = vld [vmem:[%s4462_s7] ss:$0 sm:$0xff] }
 0x589   :  { %v2380_v55 = vmul.f32 %v2957_v26, %v2379_v31 }
 0x58a   :  { %2483 = vmatmul.f32.gmra.mxu0 %v4162_v34 }
 0x58b   :  { %v2384_v54 = vsel %vm2383_vm11, %v2957_v26, %v2380_v55 }
 0x58c   :  { %v2410_v3 = vmul.f32 %v2384_v54, %v4050_v21 }
 0x58e   :  { %v2421_v45 = vmul.f32 %v4057_v29, %v2410_v3 }
 0x590   :  { %v4168_v58 = vadd.f32 %v4063_v35, %v2421_v45 }
 0x592   :  { %2486 = vmatmul.f32.gmra.mxu0 %v4168_v58 }
 0x59f   :  { %v2472_v30 = vpop.f32.mrf.mxu0 }
 0x5a0   :  { %v2473_v50 = vadd.f32 %v4174_v16, %v2472_v30 }
 0x5a2   :  { %v2496_v60 = vmax.f32 %v2473_v50, 0.0  ;;  %v1793_v50 = vmul.f32 %v3915_v19, %v3915_v19 }
 0x5a4   :  { %2540 = vmatmul.f32.vlgmr.msrb.gmra.mxu1 %v2496_v60 }
 0x5b2   :  { %v2306_v2 = vpop.xlane.xlu0 %2305 }
 0x5b3   :  { %v2315_v63 = vmul.f32 0.03125, %v2306_v2 }
 0x5b5   :  { %v2323_v21 = vadd.f32 1e-05, %v2315_v63  ;;  %v1801_v63 = vadd.f32 1e-12, %v1793_v50 }
 0x5b7   :  { %2958 = vrsqrt.f32 %v2323_v21  ;;  %vm2391_vm13 = vweird.f32 %v2323_v21  ;;  %vm1898_vm3 = vweird.f32 %v1801_v63 }
 0x5ba   :  { %v2308_v8 = vpop.xlane.xlu1 %2307 }
 0x5bb   :  { %v2316_v7 = vmul.f32 0.03125, %v2308_v8 }
 0x5bd   :  { %v2959_v62 = vpop.eup %2958  ;;  %v2324_v61 = vadd.f32 1e-05, %v2316_v7 }
 0x5be   :  { %v2386_v42 = vmul.f32 %v2959_v62, %v2323_v21  ;;  %vm2392_vm12 = vweird.f32 %v2959_v62 }
 0x5bf   :  { %2960 = vrsqrt.f32 %v2324_v61  ;;  %vm2393_vm14 = vmor %vm2391_vm13, %vm2392_vm12  ;;  %vm2401_vm1 = vweird.f32 %v2324_v61 }
 0x5c0   :  { %v2387_v5 = vmul.f32 %v2959_v62, %v2386_v42  ;;  %2962 = vrcp.f32 %v1801_v63 }
 0x5c2   :  { %v2388_v41 = vmul.f32 0.5, %v2387_v5 }
 0x5c4   :  { %v2389_v49 = vsub.f32 1.5, %v2388_v41 }
 0x5c5   :  { %v2961_v53 = vpop.eup %2960 }
 0x5c6   :  { %v2390_v15 = vmul.f32 %v2959_v62, %v2389_v49  ;;  %v2396_v20 = vmul.f32 %v2961_v53, %v2324_v61  ;;  %vm2402_vm15 = vweird.f32 %v2961_v53 }
 0x5c7   :  { %vm2403_vm2 = vmor %vm2401_vm1, %vm2402_vm15 }
 0x5c8   :  { %v2394_v6 = vsel %vm2393_vm14, %v2959_v62, %v2390_v15  ;;  %v2397_v17 = vmul.f32 %v2961_v53, %v2396_v20  ;;  %v2963_v62 = vpop.eup %2962 }
 0x5c9   :  { %v2411_v46 = vmul.f32 %v2394_v6, %v4083_v10  ;;  %v1894_v42 = vmul.f32 %v2963_v62, %v1801_v63  ;;  %vm1899_vm4 = vweird.f32 %v2963_v62  ;;  %v1902_v6 = vand.u32 2147483647, %v1801_v63 }
 0x5ca   :  { %v2398_v56 = vmul.f32 0.5, %v2397_v17  ;;  %vm1900_vm5 = vmor %vm1898_vm3, %vm1899_vm4 }
 0x5cb   :  { %v2422_v13 = vmul.f32 %v4057_v29, %v2411_v46  ;;  %v1895_v41 = vsub.f32 1.0, %v1894_v42  ;;  %vm1903_vm6 = vcmp.eq.f32.partialorder %v1902_v6, 8.507059e+37  ;;  %v1931_v6 = vpop.permute.xlu0 %1930 }
 0x5cc   :  { %v2399_v40 = vsub.f32 1.5, %v2398_v56 }
 0x5cd   :  { %v4180_v57 = vadd.f32 %v4063_v35, %v2422_v13 }
 0x5ce   :  { %v2400_v27 = vmul.f32 %v2961_v53, %v2399_v40 }
 0x5cf   :  { %2489 = vmatmul.f32.gmra.mxu0 %v4180_v57 }
 0x5d0   :  { %v2404_v32 = vsel %vm2403_vm2, %v2961_v53, %v2400_v27  ;;  %v1896_v53 = vmul.f32 %v2963_v62, %v1895_v41 }
 0x5d1   :  { %v2412_v0 = vmul.f32 %v2404_v32, %v4097_v44 }
 0x5d2   :  { %v1897_v20 = vadd.f32 %v2963_v62, %v1896_v53 }
 0x5d3   :  { %v2423_v43 = vmul.f32 %v4057_v29, %v2412_v0 }
 0x5d4   :  { %v1901_v17 = vsel %vm1900_vm5, %v2963_v62, %v1897_v20 }
 0x5d5   :  { %v4186_v10 = vadd.f32 %v4063_v35, %v2423_v43  ;;  %v1794_v43 = vmul.f32 %v3929_v1, %v3929_v1 }
 0x5d7   :  { %2492 = vmatmul.f32.gmra.mxu0 %v4186_v10 }
 0x5d8   :  { %v2475_v48 = vpop.f32.mrf.mxu0 }
 0x5d9   :  { %v2476_v4 = vadd.f32 %v4174_v16, %v2475_v48  ;;  %v4233_v48 = vshrl.u32 %v1477_v22, 7 }
 0x5db   :  { %v2497_v26 = vmax.f32 %v2476_v4, 0.0  ;;  %v1802_v4 = vadd.f32 1e-12, %v1794_v43 }
 0x5dd   :  { %2543 = vmatmul.f32.gmra.mxu1 %v2497_v26  ;;  %2964 = vrcp.f32 %v1802_v4  ;;  %vm1913_vm7 = vweird.f32 %v1802_v4 }
 0x5e0   :  { %v2478_v23 = vpop.f32.mrf.mxu0 }
 0x5e1   :  { %v2479_v52 = vadd.f32 %v4174_v16, %v2478_v23  ;;  %v1936_v23 = vpop.permute.xlu1 %1935 }
 0x5e3   :  { %v2498_v47 = vmax.f32 %v2479_v52, 0.0  ;;  %v1792_v52 = vmul.f32 %v3834_v25, %v3834_v25  ;;  %v2965_v1 = vpop.eup %2964 }
 0x5e4   :  { %vm1914_vm8 = vweird.f32 %v2965_v1 }
 0x5e5   :  { %2546 = vmatmul.f32.gmra.mxu1 %v2498_v47  ;;  %vm1915_vm9 = vmor %vm1913_vm7, %vm1914_vm8 }
 0x5e8   :  { %v2481_v39 = vpop.f32.mrf.mxu0 }
 0x5e9   :  { %v2482_v44 = vadd.f32 %v4174_v16, %v2481_v39  ;;  %v1800_v39 = vadd.f32 1e-12, %v1792_v52 }
 0x5eb   :  { %v2499_v36 = vmax.f32 %v2482_v44, 0.0  ;;  %2966 = vrcp.f32 %v1800_v39  ;;  %vm1883_vm11 = vweird.f32 %v1800_v39 }
 0x5ed   :  { %2549 = vmatmul.f32.gmra.mxu1 %v2499_v36 }
 0x607   :  { %v2484_v29 = vpop.f32.mrf.mxu0 }
 0x608   :  { %v2485_v35 = vadd.f32 %v4174_v16, %v2484_v29 }
 0x60a   :  { %v2500_v24 = vmax.f32 %v2485_v35, 0.0  ;;  %v1909_v35 = vmul.f32 %v2965_v1, %v1802_v4 }
 0x60c   :  { %2552 = vmatmul.f32.gmra.mxu1 %v2500_v24 }
 0x60f   :  { %v2487_v14 = vpop.f32.mrf.mxu0 }
 0x610   :  { %v2488_v51 = vadd.f32 %v4174_v16, %v2487_v14 }
 0x612   :  { %v2501_v38 = vmax.f32 %v2488_v51, 0.0 }
 0x614   :  { %2555 = vmatmul.f32.gmra.mxu1 %v2501_v38  ;;  %v1910_v38 = vsub.f32 1.0, %v1909_v35 }
 0x621   :  { %v2541_v31 = vpop.f32.mrf.mxu1 }
 0x622   :  { %v2542_v55 = vadd.f32 %v4197_v12, %v2541_v31 }
 0x624   :  { %v4201_v54 = vadd.f32 %v2542_v55, %v4067_v18 }
 0x626   :  { %2575 = vadd.xlane.f32.xlu2 %v4201_v54 }
 0x64c   :  { %v2490_v3 = vpop.f32.mrf.mxu0 }
 0x64d   :  { %v2491_v45 = vadd.f32 %v4174_v16, %v2490_v3  ;;  %v2967_v3 = vpop.eup %2966 }
 0x64e   :  { %v1879_v50 = vmul.f32 %v2967_v3, %v1800_v39  ;;  %vm1884_vm12 = vweird.f32 %v2967_v3 }
 0x64f   :  { %v2502_v30 = vmax.f32 %v2491_v45, 0.0 }
 0x651   :  { %2558 = vmatmul.f32.gmra.mxu1 %v2502_v30  ;;  %v1911_v30 = vmul.f32 %v2965_v1, %v1910_v38 }
 0x654   :  { %v2493_v60 = vpop.f32.mrf.mxu0 }
 0x655   :  { %v2494_v2 = vadd.f32 %v4174_v16, %v2493_v60 }
 0x657   :  { %v2503_v21 = vmax.f32 %v2494_v2, 0.0  ;;  %v1912_v2 = vadd.f32 %v2965_v1, %v1911_v30 }
 0x659   :  { %2561 = vmatmul.f32.gmra.mxu1 %v2503_v21  ;;  %v1926_v21 = vpop.permute.xlu2 %1925  ;;  %v1916_v62 = vsel %vm1915_vm9, %v2965_v1, %v1912_v2 }
 0x65a   :  { %v2544_v8 = vpop.f32.mrf.mxu1 }
 0x65b   :  { %v2545_v18 = vadd.f32 %v4197_v12, %v2544_v8  ;;  %v4260_v8 = vsel %vm1491_vm0, 1.0, %v3208_v9  ;;  %vm1885_vm0 = vmor %vm1883_vm11, %vm1884_vm12 }
 0x65d   :  { %v2566_v7 = vadd.f32 %v2545_v18, %v4144_v11  ;;  %v1904_v11 = vand.u32 2147483648, %v1801_v63  ;;  %v1917_v63 = vand.u32 2147483647, %v1802_v4 }
 0x65f   :  { %2577 = vadd.xlane.f32.xlu1 %v2566_v7  ;;  %vm1918_vm10 = vcmp.eq.f32.partialorder %v1917_v63, 8.507059e+37 }
 0x661   :  { %v1941_v9 = vpop.permute.xlu2 %1940 }
 0x662   :  { %v2547_v61 = vpop.f32.mrf.mxu1 }
 0x663   :  { %v2548_v5 = vadd.f32 %v4197_v12, %v2547_v61 }
 0x665   :  { %v4212_v19 = vadd.f32 %v2548_v5, %v4150_v33  ;;  %v1905_v33 = vor.u32 1.1754944e-38, %v1904_v11  ;;  %v1889_v5 = vand.u32 2147483648, %v1800_v39 }
 0x667   :  { %2579 = vadd.xlane.f32.xlu0 %v4212_v19  ;;  %v1906_v46 = vsel %vm1903_vm6, %v1905_v33, %v1901_v17  ;;  %v1890_v53 = vor.u32 1.1754944e-38, %v1889_v5 }
 0x668   :  { %v1907_v56 = vmul.f32 -0.5, %v1906_v46 }
 0x66a   :  { %v2550_v16 = vpop.f32.mrf.mxu1 }
 0x66b   :  { %v2551_v49 = vadd.f32 %v4197_v12, %v2550_v16  ;;  %v1887_v16 = vand.u32 2147483647, %v1800_v39 }
 0x66d   :  { %v4217_v15 = vadd.f32 %v2551_v49, %v4156_v59  ;;  %vm1888_vm13 = vcmp.eq.f32.partialorder %v1887_v16, 8.507059e+37 }
 0x66f   :  { %2581 = vadd.xlane.f32.xlu2 %v4217_v15 }
 0x67b   :  { %1955 = vperm.xlu0 %2896, %v1907_v56   ;;  %v1946_v56 = vpop.permute.xlu0 %1945 }
 0x689   :  { %v2553_v13 = vpop.f32.mrf.mxu1 }
 0x68a   :  { %v2554_v40 = vadd.f32 %v4197_v12, %v2553_v13  ;;  %v1479_v13 = vadd.s32 8, %v4233_v48 }
 0x68c   :  { %v4222_v59 = vadd.f32 %v2554_v40, %v4162_v34  ;;  %v1485_v34 = vsub.s32 %v4233_v48, %v3910_v37  ;;  %v1486_v43 = vsub.s32 %v1479_v13, %v3910_v37 }
 0x68e   :  { %2583 = vadd.xlane.f32.xlu2 %v4222_v59  ;;  %v1487_v26 = vcvt.s32.f32 %v1485_v34  ;;  %v1488_v52 = vcvt.s32.f32 %v1486_v43 }
 0x691   :  { %v2556_v27 = vpop.f32.mrf.mxu1 }
 0x692   :  { %v2557_v32 = vadd.f32 %v4197_v12, %v2556_v27 }
 0x694   :  { %v4227_v0 = vadd.f32 %v2557_v32, %v4168_v58  ;;  %v4239_v58 = vmul.f32 %v1487_v26, %v1487_v26 }
 0x696   :  { %2585 = vadd.xlane.f32.xlu1 %v4227_v0  ;;  %v1965_v22 = vmul.f32 %v1936_v23, %v4239_v58  ;;  %v1963_v23 = vmul.f32 %v1926_v21, %v4239_v58 }
 0x698   :  { %v1975_v14 = vmul.f32 1.442695, %v1965_v22  ;;  %v1971_v48 = vmul.f32 1.442695, %v1963_v23 }
 0x699   :  { %v2576_v33 = vpop.xlane.xlu2 %2575 }
 0x69a   :  { %2968 = vpow2.f32 %v1975_v14 }
 0x69b   :  { %2970 = vpow2.f32 %v1971_v48 }
 0x6a0   :  { %v2969_v60 = vpop.eup %2968 }
 0x6a1   :  { %v4263_v18 = vmul.f32 %v2969_v60, %v4260_v8 }
 0x6ce   :  { %v2559_v47 = vpop.f32.mrf.mxu1 }
 0x6cf   :  { %v2560_v44 = vadd.f32 %v4197_v12, %v2559_v47 }
 0x6d1   :  { %v4244_v36 = vadd.f32 %v2560_v44, %v4180_v57  ;;  %v4276_v44 = vmul.f32 %v1488_v52, %v1488_v52 }
 0x6d2   :  { %v2578_v29 = vpop.xlane.xlu1 %2577 }
 0x6d3   :  { %v2592_v24 = vmul.f32 0.03125, %v2578_v29  ;;  %2587 = vadd.xlane.f32.xlu2 %v4244_v36  ;;  %v1966_v1 = vmul.f32 %v1941_v9, %v4276_v44 }
 0x6d5   :  { %v2600_v25 = vsub.f32 %v2566_v7, %v2592_v24  ;;  %v1977_v35 = vmul.f32 1.442695, %v1966_v1  ;;  %v2971_v24 = vpop.eup %2970 }
 0x6d6   :  { %v2562_v51 = vpop.f32.mrf.mxu1 }
 0x6d7   :  { %v2563_v31 = vadd.f32 %v4197_v12, %v2562_v51  ;;  %v4249_v55 = vmul.f32 %v4009_v28, %v2600_v25  ;;  %v1919_v12 = vand.u32 2147483648, %v1802_v4  ;;  %2972 = vpow2.f32 %v1977_v35 }
 0x6d8   :  { %v4289_v25 = vmul.f32 %v2971_v24, %v4260_v8  ;;  %v1964_v51 = vmul.f32 %v1931_v6, %v4276_v44 }
 0x6d9   :  { %v2616_v57 = vmul.f32 %v4249_v55, %v4249_v55  ;;  %v4254_v45 = vadd.f32 %v2563_v31, %v4186_v10  ;;  %v1880_v10 = vsub.f32 1.0, %v1879_v50  ;;  %v1920_v7 = vor.u32 1.1754944e-38, %v1919_v12 }
 0x6da   :  { %v2580_v27 = vpop.xlane.xlu0 %2579  ;;  %v1973_v50 = vmul.f32 1.442695, %v1964_v51 }
 0x6db   :  { %2625 = vadd.xlane.f32.xlu0 %v2616_v57  ;;  %2589 = vadd.xlane.f32.xlu1 %v4254_v45  ;;  %v1881_v61 = vmul.f32 %v2967_v3, %v1880_v10  ;;  %v1921_v42 = vsel %vm1918_vm10, %v1920_v7, %v1916_v62  ;;  %v2593_v34 = vmul.f32 0.03125, %v2580_v27 }
 0x6dc   :  { %v1922_v49 = vmul.f32 -0.5, %v1921_v42  ;;  %2974 = vpow2.f32 %v1973_v50 }
 0x6dd   :  { %v1882_v41 = vadd.f32 %v2967_v3, %v1881_v61  ;;  %v2601_v39 = vsub.f32 %v4212_v19, %v2593_v34  ;;  %v2973_v30 = vpop.eup %2972 }
 0x6de   :  { %v4302_v63 = vmul.f32 %v2973_v30, %v4260_v8 }
 0x6df   :  { %v1886_v11 = vsel %vm1885_vm0, %v2967_v3, %v1882_v41  ;;  %v4279_v37 = vmul.f32 %v4009_v28, %v2601_v39 }
 0x6e0   :  { %v1891_v20 = vsel %vm1888_vm13, %v1890_v53, %v1886_v11 }
 0x6e1   :  { %v1892_v17 = vmul.f32 -0.5, %v1891_v20  ;;  %v2617_v22 = vmul.f32 %v4279_v37, %v4279_v37 }
 0x6e2   :  { %v2582_v46 = vpop.xlane.xlu2 %2581  ;;  %v2975_v61 = vpop.eup %2974 }
 0x6e3   :  { %1999 = vadd.xlane.f32.xlu0 %v4263_v18  ;;  %v2594_v19 = vmul.f32 0.03125, %v2582_v46 }
 0x6e5   :  { %v2602_v31 = vsub.f32 %v4217_v15, %v2594_v19  ;;  %v1967_v15 = vmul.f32 %v1946_v56, %v4239_v58  ;;  %v4345_v19 = vld [vmem:[%s4463_s8] ss:$0 sm:$0xff]  ;;  %s3210_s8 = smov [#allocation11]  }
 0x6e7   :  { %v4297_v60 = vmul.f32 %v4009_v28, %v2602_v31  ;;  %v1979_v62 = vmul.f32 1.442695, %v1967_v15  ;;  %v4350_v31 = vld [vmem:[%s4464_s9] ss:$0 sm:$0xff]  ;;  %s2793_s9 = sshll.u32 %s3210_s8, 4  ;;  %s2794_s9 = int_to_ptr.vmem [resolvable:$true] %s2793_s9 }
 0x6e9   :  { %v2618_v21 = vmul.f32 %v4297_v60, %v4297_v60 }
 0x6eb   :  { %1960 = vperm.xlu2 %2895, %v1922_v49  }
 0x6ed   :  { %v1956_v3 = vpop.permute.xlu0 %1955 }
 0x6ee   :  { %v1969_v12 = vmul.f32 %v1956_v3, %v4239_v58  ;;  %v4314_v58 = vmul.f32 %v2975_v61, %v4260_v8 }
 0x6f0   :  { %v1983_v10 = vmul.f32 1.442695, %v1969_v12 }
 0x6f2   :  { %2976 = vpow2.f32 %v1983_v10 }
 0x6f3   :  { %2978 = vpow2.f32 %v1979_v62 }
 0x6f4   :  { %1950 = vperm.xlu1 %2897, %v1892_v17  }
 0x6f8   :  { %v2977_v42 = vpop.eup %2976 }
 0x6f9   :  { %v2979_v5 = vpop.eup %2978  ;;  %v4318_v41 = vmul.f32 %v2977_v42, %v4260_v8 }
 0x6fa   :  { %v4322_v16 = vmul.f32 %v2979_v5, %v4260_v8 }
 0x701   :  { %v2584_v40 = vpop.xlane.xlu2 %2583 }
 0x702   :  { %v2595_v32 = vmul.f32 0.03125, %v2584_v40 }
 0x704   :  { %v2603_v4 = vsub.f32 %v4222_v59, %v2595_v32  ;;  %v2591_v59 = vmul.f32 0.03125, %v2576_v33 }
 0x706   :  { %v4270_v26 = vmul.f32 %v4009_v28, %v2603_v4  ;;  %v2599_v29 = vsub.f32 %v4201_v54, %v2591_v59 }
 0x708   :  { %v2619_v47 = vmul.f32 %v4270_v26, %v4270_v26  ;;  %v4286_v14 = vmul.f32 %v4009_v28, %v2599_v29 }
 0x709   :  { %v2586_v38 = vpop.xlane.xlu1 %2585 }
 0x70a   :  { %2631 = vadd.xlane.f32.xlu0 %v2619_v47  ;;  %v2615_v54 = vmul.f32 %v4286_v14, %v4286_v14  ;;  %v2596_v57 = vmul.f32 0.03125, %v2586_v38 }
 0x70c   :  { %v2604_v2 = vsub.f32 %v4227_v0, %v2596_v57 }
 0x70e   :  { %v4309_v7 = vmul.f32 %v4009_v28, %v2604_v2 }
 0x710   :  { %v2620_v0 = vmul.f32 %v4309_v7, %v4309_v7 }
 0x714   :  { %2627 = vadd.xlane.f32.xlu2 %v2617_v22 }
 0x71c   :  { %1995 = vadd.xlane.f32.xlu2 %v4289_v25 }
 0x71e   :  { %2623 = vadd.xlane.f32.xlu1 %v2615_v54 }
 0x724   :  { %2001 = vadd.xlane.f32.xlu2 %v4302_v63 }
 0x726   :  { %2629 = vadd.xlane.f32.xlu1 %v2618_v21 }
 0x72c   :  { %2633 = vadd.xlane.f32.xlu2 %v2620_v0 }
 0x72e   :  { %1997 = vadd.xlane.f32.xlu1 %v4314_v58 }
 0x734   :  { %2007 = vadd.xlane.f32.xlu2 %v4318_v41 }
 0x736   :  { %2003 = vadd.xlane.f32.xlu1 %v4322_v16 }
 0x746   :  { %v2588_v49 = vpop.xlane.xlu2 %2587 }
 0x747   :  { %v2597_v9 = vmul.f32 0.03125, %v2588_v49 }
 0x749   :  { %v2605_v53 = vsub.f32 %v4244_v36, %v2597_v9 }
 0x74b   :  { %v4327_v11 = vmul.f32 %v4009_v28, %v2605_v53 }
 0x74d   :  { %v2621_v20 = vmul.f32 %v4327_v11, %v4327_v11 }
 0x74e   :  { %v2590_v6 = vpop.xlane.xlu1 %2589  ;;  %v1961_v33 = vpop.permute.xlu2 %1960 }
 0x74f   :  { %v2598_v17 = vmul.f32 0.03125, %v2590_v6  ;;  %v1970_v46 = vmul.f32 %v1961_v33, %v4276_v44  ;;  %v2626_v56 = vpop.xlane.xlu0 %2625  ;;  %2635 = vadd.xlane.f32.xlu1 %v2621_v20 }
 0x750   :  { %v2640_v13 = vmul.f32 0.03125, %v2626_v56 }
 0x751   :  { %v2606_v40 = vsub.f32 %v4254_v45, %v2598_v17  ;;  %v1985_v27 = vmul.f32 1.442695, %v1970_v46 }
 0x752   :  { %v2648_v32 = vadd.f32 1e-05, %v2640_v13 }
 0x753   :  { %2980 = vpow2.f32 %v1985_v27  ;;  %v4334_v36 = vmul.f32 %v4009_v28, %v2606_v40 }
 0x754   :  { %2982 = vrsqrt.f32 %v2648_v32  ;;  %vm2671_vm15 = vweird.f32 %v2648_v32 }
 0x755   :  { %v2622_v43 = vmul.f32 %v4334_v36, %v4334_v36 }
 0x757   :  { %v2000_v4 = vpop.xlane.xlu0 %1999  ;;  %2637 = vadd.xlane.f32.xlu0 %v2622_v43 }
 0x758   :  { %2984 = vrcp.f32 %v2000_v4  ;;  %v2052_v22 = vand.u32 2147483648, %v2000_v4  ;;  %v2050_v24 = vand.u32 2147483647, %v2000_v4  ;;  %vm2046_vm3 = vweird.f32 %v2000_v4 }
 0x759   :  { %v2981_v34 = vpop.eup %2980 }
 0x75a   :  { %v2983_v23 = vpop.eup %2982  ;;  %v4339_v52 = vmul.f32 %v2981_v34, %v4260_v8  ;;  %v2053_v3 = vor.u32 1.1754944e-38, %v2052_v22  ;;  %vm2051_vm5 = vcmp.eq.f32.partialorder %v2050_v24, 8.507059e+37 }
 0x75b   :  { %v2666_v47 = vmul.f32 %v2983_v23, %v2648_v32  ;;  %vm2672_vm14 = vweird.f32 %v2983_v23 }
 0x75c   :  { %2009 = vadd.xlane.f32.xlu1 %v4339_v52  ;;  %vm2673_vm2 = vmor %vm2671_vm15, %vm2672_vm14 }
 0x75d   :  { %v2667_v45 = vmul.f32 %v2983_v23, %v2666_v47 }
 0x75e   :  { %v2985_v39 = vpop.eup %2984 }
 0x75f   :  { %v2668_v48 = vmul.f32 0.5, %v2667_v45  ;;  %v2042_v28 = vmul.f32 %v2985_v39, %v2000_v4  ;;  %vm2047_vm1 = vweird.f32 %v2985_v39 }
 0x760   :  { %vm2048_vm4 = vmor %vm2046_vm3, %vm2047_vm1 }
 0x761   :  { %v2669_v59 = vsub.f32 1.5, %v2668_v48  ;;  %v2043_v1 = vsub.f32 1.0, %v2042_v28 }
 0x763   :  { %v2670_v29 = vmul.f32 %v2983_v23, %v2669_v59  ;;  %v2044_v35 = vmul.f32 %v2985_v39, %v2043_v1 }
 0x765   :  { %v2674_v51 = vsel %vm2673_vm2, %v2983_v23, %v2670_v29  ;;  %v2045_v38 = vadd.f32 %v2985_v39, %v2044_v35 }
 0x766   :  { %v2736_v54 = vmul.f32 %v2674_v51, %v4249_v55  ;;  %v1951_v57 = vpop.permute.xlu1 %1950 }
 0x767   :  { %v2049_v30 = vsel %vm2048_vm4, %v2985_v39, %v2045_v38  ;;  %v1968_v50 = vmul.f32 %v1951_v57, %v4276_v44 }
 0x768   :  { %v2747_v12 = vmul.f32 %v4345_v19, %v2736_v54  ;;  %v2054_v2 = vsel %vm2051_vm5, %v2053_v3, %v2049_v30 }
 0x769   :  { %v2133_v15 = vmul.f32 %v2054_v2, %v4263_v18  ;;  %v1981_v21 = vmul.f32 1.442695, %v1968_v50 }
 0x76a   :  { %v2758_v10 = vadd.f32 %v4350_v31, %v2747_v12 }
 0x76b   :  { %2775 = vst [vmem:[#allocation12 + $0x10] sm:$0xff] %v2133_v15  ;;  %2986 = vpow2.f32 %v1981_v21 }
 0x76c   :  { %2766 = vst [vmem:[#allocation11 + $0x8] sm:$0xff] %v2758_v10 }
 0x771   :  { %v2987_v62 = vpop.eup %2986 }
 0x772   :  { %v4358_v55 = vmul.f32 %v2987_v62, %v4260_v8 }
 0x774   :  { %2005 = vadd.xlane.f32.xlu0 %v4358_v55 }
 0x77d   :  { %v2632_v61 = vpop.xlane.xlu0 %2631 }
 0x77e   :  { %v2643_v0 = vmul.f32 0.03125, %v2632_v61 }
 0x780   :  { %v2651_v44 = vadd.f32 1e-05, %v2643_v0 }
 0x782   :  { %2988 = vrsqrt.f32 %v2651_v44  ;;  %vm2701_vm7 = vweird.f32 %v2651_v44 }
 0x787   :  { %v2628_v42 = vpop.xlane.xlu2 %2627 }
 0x788   :  { %v2641_v5 = vmul.f32 0.03125, %v2628_v42  ;;  %v2989_v49 = vpop.eup %2988 }
 0x789   :  { %v2696_v18 = vmul.f32 %v2989_v49, %v2651_v44  ;;  %vm2702_vm6 = vweird.f32 %v2989_v49 }
 0x78a   :  { %v2649_v9 = vadd.f32 1e-05, %v2641_v5  ;;  %vm2703_vm8 = vmor %vm2701_vm7, %vm2702_vm6 }
 0x78b   :  { %v2697_v53 = vmul.f32 %v2989_v49, %v2696_v18 }
 0x78c   :  { %2990 = vrsqrt.f32 %v2649_v9  ;;  %vm2681_vm10 = vweird.f32 %v2649_v9 }
 0x78d   :  { %v2698_v20 = vmul.f32 0.5, %v2697_v53 }
 0x78f   :  { %v1996_v6 = vpop.xlane.xlu2 %1995  ;;  %v2699_v33 = vsub.f32 1.5, %v2698_v20 }
 0x790   :  { %2992 = vrcp.f32 %v1996_v6  ;;  %v2022_v1 = vand.u32 2147483648, %v1996_v6  ;;  %v2020_v35 = vand.u32 2147483647, %v1996_v6  ;;  %vm2016_vm0 = vweird.f32 %v1996_v6 }
 0x791   :  { %v2624_v8 = vpop.xlane.xlu1 %2623  ;;  %v2700_v46 = vmul.f32 %v2989_v49, %v2699_v33 }
 0x792   :  { %v2991_v17 = vpop.eup %2990  ;;  %v2639_v56 = vmul.f32 0.03125, %v2624_v8  ;;  %v2023_v50 = vor.u32 1.1754944e-38, %v2022_v1  ;;  %vm2021_vm14 = vcmp.eq.f32.partialorder %v2020_v35, 8.507059e+37 }
 0x793   :  { %v2676_v13 = vmul.f32 %v2991_v17, %v2649_v9  ;;  %v2704_v40 = vsel %vm2703_vm8, %v2989_v49, %v2700_v46  ;;  %vm2682_vm9 = vweird.f32 %v2991_v17 }
 0x794   :  { %v2647_v27 = vadd.f32 1e-05, %v2639_v56  ;;  %v2739_v32 = vmul.f32 %v2704_v40, %v4270_v26  ;;  %vm2683_vm12 = vmor %vm2681_vm10, %vm2682_vm9 }
 0x795   :  { %v2677_v43 = vmul.f32 %v2991_v17, %v2676_v13 }
 0x796   :  { %v2993_v4 = vpop.eup %2992  ;;  %2994 = vrsqrt.f32 %v2647_v27  ;;  %v2750_v34 = vmul.f32 %v4345_v19, %v2739_v32  ;;  %vm2661_vm2 = vweird.f32 %v2647_v27 }
 0x797   :  { %v2678_v23 = vmul.f32 0.5, %v2677_v43  ;;  %v2012_v47 = vmul.f32 %v2993_v4, %v1996_v6  ;;  %v4363_v45 = vpop.xlane.xlu2 %2001  ;;  %vm2017_vm11 = vweird.f32 %v2993_v4 }
 0x798   :  { %2996 = vrcp.f32 %v4363_v45  ;;  %v2761_v39 = vadd.f32 %v4350_v31, %v2750_v34  ;;  %vm2018_vm13 = vmor %vm2016_vm0, %vm2017_vm11  ;;  %v2065_v20 = vand.u32 2147483647, %v4363_v45  ;;  %vm2061_vm4 = vweird.f32 %v4363_v45 }
 0x799   :  { %v2679_v48 = vsub.f32 1.5, %v2678_v23  ;;  %v2013_v28 = vsub.f32 1.0, %v2012_v47  ;;  %v2630_v59 = vpop.xlane.xlu1 %2629 }
 0x79a   :  { %v2642_v26 = vmul.f32 0.03125, %v2630_v59  ;;  %2769 = vst [vmem:[#allocation11 + $0x20] sm:$0xff] %v2761_v39  ;;  %vm2066_vm6 = vcmp.eq.f32.partialorder %v2065_v20, 8.507059e+37 }
 0x79b   :  { %v2680_v22 = vmul.f32 %v2991_v17, %v2679_v48  ;;  %v2014_v29 = vmul.f32 %v2993_v4, %v2013_v28 }
 0x79c   :  { %v2995_v24 = vpop.eup %2994  ;;  %v4367_v51 = vadd.f32 1e-05, %v2642_v26 }
 0x79d   :  { %v2684_v38 = vsel %vm2683_vm12, %v2991_v17, %v2680_v22  ;;  %v2015_v54 = vadd.f32 %v2993_v4, %v2014_v29  ;;  %v2656_v3 = vmul.f32 %v2995_v24, %v2647_v27  ;;  %vm2662_vm15 = vweird.f32 %v2995_v24 }
 0x79e   :  { %v2997_v57 = vpop.eup %2996  ;;  %v2737_v30 = vmul.f32 %v2684_v38, %v4279_v37  ;;  %2998 = vrsqrt.f32 %v4367_v51  ;;  %v2067_v37 = vand.u32 2147483648, %v4363_v45  ;;  %vm2663_vm3 = vmor %vm2661_vm2, %vm2662_vm15  ;;  %vm2691_vm8 = vweird.f32 %v4367_v51 }
 0x79f   :  { %v2019_v12 = vsel %vm2018_vm13, %v2993_v4, %v2015_v54  ;;  %v2657_v2 = vmul.f32 %v2995_v24, %v2656_v3  ;;  %v2057_v15 = vmul.f32 %v2997_v57, %v4363_v45  ;;  %v2634_v21 = vpop.xlane.xlu2 %2633  ;;  %vm2062_vm1 = vweird.f32 %v2997_v57 }
 0x7a0   :  { %v2748_v10 = vmul.f32 %v4345_v19, %v2737_v30  ;;  %v2024_v62 = vsel %vm2021_vm14, %v2023_v50, %v2019_v12  ;;  %v2644_v61 = vmul.f32 0.03125, %v2634_v21  ;;  %vm2063_vm5 = vmor %vm2061_vm4, %vm2062_vm1  ;;  %v2068_v17 = vor.u32 1.1754944e-38, %v2067_v37 }
 0x7a1   :  { %v2131_v0 = vmul.f32 %v2024_v62, %v4289_v25  ;;  %v2658_v44 = vmul.f32 0.5, %v2657_v2  ;;  %v2058_v42 = vsub.f32 1.0, %v2057_v15  ;;  %v4375_v5 = vpop.xlane.xlu1 %1997 }
 0x7a2   :  { %v2759_v49 = vadd.f32 %v4350_v31, %v2748_v10  ;;  %v4378_v18 = vadd.f32 1e-05, %v2644_v61  ;;  %3000 = vrcp.f32 %v4375_v5  ;;  %v2035_v48 = vand.u32 2147483647, %v4375_v5 }
 0x7a3   :  { %2773 = vst [vmem:[#allocation12] sm:$0xff] %v2131_v0  ;;  %v2659_v9 = vsub.f32 1.5, %v2658_v44  ;;  %v2059_v53 = vmul.f32 %v2997_v57, %v2058_v42  ;;  %v2037_v1 = vand.u32 2147483648, %v4375_v5  ;;  %vm2031_vm12 = vweird.f32 %v4375_v5 }
 0x7a4   :  { %v2999_v25 = vpop.eup %2998  ;;  %2767 = vst [vmem:[#allocation11 + $0x10] sm:$0xff] %v2759_v49  ;;  %3002 = vrsqrt.f32 %v4378_v18  ;;  %vm2711_vm11 = vweird.f32 %v4378_v18  ;;  %vm4402_vm0 = vcmp.eq.f32.partialorder %v2035_v48, 8.507059e+37 }
 0x7a5   :  { %v2660_v6 = vmul.f32 %v2995_v24, %v2659_v9  ;;  %v2060_v33 = vadd.f32 %v2997_v57, %v2059_v53  ;;  %v2686_v8 = vmul.f32 %v2999_v25, %v4367_v51  ;;  %vm2692_vm7 = vweird.f32 %v2999_v25 }
 0x7a6   :  { %vm2693_vm10 = vmor %vm2691_vm8, %vm2692_vm7  ;;  %v2038_v50 = vor.u32 1.1754944e-38, %v2037_v1 }
 0x7a7   :  { %v2664_v46 = vsel %vm2663_vm3, %v2995_v24, %v2660_v6  ;;  %v2064_v56 = vsel %vm2063_vm5, %v2997_v57, %v2060_v33  ;;  %v2687_v13 = vmul.f32 %v2999_v25, %v2686_v8  ;;  %v4385_v40 = vpop.xlane.xlu2 %2007 }
 0x7a8   :  { %v3001_v32 = vpop.eup %3000  ;;  %v2735_v27 = vmul.f32 %v2664_v46, %v4286_v14  ;;  %v2069_v43 = vsel %vm2066_vm6, %v2068_v17, %v2064_v56  ;;  %3004 = vrcp.f32 %v4385_v40  ;;  %v2110_v12 = vand.u32 2147483647, %v4385_v40 }
 0x7a9   :  { %v2134_v4 = vmul.f32 %v2069_v43, %v4302_v63  ;;  %v2688_v34 = vmul.f32 0.5, %v2687_v13  ;;  %v2027_v23 = vmul.f32 %v3001_v32, %v4375_v5  ;;  %v4391_v47 = vpop.xlane.xlu1 %2003  ;;  %vm2032_vm9 = vweird.f32 %v3001_v32 }
 0x7aa   :  { %v3003_v45 = vpop.eup %3002  ;;  %v2746_v39 = vmul.f32 %v4345_v19, %v2735_v27  ;;  %3006 = vrcp.f32 %v4391_v47  ;;  %vm2033_vm14 = vmor %vm2031_vm12, %vm2032_vm9  ;;  %v2112_v0 = vand.u32 2147483648, %v4385_v40  ;;  %vm2106_vm2 = vweird.f32 %v4385_v40 }
 0x7ab   :  { %2776 = vst [vmem:[#allocation12 + $0x18] sm:$0xff] %v2134_v4  ;;  %v2689_v28 = vsub.f32 1.5, %v2688_v34  ;;  %v2706_v14 = vmul.f32 %v3003_v45, %v4378_v18  ;;  %v2028_v59 = vsub.f32 1.0, %v2027_v23  ;;  %vm2712_vm13 = vweird.f32 %v3003_v45 }
 0x7ac   :  { %v2757_v63 = vadd.f32 %v4350_v31, %v2746_v39  ;;  %vm2713_vm1 = vmor %vm2711_vm11, %vm2712_vm13  ;;  %v2080_v49 = vand.u32 2147483647, %v4391_v47  ;;  %v2082_v9 = vand.u32 2147483648, %v4391_v47  ;;  %v2113_v6 = vor.u32 1.1754944e-38, %v2112_v0 }
 0x7ad   :  { %v2690_v26 = vmul.f32 %v2999_v25, %v2689_v28  ;;  %v2707_v22 = vmul.f32 %v3003_v45, %v2706_v14  ;;  %v2029_v29 = vmul.f32 %v3001_v32, %v2028_v59  ;;  %vm2111_vm5 = vcmp.eq.f32.partialorder %v2110_v12, 8.507059e+37 }
 0x7ae   :  { %v3005_v35 = vpop.eup %3004  ;;  %2765 = vst [vmem:[#allocation11] sm:$0xff] %v2757_v63  ;;  %vm2076_vm6 = vweird.f32 %v4391_v47  ;;  %v2083_v46 = vor.u32 1.1754944e-38, %v2082_v9  ;;  %vm2081_vm8 = vcmp.eq.f32.partialorder %v2080_v49, 8.507059e+37 }
 0x7af   :  { %v2694_v38 = vsel %vm2693_vm10, %v2999_v25, %v2690_v26  ;;  %v2708_v54 = vmul.f32 0.5, %v2707_v22  ;;  %v2030_v51 = vadd.f32 %v3001_v32, %v2029_v29  ;;  %v2102_v3 = vmul.f32 %v3005_v35, %v4385_v40 }
 0x7b0   :  { %v3007_v57 = vpop.eup %3006  ;;  %v2738_v30 = vmul.f32 %v2694_v38, %v4297_v60  ;;  %vm2107_vm15 = vweird.f32 %v3005_v35 }
 0x7b1   :  { %v2709_v2 = vsub.f32 1.5, %v2708_v54  ;;  %v2034_v15 = vsel %vm2033_vm14, %v3001_v32, %v2030_v51  ;;  %v2103_v21 = vsub.f32 1.0, %v2102_v3  ;;  %v2072_v10 = vmul.f32 %v3007_v57, %v4391_v47  ;;  %vm2108_vm4 = vmor %vm2106_vm2, %vm2107_vm15 }
 0x7b2   :  { %v2749_v62 = vmul.f32 %v4345_v19, %v2738_v30  ;;  %v2039_v61 = vsel %vm4402_vm0, %v2038_v50, %v2034_v15  ;;  %vm2077_vm3 = vweird.f32 %v3007_v57 }
 0x7b3   :  { %v2710_v44 = vmul.f32 %v3003_v45, %v2709_v2  ;;  %v2132_v60 = vmul.f32 %v2039_v61, %v4314_v58  ;;  %v2104_v42 = vmul.f32 %v3005_v35, %v2103_v21  ;;  %v2073_v37 = vsub.f32 1.0, %v2072_v10  ;;  %vm2078_vm7 = vmor %vm2076_vm6, %vm2077_vm3 }
 0x7b4   :  { %v2760_v5 = vadd.f32 %v4350_v31, %v2749_v62 }
 0x7b5   :  { %v2714_v53 = vsel %vm2713_vm1, %v3003_v45, %v2710_v44  ;;  %2774 = vst [vmem:[#allocation12 + $0x8] sm:$0xff] %v2132_v60  ;;  %v2105_v20 = vadd.f32 %v3005_v35, %v2104_v42  ;;  %v2074_v25 = vmul.f32 %v3007_v57, %v2073_v37 }
 0x7b6   :  { %2768 = vst [vmem:[#allocation11 + $0x18] sm:$0xff] %v2760_v5  ;;  %v2740_v58 = vmul.f32 %v2714_v53, %v4309_v7 }
 0x7b7   :  { %v2109_v33 = vsel %vm2108_vm4, %v3005_v35, %v2105_v20  ;;  %v2075_v18 = vadd.f32 %v3007_v57, %v2074_v25 }
 0x7b8   :  { %v2751_v8 = vmul.f32 %v4345_v19, %v2740_v58  ;;  %v2114_v17 = vsel %vm2111_vm5, %v2113_v6, %v2109_v33 }
 0x7b9   :  { %v2137_v56 = vmul.f32 %v2114_v17, %v4318_v41  ;;  %v2079_v13 = vsel %vm2078_vm7, %v3007_v57, %v2075_v18 }
 0x7ba   :  { %v2762_v40 = vadd.f32 %v4350_v31, %v2751_v8  ;;  %v2084_v7 = vsel %vm2081_vm8, %v2083_v46, %v2079_v13 }
 0x7bb   :  { %2779 = vst [vmem:[#allocation12 + $0x30] sm:$0xff] %v2137_v56  ;;  %v2135_v32 = vmul.f32 %v2084_v7, %v4322_v16 }
 0x7bc   :  { %2770 = vst [vmem:[#allocation11 + $0x28] sm:$0xff] %v2762_v40 }
 0x7bd   :  { %2777 = vst [vmem:[#allocation12 + $0x20] sm:$0xff] %v2135_v32 }
 0x7c2   :  { %v2636_v27 = vpop.xlane.xlu1 %2635 }
 0x7c3   :  { %v2645_v43 = vmul.f32 0.03125, %v2636_v27 }
 0x7c5   :  { %v2653_v4 = vadd.f32 1e-05, %v2645_v43 }
 0x7c7   :  { %3008 = vrsqrt.f32 %v2653_v4  ;;  %vm2721_vm10 = vweird.f32 %v2653_v4 }
 0x7ca   :  { %v2638_v34 = vpop.xlane.xlu0 %2637 }
 0x7cb   :  { %v2646_v23 = vmul.f32 0.03125, %v2638_v34 }
 0x7cd   :  { %v3009_v47 = vpop.eup %3008  ;;  %v2654_v45 = vadd.f32 1e-05, %v2646_v23 }
 0x7ce   :  { %v2716_v39 = vmul.f32 %v3009_v47, %v2653_v4  ;;  %vm2722_vm9 = vweird.f32 %v3009_v47 }
 0x7cf   :  { %3010 = vrsqrt.f32 %v2654_v45  ;;  %v2010_v41 = vpop.xlane.xlu1 %2009  ;;  %vm2723_vm11 = vmor %vm2721_vm10, %vm2722_vm9  ;;  %vm2731_vm14 = vweird.f32 %v2654_v45 }
 0x7d0   :  { %v2717_v48 = vmul.f32 %v3009_v47, %v2716_v39  ;;  %3012 = vrcp.f32 %v2010_v41  ;;  %v2127_v54 = vand.u32 2147483648, %v2010_v41  ;;  %v2125_v57 = vand.u32 2147483647, %v2010_v41 }
 0x7d1   :  { %vm2121_vm13 = vweird.f32 %v2010_v41 }
 0x7d2   :  { %v2718_v28 = vmul.f32 0.5, %v2717_v48  ;;  %v2128_v15 = vor.u32 1.1754944e-38, %v2127_v54  ;;  %vm2126_vm2 = vcmp.eq.f32.partialorder %v2125_v57, 8.507059e+37 }
 0x7d4   :  { %v2719_v14 = vsub.f32 1.5, %v2718_v28 }
 0x7d5   :  { %v3011_v59 = vpop.eup %3010 }
 0x7d6   :  { %v3013_v16 = vpop.eup %3012  ;;  %v2720_v63 = vmul.f32 %v3009_v47, %v2719_v14  ;;  %v2726_v1 = vmul.f32 %v3011_v59, %v2654_v45  ;;  %vm2732_vm0 = vweird.f32 %v3011_v59 }
 0x7d7   :  { %v2117_v26 = vmul.f32 %v3013_v16, %v2010_v41  ;;  %vm2122_vm12 = vweird.f32 %v3013_v16  ;;  %vm2733_vm1 = vmor %vm2731_vm14, %vm2732_vm0 }
 0x7d8   :  { %v2724_v22 = vsel %vm2723_vm11, %v3009_v47, %v2720_v63  ;;  %v2727_v29 = vmul.f32 %v3011_v59, %v2726_v1  ;;  %vm2123_vm15 = vmor %vm2121_vm13, %vm2122_vm12 }
 0x7d9   :  { %v2741_v35 = vmul.f32 %v2724_v22, %v4327_v11  ;;  %v2118_v24 = vsub.f32 1.0, %v2117_v26 }
 0x7da   :  { %v2728_v38 = vmul.f32 0.5, %v2727_v29 }
 0x7db   :  { %v2752_v51 = vmul.f32 %v4345_v19, %v2741_v35  ;;  %v2119_v3 = vmul.f32 %v3013_v16, %v2118_v24 }
 0x7dc   :  { %v2729_v30 = vsub.f32 1.5, %v2728_v38 }
 0x7dd   :  { %v2763_v50 = vadd.f32 %v4350_v31, %v2752_v51  ;;  %v2120_v12 = vadd.f32 %v3013_v16, %v2119_v3 }
 0x7de   :  { %v2730_v2 = vmul.f32 %v3011_v59, %v2729_v30 }
 0x7df   :  { %2771 = vst [vmem:[#allocation11 + $0x30] sm:$0xff] %v2763_v50  ;;  %v2124_v11 = vsel %vm2123_vm15, %v3013_v16, %v2120_v12 }
 0x7e0   :  { %v2734_v21 = vsel %vm2733_vm1, %v3011_v59, %v2730_v2  ;;  %v2129_v10 = vsel %vm2126_vm2, %v2128_v15, %v2124_v11 }
 0x7e1   :  { %v2742_v62 = vmul.f32 %v2734_v21, %v4334_v36  ;;  %v2138_v61 = vmul.f32 %v2129_v10, %v4339_v52 }
 0x7e3   :  { %v2753_v0 = vmul.f32 %v4345_v19, %v2742_v62  ;;  %2780 = vst [vmem:[#allocation12 + $0x38] sm:$0xff] %v2138_v61 }
 0x7e5   :  { %v2764_v44 = vadd.f32 %v4350_v31, %v2753_v0 }
 0x7e7   :  { %2772 = vst [vmem:[#allocation11 + $0x38] sm:$0xff] %v2764_v44  ;;  %v2006_v60 = vpop.xlane.xlu0 %2005 }
 0x7e8   :  { %3014 = vrcp.f32 %v2006_v60  ;;  %2801 = dma.vmem_to_hbm [thread:$0]  %s2794_s9, 1024, %s2796_s1, [#allocation5], %s3203_s15, %s3203_s15, %s3204_s16   ;;  %v2097_v37 = vand.u32 2147483648, %v2006_v60  ;;  %v2095_v49 = vand.u32 2147483647, %v2006_v60  ;;  %vm2091_vm4 = vweird.f32 %v2006_v60 }
 0x7ea   :  { %v2098_v31 = vor.u32 1.1754944e-38, %v2097_v37  ;;  %vm2096_vm6 = vcmp.eq.f32.partialorder %v2095_v49, 8.507059e+37 }
 0x7ee   :  { %v3015_v36 = vpop.eup %3014 }
 0x7ef   :  { %v2087_v52 = vmul.f32 %v3015_v36, %v2006_v60  ;;  %vm2092_vm3 = vweird.f32 %v3015_v36 }
 0x7f0   :  { %vm2093_vm5 = vmor %vm2091_vm4, %vm2092_vm3 }
 0x7f1   :  { %v2088_v42 = vsub.f32 1.0, %v2087_v52 }
 0x7f3   :  { %v2089_v5 = vmul.f32 %v3015_v36, %v2088_v42 }
 0x7f5   :  { %v2090_v19 = vadd.f32 %v3015_v36, %v2089_v5 }
 0x7f7   :  { %v2094_v9 = vsel %vm2093_vm5, %v3015_v36, %v2090_v19 }
 0x7f8   :  { %v2099_v53 = vsel %vm2096_vm6, %v2098_v31, %v2094_v9 }
 0x7f9   :  { %v2136_v20 = vmul.f32 %v2099_v53, %v4358_v55 }
 0x7fb   :  { %2778 = vst [vmem:[#allocation12 + $0x28] sm:$0xff] %v2136_v20 }
 0x7fc   :  { %2814 = dma.vmem_to_hbm [thread:$0]  %s2807_s17, 1024, %s2809_s0, [#allocation13], %s3203_s15, %s3203_s15, %s3204_s16  }
 0x7fd   :  { %2827 = dma.vmem_to_hbm [thread:$0]  %s2820_s21, 1024, %s2822_s24, [#allocation13], %s3203_s15, %s3203_s15, %s3204_s16  }
 0x7fe   :  { %3195 = dma.done.wait [#allocation5], 1024  }
 0x7ff   :  { %3196 = vsyncadd [#allocation5], 4294966272 }
 0x800   :  { %3197 = dma.done.wait [#allocation13], 2048  }
 0x801   :  { %3198 = vsyncadd [#allocation13], 4294965248 }
 0x802   :  { %2840 = vsyncpa [#allocation4], 1 }
 0x803   :  { %2841 = vsyncpa [#allocation7], 1 }
 0x804   :  { %2842 = vsyncpa [#allocation10], 1 }
 0x805   :  { %2843 = vsyncpa [#allocation5], 1 }
 0x806   :  { %2844 = vsyncpa [#allocation13], 1 }

</bundles_post_ra>
